<compile_context>
chip_gen: v6e
topology: v6e:2x2x1
jax: 0.10.0
libtpu: 0.0.40
codegen_flags: <defaults>
</compile_context>

<pallas_src>
import functools
import math

import jax
import jax.numpy as jnp
import numpy as np
from jax import lax
from jax.experimental import pallas as pl
from jax.experimental.pallas import tpu as pltpu


PARAM_ORDER = [
    # masked self-attention (fused QKV + output projection)
    "w_qkv1", "b_qkv1", "wo1", "bo1",
    # layer_norm_1 affine
    "g1", "be1",
    # cross-attention (Q on decoder stream, fused KV on encoder stream)
    "wq2", "bq2", "w_kv2", "b_kv2", "wo2", "bo2",
    # layer_norm_2 affine (re-used by the last two add&norms, as in the module)
    "g2", "be2",
    # feed-forward
    "wf1", "bf1", "wf2", "bf2",
]


def layer_norm(x, gamma, beta, eps=1e-5):
    mu = jnp.mean(x, axis=-1, keepdims=True)
    var = jnp.mean((x - mu) ** 2, axis=-1, keepdims=True)
    return gamma * (x - mu) * lax.rsqrt(var + eps) + beta


def _softmax(s):
    m = jnp.max(s, axis=-1, keepdims=True)
    e = jnp.exp(s - m)
    return e / jnp.sum(e, axis=-1, keepdims=True)   # exact divide (matches ref)


def _attention_core(q2d, k2d, v2d, B, Sq, Sk, H, D, causal):
    """Attention core on lane-concatenated per-head slabs.

    q2d: (B*Sq, H*D) bf16, k2d/v2d: (B*Sk, H*D) bf16. Returns (B*Sq, H*D) f32.
    The 1/sqrt(D) scale is already folded into the Q projection weights.
    """
    bias = None
    if causal:
        row = lax.broadcasted_iota(jnp.int32, (Sq, Sk), 0)
        col = lax.broadcasted_iota(jnp.int32, (Sq, Sk), 1)
        bias = jnp.where(col <= row, jnp.float32(0.0), jnp.float32(-1e9))

    ctx_rows = []
    for b in range(B):                       # static (B=2) — unrolled at trace
        qb = q2d[b * Sq:(b + 1) * Sq]
        kb = k2d[b * Sk:(b + 1) * Sk]
        vb = v2d[b * Sk:(b + 1) * Sk]
        heads = []
        for h in range(H):                   # static (H=4) — unrolled at trace
            sl = slice(h * D, (h + 1) * D)
            # (Sq, D) x (Sk, D)^T contraction without an explicit transpose.
            s = lax.dot_general(qb[:, sl], kb[:, sl],
                                (((1,), (1,)), ((), ())),
                                preferred_element_type=jnp.float32)
            if causal:
                s = s + bias
            p = _softmax(s)
            heads.append(jnp.dot(p.astype(jnp.bfloat16), vb[:, sl],
                                 preferred_element_type=jnp.float32))
        ctx_rows.append(jnp.concatenate(heads, axis=-1))    # (Sq, H*D)
    return jnp.concatenate(ctx_rows, axis=0)                # (B*Sq, H*D)


def decoder_layer_body(x, enc, p, *, num_heads):
    """Forward math for the whole batch; used inside the kernel and as ref."""
    B, S, E = x.shape
    Se = enc.shape[1]
    H = num_heads
    D = E // H

    x2d = x.reshape(B * S, E)
    enc2d = enc.reshape(B * Se, E)

    # ---- masked (causal) self-attention: fused QKV projection (N = 3E) -----
    xb = x2d.astype(jnp.bfloat16)            # cast once, reused below
    qkv = jnp.dot(xb, p["w_qkv1"],
                  preferred_element_type=jnp.float32) + p["b_qkv1"]
    qkv = qkv.astype(jnp.bfloat16)
    q1, k1, v1 = qkv[:, :E], qkv[:, E:2 * E], qkv[:, 2 * E:]
    ctx1 = _attention_core(q1, k1, v1, B, S, S, H, D, causal=True)
    a = jnp.dot(ctx1.astype(jnp.bfloat16), p["wo1"],
                preferred_element_type=jnp.float32) + p["bo1"]
    # dropout(identity) + add & LN1
    x1 = layer_norm(a + x2d, p["g1"], p["be1"])

    # ---- cross attention: queries from decoder stream, K/V from encoder ----
    x1b = x1.astype(jnp.bfloat16)
    encb = enc2d.astype(jnp.bfloat16)
    q2 = (jnp.dot(x1b, p["wq2"], preferred_element_type=jnp.float32)
          + p["bq2"]).astype(jnp.bfloat16)
    kv2 = (jnp.dot(encb, p["w_kv2"], preferred_element_type=jnp.float32)
           + p["b_kv2"]).astype(jnp.bfloat16)
    k2, v2 = kv2[:, :E], kv2[:, E:]
    ctx2 = _attention_core(q2, k2, v2, B, S, Se, H, D, causal=False)
    c = jnp.dot(ctx2.astype(jnp.bfloat16), p["wo2"],
                preferred_element_type=jnp.float32) + p["bo2"]
    x2 = layer_norm(c + x1, p["g2"], p["be2"])

    # ---- feed-forward: Linear -> ReLU -> Dropout(id) -> Linear -> Dropout(id)
    h = jnp.maximum(
        jnp.dot(x2.astype(jnp.bfloat16), p["wf1"],
                preferred_element_type=jnp.float32) + p["bf1"], 0.0)
    f = jnp.dot(h.astype(jnp.bfloat16), p["wf2"],
                preferred_element_type=jnp.float32) + p["bf2"]
    # NOTE: the PyTorch module re-uses layer_norm_2 for the final add & norm.
    out = layer_norm(f + x2, p["g2"], p["be2"])
    return out.reshape(B, S, E)


def make_kernel(num_heads):
    def kernel(x_ref, enc_ref, *rest):
        param_refs, out_ref = rest[:-1], rest[-1]
        p = {name: r[...] for name, r in zip(PARAM_ORDER, param_refs)}
        out_ref[...] = decoder_layer_body(x_ref[...], enc_ref[...], p,
                                          num_heads=num_heads)
    return kernel


def prepare_params(raw, num_heads):
    """Host-side layout plumbing.

    * Fuse [Wq | Wk | Wv] into one (E, 3E) slab (and [Wk | Wv] for cross
      attention) so the projections are single full-width MXU matmuls.
    * Fold 1/sqrt(D) into Wq / bq (in f32, before the bf16 cast) so no VPU
      pass over the score tensor is needed.
    * Matmul weights cast to bf16 (halves DMA bytes, feeds the bf16 MXU
      path); biases / LayerNorm affine stay f32 and lane-dense.
    """
    E = raw["wq1"].shape[0]
    D = E // num_heads
    scale = jnp.float32(1.0 / math.sqrt(D))

    out = {}
    # self-attention
    out["w_qkv1"] = jnp.concatenate(
        [raw["wq1"] * scale, raw["wk1"], raw["wv1"]], axis=1).astype(jnp.bfloat16)
    out["b_qkv1"] = jnp.concatenate(
        [raw["bq1"] * scale, raw["bk1"], raw["bv1"]], axis=1).astype(jnp.float32)
    out["wo1"] = raw["wo1"].astype(jnp.bfloat16)
    out["bo1"] = raw["bo1"].astype(jnp.float32)
    out["g1"] = raw["g1"].astype(jnp.float32)
    out["be1"] = raw["be1"].astype(jnp.float32)
    # cross-attention
    out["wq2"] = (raw["wq2"] * scale).astype(jnp.bfloat16)
    out["bq2"] = (raw["bq2"] * scale).astype(jnp.float32)
    out["w_kv2"] = jnp.concatenate(
        [raw["wk2"], raw["wv2"]], axis=1).astype(jnp.bfloat16)
    out["b_kv2"] = jnp.concatenate(
        [raw["bk2"], raw["bv2"]], axis=1).astype(jnp.float32)
    out["wo2"] = raw["wo2"].astype(jnp.bfloat16)
    out["bo2"] = raw["bo2"].astype(jnp.float32)
    out["g2"] = raw["g2"].astype(jnp.float32)
    out["be2"] = raw["be2"].astype(jnp.float32)
    # feed-forward
    out["wf1"] = raw["wf1"].astype(jnp.bfloat16)
    out["bf1"] = raw["bf1"].astype(jnp.float32)
    out["wf2"] = raw["wf2"].astype(jnp.bfloat16)
    out["bf2"] = raw["bf2"].astype(jnp.float32)
    return out


def _cost_estimate(x, enc, params, num_heads):
    B, S, E = x.shape
    Se = enc.shape[1]
    H, D = num_heads, E // num_heads
    F = params["wf1"].shape[-1]
    BS, BSe = B * S, B * Se
    flops = (2 * BS * E * 3 * E + 2 * BS * E * E          # self-attn qkv + out
             + B * H * (2 * S * S * D) * 2                # scores + ctx
             + 2 * BS * E * E + 2 * BSe * E * 2 * E       # cross q + kv
             + 2 * BS * E * E                             # cross out proj
             + B * H * (2 * S * Se * D) * 2               # cross scores + ctx
             + 2 * BS * E * F + 2 * BS * F * E)           # FFN
    transcendentals = B * H * S * (S + Se) + 3 * BS
    bytes_accessed = (x.size * x.dtype.itemsize
                      + enc.size * enc.dtype.itemsize
                      + B * S * E * 4
                      + sum(int(p.size) * p.dtype.itemsize
                            for p in params.values()))
    return pl.CostEstimate(flops=int(flops),
                           transcendentals=int(transcendentals),
                           bytes_accessed=int(bytes_accessed))


def decoder_layer_pallas(x, enc, params, num_heads):
    """params must already be in the fused layout from prepare_params."""
    B, S, E = x.shape
    param_list = [params[k] for k in PARAM_ORDER]

    def full_spec(arr):
        nd = arr.ndim
        return pl.BlockSpec(arr.shape, lambda i, _nd=nd: (0,) * _nd)

    # Single program over the whole batch: all matmuls run on (B*S, E) slabs
    # and there is no per-step pipeline overhead at these sizes.
    in_specs = [full_spec(x), full_spec(enc)] + [full_spec(p) for p in param_list]

    return pl.pallas_call(
        make_kernel(num_heads),
        out_shape=jax.ShapeDtypeStruct((B, S, E), jnp.float32),
        grid=(1,),
        in_specs=in_specs,
        out_specs=full_spec(x),
        compiler_params=pltpu.CompilerParams(
            dimension_semantics=("arbitrary",),
            # TODO(synk): make generation-aware (<=~40 MiB on v7x) and stream
            # FFN weights / single-buffer constants at production sizes.
            vmem_limit_bytes=32 * 1024 * 1024),
        cost_estimate=_cost_estimate(x, enc, params, num_heads),
    )(x, enc, *param_list)


if __name__ == "__main__":
    # Small but TPU-friendly shapes: E is a multiple of 128 so activations,
    # weights and the output are lane-dense (no masked vst on the last axis).
    B, S, Se = 2, 16, 8          # batch, decoder seq, encoder seq
    E, H, F = 128, 4, 256        # embedding, heads, ff hidden

    key = jax.random.PRNGKey(0)
    ks = iter(jax.random.split(key, 32))

    def w(shape):
        return 0.1 * jax.random.normal(next(ks), shape, jnp.float32)

    raw_params = {
        # masked self-attention projections (stored (in, out); y = x @ W + b)
        "wq1": w((E, E)), "bq1": w((1, E)),
        "wk1": w((E, E)), "bk1": w((1, E)),
        "wv1": w((E, E)), "bv1": w((1, E)),
        "wo1": w((E, E)), "bo1": w((1, E)),
        # layer_norm_1 affine
        "g1": 1.0 + w((1, E)), "be1": w((1, E)),
        # cross-attention projections
        "wq2": w((E, E)), "bq2": w((1, E)),
        "wk2": w((E, E)), "bk2": w((1, E)),
        "wv2": w((E, E)), "bv2": w((1, E)),
        "wo2": w((E, E)), "bo2": w((1, E)),
        # layer_norm_2 affine (shared by the last two add&norms)
        "g2": 1.0 + w((1, E)), "be2": w((1, E)),
        # feed-forward
        "wf1": w((E, F)), "bf1": w((1, F)),
        "wf2": w((F, E)), "bf2": w((1, E)),
    }
    params = prepare_params(raw_params, H)

    x = jax.random.normal(next(ks), (B, S, E), jnp.float32)
    encoder_output = jax.random.normal(next(ks), (B, Se, E), jnp.float32)

    out = jax.block_until_ready(decoder_layer_pallas(x, encoder_output, params, H))

    # Plain-JAX reference: EXACTLY the same body (same fused bf16 weights,
    # same exact softmax divide) — only backend lowering differs.
    ref_fn = jax.jit(functools.partial(decoder_layer_body, num_heads=H))
    ref = jax.block_until_ready(ref_fn(x, encoder_output, params))

    np.testing.assert_allclose(np.asarray(out), np.asarray(ref),
                               rtol=1e-2, atol=1e-2)
    print("KERNEL_OK")
</pallas_src>

<mosaic_0001>
module attributes {stable_mosaic.version = 11 : i64} {
  func.func @kernel(%arg0: i32, %arg1: memref<2x16x128xf32, #tpu.memory_space<vmem>>, %arg2: memref<2x8x128xf32, #tpu.memory_space<vmem>>, %arg3: memref<128x384xbf16, #tpu.memory_space<vmem>>, %arg4: memref<1x384xf32, #tpu.memory_space<vmem>>, %arg5: memref<128x128xbf16, #tpu.memory_space<vmem>>, %arg6: memref<1x128xf32, #tpu.memory_space<vmem>>, %arg7: memref<1x128xf32, #tpu.memory_space<vmem>>, %arg8: memref<1x128xf32, #tpu.memory_space<vmem>>, %arg9: memref<128x128xbf16, #tpu.memory_space<vmem>>, %arg10: memref<1x128xf32, #tpu.memory_space<vmem>>, %arg11: memref<128x256xbf16, #tpu.memory_space<vmem>>, %arg12: memref<1x256xf32, #tpu.memory_space<vmem>>, %arg13: memref<128x128xbf16, #tpu.memory_space<vmem>>, %arg14: memref<1x128xf32, #tpu.memory_space<vmem>>, %arg15: memref<1x128xf32, #tpu.memory_space<vmem>>, %arg16: memref<1x128xf32, #tpu.memory_space<vmem>>, %arg17: memref<128x256xbf16, #tpu.memory_space<vmem>>, %arg18: memref<1x256xf32, #tpu.memory_space<vmem>>, %arg19: memref<256x128xbf16, #tpu.memory_space<vmem>>, %arg20: memref<1x128xf32, #tpu.memory_space<vmem>>, %arg21: memref<2x16x128xf32, #tpu.memory_space<vmem>>) attributes {dimension_semantics = [#tpu.dimension_semantics<arbitrary>], iteration_bounds = array<i64: 1>, scalar_prefetch = 0 : i64, scratch_operands = 0 : i64, tpu.core_type = #tpu.core_type<tc>, window_params = [{pipeline_mode = #tpu.pipeline_mode<synchronous>, transform_indices = @transform_0, window_bounds = array<i64: 2, 16, 128>}, {pipeline_mode = #tpu.pipeline_mode<synchronous>, transform_indices = @transform_1, window_bounds = array<i64: 2, 8, 128>}, {pipeline_mode = #tpu.pipeline_mode<synchronous>, transform_indices = @transform_2, window_bounds = array<i64: 128, 384>}, {pipeline_mode = #tpu.pipeline_mode<synchronous>, transform_indices = @transform_3, window_bounds = array<i64: 1, 384>}, {pipeline_mode = #tpu.pipeline_mode<synchronous>, transform_indices = @transform_4, window_bounds = array<i64: 128, 128>}, {pipeline_mode = #tpu.pipeline_mode<synchronous>, transform_indices = @transform_5, window_bounds = array<i64: 1, 128>}, {pipeline_mode = #tpu.pipeline_mode<synchronous>, transform_indices = @transform_6, window_bounds = array<i64: 1, 128>}, {pipeline_mode = #tpu.pipeline_mode<synchronous>, transform_indices = @transform_7, window_bounds = array<i64: 1, 128>}, {pipeline_mode = #tpu.pipeline_mode<synchronous>, transform_indices = @transform_8, window_bounds = array<i64: 128, 128>}, {pipeline_mode = #tpu.pipeline_mode<synchronous>, transform_indices = @transform_9, window_bounds = array<i64: 1, 128>}, {pipeline_mode = #tpu.pipeline_mode<synchronous>, transform_indices = @transform_10, window_bounds = array<i64: 128, 256>}, {pipeline_mode = #tpu.pipeline_mode<synchronous>, transform_indices = @transform_11, window_bounds = array<i64: 1, 256>}, {pipeline_mode = #tpu.pipeline_mode<synchronous>, transform_indices = @transform_12, window_bounds = array<i64: 128, 128>}, {pipeline_mode = #tpu.pipeline_mode<synchronous>, transform_indices = @transform_13, window_bounds = array<i64: 1, 128>}, {pipeline_mode = #tpu.pipeline_mode<synchronous>, transform_indices = @transform_14, window_bounds = array<i64: 1, 128>}, {pipeline_mode = #tpu.pipeline_mode<synchronous>, transform_indices = @transform_15, window_bounds = array<i64: 1, 128>}, {pipeline_mode = #tpu.pipeline_mode<synchronous>, transform_indices = @transform_16, window_bounds = array<i64: 128, 256>}, {pipeline_mode = #tpu.pipeline_mode<synchronous>, transform_indices = @transform_17, window_bounds = array<i64: 1, 256>}, {pipeline_mode = #tpu.pipeline_mode<synchronous>, transform_indices = @transform_18, window_bounds = array<i64: 256, 128>}, {pipeline_mode = #tpu.pipeline_mode<synchronous>, transform_indices = @transform_19, window_bounds = array<i64: 1, 128>}, {pipeline_mode = #tpu.pipeline_mode<synchronous>, transform_indices = @transform_20, window_bounds = array<i64: 2, 16, 128>}]} {
    %c0 = arith.constant 0 : index
    %c0_0 = arith.constant 0 : index
    %0 = vector.load %arg3[%c0, %c0_0] : memref<128x384xbf16, #tpu.memory_space<vmem>>, vector<128x384xbf16>
    %c0_1 = arith.constant 0 : index
    %c0_2 = arith.constant 0 : index
    %1 = vector.load %arg4[%c0_1, %c0_2] : memref<1x384xf32, #tpu.memory_space<vmem>>, vector<1x384xf32>
    %c0_3 = arith.constant 0 : index
    %c0_4 = arith.constant 0 : index
    %2 = vector.load %arg5[%c0_3, %c0_4] : memref<128x128xbf16, #tpu.memory_space<vmem>>, vector<128x128xbf16>
    %c0_5 = arith.constant 0 : index
    %c0_6 = arith.constant 0 : index
    %3 = vector.load %arg6[%c0_5, %c0_6] : memref<1x128xf32, #tpu.memory_space<vmem>>, vector<1x128xf32>
    %c0_7 = arith.constant 0 : index
    %c0_8 = arith.constant 0 : index
    %4 = vector.load %arg7[%c0_7, %c0_8] : memref<1x128xf32, #tpu.memory_space<vmem>>, vector<1x128xf32>
    %c0_9 = arith.constant 0 : index
    %c0_10 = arith.constant 0 : index
    %5 = vector.load %arg8[%c0_9, %c0_10] : memref<1x128xf32, #tpu.memory_space<vmem>>, vector<1x128xf32>
    %c0_11 = arith.constant 0 : index
    %c0_12 = arith.constant 0 : index
    %6 = vector.load %arg9[%c0_11, %c0_12] : memref<128x128xbf16, #tpu.memory_space<vmem>>, vector<128x128xbf16>
    %c0_13 = arith.constant 0 : index
    %c0_14 = arith.constant 0 : index
    %7 = vector.load %arg10[%c0_13, %c0_14] : memref<1x128xf32, #tpu.memory_space<vmem>>, vector<1x128xf32>
    %c0_15 = arith.constant 0 : index
    %c0_16 = arith.constant 0 : index
    %8 = vector.load %arg11[%c0_15, %c0_16] : memref<128x256xbf16, #tpu.memory_space<vmem>>, vector<128x256xbf16>
    %c0_17 = arith.constant 0 : index
    %c0_18 = arith.constant 0 : index
    %9 = vector.load %arg12[%c0_17, %c0_18] : memref<1x256xf32, #tpu.memory_space<vmem>>, vector<1x256xf32>
    %c0_19 = arith.constant 0 : index
    %c0_20 = arith.constant 0 : index
    %10 = vector.load %arg13[%c0_19, %c0_20] : memref<128x128xbf16, #tpu.memory_space<vmem>>, vector<128x128xbf16>
    %c0_21 = arith.constant 0 : index
    %c0_22 = arith.constant 0 : index
    %11 = vector.load %arg14[%c0_21, %c0_22] : memref<1x128xf32, #tpu.memory_space<vmem>>, vector<1x128xf32>
    %c0_23 = arith.constant 0 : index
    %c0_24 = arith.constant 0 : index
    %12 = vector.load %arg15[%c0_23, %c0_24] : memref<1x128xf32, #tpu.memory_space<vmem>>, vector<1x128xf32>
    %c0_25 = arith.constant 0 : index
    %c0_26 = arith.constant 0 : index
    %13 = vector.load %arg16[%c0_25, %c0_26] : memref<1x128xf32, #tpu.memory_space<vmem>>, vector<1x128xf32>
    %c0_27 = arith.constant 0 : index
    %c0_28 = arith.constant 0 : index
    %14 = vector.load %arg17[%c0_27, %c0_28] : memref<128x256xbf16, #tpu.memory_space<vmem>>, vector<128x256xbf16>
    %c0_29 = arith.constant 0 : index
    %c0_30 = arith.constant 0 : index
    %15 = vector.load %arg18[%c0_29, %c0_30] : memref<1x256xf32, #tpu.memory_space<vmem>>, vector<1x256xf32>
    %c0_31 = arith.constant 0 : index
    %c0_32 = arith.constant 0 : index
    %16 = vector.load %arg19[%c0_31, %c0_32] : memref<256x128xbf16, #tpu.memory_space<vmem>>, vector<256x128xbf16>
    %c0_33 = arith.constant 0 : index
    %c0_34 = arith.constant 0 : index
    %17 = vector.load %arg20[%c0_33, %c0_34] : memref<1x128xf32, #tpu.memory_space<vmem>>, vector<1x128xf32>
    %c0_35 = arith.constant 0 : index
    %c0_36 = arith.constant 0 : index
    %c0_37 = arith.constant 0 : index
    %18 = vector.load %arg1[%c0_35, %c0_36, %c0_37] : memref<2x16x128xf32, #tpu.memory_space<vmem>>, vector<2x16x128xf32>
    %c0_38 = arith.constant 0 : index
    %c0_39 = arith.constant 0 : index
    %c0_40 = arith.constant 0 : index
    %19 = vector.load %arg2[%c0_38, %c0_39, %c0_40] : memref<2x8x128xf32, #tpu.memory_space<vmem>>, vector<2x8x128xf32>
    %20 = vector.shape_cast %18 : vector<2x16x128xf32> to vector<32x128xf32>
    %21 = vector.shape_cast %19 : vector<2x8x128xf32> to vector<16x128xf32>
    %22 = arith.truncf %20 : vector<32x128xf32> to vector<32x128xbf16>
    %cst = arith.constant dense<0.000000e+00> : vector<32x384xf32>
    %23 = tpu.matmul %22, %0, %cst {dimension_numbers = #tpu.dot_dimension_numbers<[1], [0], [0], [1], [0, 0, 1, 1], [], []>} : vector<32x128xbf16>, vector<128x384xbf16>, vector<32x384xf32> -> vector<32x384xf32>
    %24 = vector.broadcast %1 : vector<1x384xf32> to vector<32x384xf32>
    %25 = arith.addf %23, %24 : vector<32x384xf32>
    %26 = arith.truncf %25 : vector<32x384xf32> to vector<32x384xbf16>
    %27 = vector.extract_strided_slice %26 {offsets = [0, 0], sizes = [32, 128], strides = [1, 1]} : vector<32x384xbf16> to vector<32x128xbf16>
    %28 = vector.extract_strided_slice %26 {offsets = [0, 128], sizes = [32, 128], strides = [1, 1]} : vector<32x384xbf16> to vector<32x128xbf16>
    %29 = vector.extract_strided_slice %26 {offsets = [0, 256], sizes = [32, 128], strides = [1, 1]} : vector<32x384xbf16> to vector<32x128xbf16>
    %30 = tpu.iota {dimensions = array<i32: 0>} : vector<16x16xi32>
    %31 = tpu.iota {dimensions = array<i32: 1>} : vector<16x16xi32>
    %32 = arith.cmpi sle, %31, %30 : vector<16x16xi32>
    %cst_41 = arith.constant 0.000000e+00 : f32
    %cst_42 = arith.constant -1.000000e+09 : f32
    %33 = vector.broadcast %cst_41 : f32 to vector<16x16xf32>
    %34 = vector.broadcast %cst_42 : f32 to vector<16x16xf32>
    %35 = arith.select %32, %33, %34 : vector<16x16xi1>, vector<16x16xf32>
    %36 = vector.extract_strided_slice %27 {offsets = [0, 0], sizes = [16, 128], strides = [1, 1]} : vector<32x128xbf16> to vector<16x128xbf16>
    %37 = vector.extract_strided_slice %28 {offsets = [0, 0], sizes = [16, 128], strides = [1, 1]} : vector<32x128xbf16> to vector<16x128xbf16>
    %38 = vector.extract_strided_slice %29 {offsets = [0, 0], sizes = [16, 128], strides = [1, 1]} : vector<32x128xbf16> to vector<16x128xbf16>
    %39 = vector.extract_strided_slice %36 {offsets = [0, 0], sizes = [16, 32], strides = [1, 1]} : vector<16x128xbf16> to vector<16x32xbf16>
    %40 = vector.extract_strided_slice %37 {offsets = [0, 0], sizes = [16, 32], strides = [1, 1]} : vector<16x128xbf16> to vector<16x32xbf16>
    %cst_43 = arith.constant dense<0.000000e+00> : vector<16x16xf32>
    %41 = tpu.matmul %39, %40, %cst_43 {dimension_numbers = #tpu.dot_dimension_numbers<[1], [1], [0], [0], [0, 0, 1, 0], [], []>} : vector<16x32xbf16>, vector<16x32xbf16>, vector<16x16xf32> -> vector<16x16xf32>
    %42 = arith.addf %41, %35 : vector<16x16xf32>
    %cst_44 = arith.constant dense<0xFF800000> : vector<16xf32>
    %43 = vector.multi_reduction <maximumf>, %42, %cst_44 [1] : vector<16x16xf32> to vector<16xf32>
    %44 = vector.shape_cast %43 : vector<16xf32> to vector<16x1xf32>
    %45 = vector.broadcast %44 : vector<16x1xf32> to vector<16x16xf32>
    %46 = arith.subf %42, %45 : vector<16x16xf32>
    %47 = math.exp %46 : vector<16x16xf32>
    %cst_45 = arith.constant dense<0.000000e+00> : vector<16xf32>
    %48 = vector.multi_reduction <add>, %47, %cst_45 [1] : vector<16x16xf32> to vector<16xf32>
    %49 = vector.shape_cast %48 : vector<16xf32> to vector<16x1xf32>
    %50 = vector.broadcast %49 : vector<16x1xf32> to vector<16x16xf32>
    %51 = arith.divf %47, %50 : vector<16x16xf32>
    %52 = arith.truncf %51 : vector<16x16xf32> to vector<16x16xbf16>
    %53 = vector.extract_strided_slice %38 {offsets = [0, 0], sizes = [16, 32], strides = [1, 1]} : vector<16x128xbf16> to vector<16x32xbf16>
    %cst_46 = arith.constant dense<0.000000e+00> : vector<16x32xf32>
    %54 = tpu.matmul %52, %53, %cst_46 {dimension_numbers = #tpu.dot_dimension_numbers<[1], [0], [0], [1], [0, 0, 1, 1], [], []>} : vector<16x16xbf16>, vector<16x32xbf16>, vector<16x32xf32> -> vector<16x32xf32>
    %55 = vector.extract_strided_slice %36 {offsets = [0, 32], sizes = [16, 32], strides = [1, 1]} : vector<16x128xbf16> to vector<16x32xbf16>
    %56 = vector.extract_strided_slice %37 {offsets = [0, 32], sizes = [16, 32], strides = [1, 1]} : vector<16x128xbf16> to vector<16x32xbf16>
    %cst_47 = arith.constant dense<0.000000e+00> : vector<16x16xf32>
    %57 = tpu.matmul %55, %56, %cst_47 {dimension_numbers = #tpu.dot_dimension_numbers<[1], [1], [0], [0], [0, 0, 1, 0], [], []>} : vector<16x32xbf16>, vector<16x32xbf16>, vector<16x16xf32> -> vector<16x16xf32>
    %58 = arith.addf %57, %35 : vector<16x16xf32>
    %cst_48 = arith.constant dense<0xFF800000> : vector<16xf32>
    %59 = vector.multi_reduction <maximumf>, %58, %cst_48 [1] : vector<16x16xf32> to vector<16xf32>
    %60 = vector.shape_cast %59 : vector<16xf32> to vector<16x1xf32>
    %61 = vector.broadcast %60 : vector<16x1xf32> to vector<16x16xf32>
    %62 = arith.subf %58, %61 : vector<16x16xf32>
    %63 = math.exp %62 : vector<16x16xf32>
    %cst_49 = arith.constant dense<0.000000e+00> : vector<16xf32>
    %64 = vector.multi_reduction <add>, %63, %cst_49 [1] : vector<16x16xf32> to vector<16xf32>
    %65 = vector.shape_cast %64 : vector<16xf32> to vector<16x1xf32>
    %66 = vector.broadcast %65 : vector<16x1xf32> to vector<16x16xf32>
    %67 = arith.divf %63, %66 : vector<16x16xf32>
    %68 = arith.truncf %67 : vector<16x16xf32> to vector<16x16xbf16>
    %69 = vector.extract_strided_slice %38 {offsets = [0, 32], sizes = [16, 32], strides = [1, 1]} : vector<16x128xbf16> to vector<16x32xbf16>
    %cst_50 = arith.constant dense<0.000000e+00> : vector<16x32xf32>
    %70 = tpu.matmul %68, %69, %cst_50 {dimension_numbers = #tpu.dot_dimension_numbers<[1], [0], [0], [1], [0, 0, 1, 1], [], []>} : vector<16x16xbf16>, vector<16x32xbf16>, vector<16x32xf32> -> vector<16x32xf32>
    %71 = vector.extract_strided_slice %36 {offsets = [0, 64], sizes = [16, 32], strides = [1, 1]} : vector<16x128xbf16> to vector<16x32xbf16>
    %72 = vector.extract_strided_slice %37 {offsets = [0, 64], sizes = [16, 32], strides = [1, 1]} : vector<16x128xbf16> to vector<16x32xbf16>
    %cst_51 = arith.constant dense<0.000000e+00> : vector<16x16xf32>
    %73 = tpu.matmul %71, %72, %cst_51 {dimension_numbers = #tpu.dot_dimension_numbers<[1], [1], [0], [0], [0, 0, 1, 0], [], []>} : vector<16x32xbf16>, vector<16x32xbf16>, vector<16x16xf32> -> vector<16x16xf32>
    %74 = arith.addf %73, %35 : vector<16x16xf32>
    %cst_52 = arith.constant dense<0xFF800000> : vector<16xf32>
    %75 = vector.multi_reduction <maximumf>, %74, %cst_52 [1] : vector<16x16xf32> to vector<16xf32>
    %76 = vector.shape_cast %75 : vector<16xf32> to vector<16x1xf32>
    %77 = vector.broadcast %76 : vector<16x1xf32> to vector<16x16xf32>
    %78 = arith.subf %74, %77 : vector<16x16xf32>
    %79 = math.exp %78 : vector<16x16xf32>
    %cst_53 = arith.constant dense<0.000000e+00> : vector<16xf32>
    %80 = vector.multi_reduction <add>, %79, %cst_53 [1] : vector<16x16xf32> to vector<16xf32>
    %81 = vector.shape_cast %80 : vector<16xf32> to vector<16x1xf32>
    %82 = vector.broadcast %81 : vector<16x1xf32> to vector<16x16xf32>
    %83 = arith.divf %79, %82 : vector<16x16xf32>
    %84 = arith.truncf %83 : vector<16x16xf32> to vector<16x16xbf16>
    %85 = vector.extract_strided_slice %38 {offsets = [0, 64], sizes = [16, 32], strides = [1, 1]} : vector<16x128xbf16> to vector<16x32xbf16>
    %cst_54 = arith.constant dense<0.000000e+00> : vector<16x32xf32>
    %86 = tpu.matmul %84, %85, %cst_54 {dimension_numbers = #tpu.dot_dimension_numbers<[1], [0], [0], [1], [0, 0, 1, 1], [], []>} : vector<16x16xbf16>, vector<16x32xbf16>, vector<16x32xf32> -> vector<16x32xf32>
    %87 = vector.extract_strided_slice %36 {offsets = [0, 96], sizes = [16, 32], strides = [1, 1]} : vector<16x128xbf16> to vector<16x32xbf16>
    %88 = vector.extract_strided_slice %37 {offsets = [0, 96], sizes = [16, 32], strides = [1, 1]} : vector<16x128xbf16> to vector<16x32xbf16>
    %cst_55 = arith.constant dense<0.000000e+00> : vector<16x16xf32>
    %89 = tpu.matmul %87, %88, %cst_55 {dimension_numbers = #tpu.dot_dimension_numbers<[1], [1], [0], [0], [0, 0, 1, 0], [], []>} : vector<16x32xbf16>, vector<16x32xbf16>, vector<16x16xf32> -> vector<16x16xf32>
    %90 = arith.addf %89, %35 : vector<16x16xf32>
    %cst_56 = arith.constant dense<0xFF800000> : vector<16xf32>
    %91 = vector.multi_reduction <maximumf>, %90, %cst_56 [1] : vector<16x16xf32> to vector<16xf32>
    %92 = vector.shape_cast %91 : vector<16xf32> to vector<16x1xf32>
    %93 = vector.broadcast %92 : vector<16x1xf32> to vector<16x16xf32>
    %94 = arith.subf %90, %93 : vector<16x16xf32>
    %95 = math.exp %94 : vector<16x16xf32>
    %cst_57 = arith.constant dense<0.000000e+00> : vector<16xf32>
    %96 = vector.multi_reduction <add>, %95, %cst_57 [1] : vector<16x16xf32> to vector<16xf32>
    %97 = vector.shape_cast %96 : vector<16xf32> to vector<16x1xf32>
    %98 = vector.broadcast %97 : vector<16x1xf32> to vector<16x16xf32>
    %99 = arith.divf %95, %98 : vector<16x16xf32>
    %100 = arith.truncf %99 : vector<16x16xf32> to vector<16x16xbf16>
    %101 = vector.extract_strided_slice %38 {offsets = [0, 96], sizes = [16, 32], strides = [1, 1]} : vector<16x128xbf16> to vector<16x32xbf16>
    %cst_58 = arith.constant dense<0.000000e+00> : vector<16x32xf32>
    %102 = tpu.matmul %100, %101, %cst_58 {dimension_numbers = #tpu.dot_dimension_numbers<[1], [0], [0], [1], [0, 0, 1, 1], [], []>} : vector<16x16xbf16>, vector<16x32xbf16>, vector<16x32xf32> -> vector<16x32xf32>
    %103 = tpu.concatenate %54, %70, %86, %102 in 1 : vector<16x32xf32>, vector<16x32xf32>, vector<16x32xf32>, vector<16x32xf32> -> vector<16x128xf32>
    %104 = vector.extract_strided_slice %27 {offsets = [16, 0], sizes = [16, 128], strides = [1, 1]} : vector<32x128xbf16> to vector<16x128xbf16>
    %105 = vector.extract_strided_slice %28 {offsets = [16, 0], sizes = [16, 128], strides = [1, 1]} : vector<32x128xbf16> to vector<16x128xbf16>
    %106 = vector.extract_strided_slice %29 {offsets = [16, 0], sizes = [16, 128], strides = [1, 1]} : vector<32x128xbf16> to vector<16x128xbf16>
    %107 = vector.extract_strided_slice %104 {offsets = [0, 0], sizes = [16, 32], strides = [1, 1]} : vector<16x128xbf16> to vector<16x32xbf16>
    %108 = vector.extract_strided_slice %105 {offsets = [0, 0], sizes = [16, 32], strides = [1, 1]} : vector<16x128xbf16> to vector<16x32xbf16>
    %cst_59 = arith.constant dense<0.000000e+00> : vector<16x16xf32>
    %109 = tpu.matmul %107, %108, %cst_59 {dimension_numbers = #tpu.dot_dimension_numbers<[1], [1], [0], [0], [0, 0, 1, 0], [], []>} : vector<16x32xbf16>, vector<16x32xbf16>, vector<16x16xf32> -> vector<16x16xf32>
    %110 = arith.addf %109, %35 : vector<16x16xf32>
    %cst_60 = arith.constant dense<0xFF800000> : vector<16xf32>
    %111 = vector.multi_reduction <maximumf>, %110, %cst_60 [1] : vector<16x16xf32> to vector<16xf32>
    %112 = vector.shape_cast %111 : vector<16xf32> to vector<16x1xf32>
    %113 = vector.broadcast %112 : vector<16x1xf32> to vector<16x16xf32>
    %114 = arith.subf %110, %113 : vector<16x16xf32>
    %115 = math.exp %114 : vector<16x16xf32>
    %cst_61 = arith.constant dense<0.000000e+00> : vector<16xf32>
    %116 = vector.multi_reduction <add>, %115, %cst_61 [1] : vector<16x16xf32> to vector<16xf32>
    %117 = vector.shape_cast %116 : vector<16xf32> to vector<16x1xf32>
    %118 = vector.broadcast %117 : vector<16x1xf32> to vector<16x16xf32>
    %119 = arith.divf %115, %118 : vector<16x16xf32>
    %120 = arith.truncf %119 : vector<16x16xf32> to vector<16x16xbf16>
    %121 = vector.extract_strided_slice %106 {offsets = [0, 0], sizes = [16, 32], strides = [1, 1]} : vector<16x128xbf16> to vector<16x32xbf16>
    %cst_62 = arith.constant dense<0.000000e+00> : vector<16x32xf32>
    %122 = tpu.matmul %120, %121, %cst_62 {dimension_numbers = #tpu.dot_dimension_numbers<[1], [0], [0], [1], [0, 0, 1, 1], [], []>} : vector<16x16xbf16>, vector<16x32xbf16>, vector<16x32xf32> -> vector<16x32xf32>
    %123 = vector.extract_strided_slice %104 {offsets = [0, 32], sizes = [16, 32], strides = [1, 1]} : vector<16x128xbf16> to vector<16x32xbf16>
    %124 = vector.extract_strided_slice %105 {offsets = [0, 32], sizes = [16, 32], strides = [1, 1]} : vector<16x128xbf16> to vector<16x32xbf16>
    %cst_63 = arith.constant dense<0.000000e+00> : vector<16x16xf32>
    %125 = tpu.matmul %123, %124, %cst_63 {dimension_numbers = #tpu.dot_dimension_numbers<[1], [1], [0], [0], [0, 0, 1, 0], [], []>} : vector<16x32xbf16>, vector<16x32xbf16>, vector<16x16xf32> -> vector<16x16xf32>
    %126 = arith.addf %125, %35 : vector<16x16xf32>
    %cst_64 = arith.constant dense<0xFF800000> : vector<16xf32>
    %127 = vector.multi_reduction <maximumf>, %126, %cst_64 [1] : vector<16x16xf32> to vector<16xf32>
    %128 = vector.shape_cast %127 : vector<16xf32> to vector<16x1xf32>
    %129 = vector.broadcast %128 : vector<16x1xf32> to vector<16x16xf32>
    %130 = arith.subf %126, %129 : vector<16x16xf32>
    %131 = math.exp %130 : vector<16x16xf32>
    %cst_65 = arith.constant dense<0.000000e+00> : vector<16xf32>
    %132 = vector.multi_reduction <add>, %131, %cst_65 [1] : vector<16x16xf32> to vector<16xf32>
    %133 = vector.shape_cast %132 : vector<16xf32> to vector<16x1xf32>
    %134 = vector.broadcast %133 : vector<16x1xf32> to vector<16x16xf32>
    %135 = arith.divf %131, %134 : vector<16x16xf32>
    %136 = arith.truncf %135 : vector<16x16xf32> to vector<16x16xbf16>
    %137 = vector.extract_strided_slice %106 {offsets = [0, 32], sizes = [16, 32], strides = [1, 1]} : vector<16x128xbf16> to vector<16x32xbf16>
    %cst_66 = arith.constant dense<0.000000e+00> : vector<16x32xf32>
    %138 = tpu.matmul %136, %137, %cst_66 {dimension_numbers = #tpu.dot_dimension_numbers<[1], [0], [0], [1], [0, 0, 1, 1], [], []>} : vector<16x16xbf16>, vector<16x32xbf16>, vector<16x32xf32> -> vector<16x32xf32>
    %139 = vector.extract_strided_slice %104 {offsets = [0, 64], sizes = [16, 32], strides = [1, 1]} : vector<16x128xbf16> to vector<16x32xbf16>
    %140 = vector.extract_strided_slice %105 {offsets = [0, 64], sizes = [16, 32], strides = [1, 1]} : vector<16x128xbf16> to vector<16x32xbf16>
    %cst_67 = arith.constant dense<0.000000e+00> : vector<16x16xf32>
    %141 = tpu.matmul %139, %140, %cst_67 {dimension_numbers = #tpu.dot_dimension_numbers<[1], [1], [0], [0], [0, 0, 1, 0], [], []>} : vector<16x32xbf16>, vector<16x32xbf16>, vector<16x16xf32> -> vector<16x16xf32>
    %142 = arith.addf %141, %35 : vector<16x16xf32>
    %cst_68 = arith.constant dense<0xFF800000> : vector<16xf32>
    %143 = vector.multi_reduction <maximumf>, %142, %cst_68 [1] : vector<16x16xf32> to vector<16xf32>
    %144 = vector.shape_cast %143 : vector<16xf32> to vector<16x1xf32>
    %145 = vector.broadcast %144 : vector<16x1xf32> to vector<16x16xf32>
    %146 = arith.subf %142, %145 : vector<16x16xf32>
    %147 = math.exp %146 : vector<16x16xf32>
    %cst_69 = arith.constant dense<0.000000e+00> : vector<16xf32>
    %148 = vector.multi_reduction <add>, %147, %cst_69 [1] : vector<16x16xf32> to vector<16xf32>
    %149 = vector.shape_cast %148 : vector<16xf32> to vector<16x1xf32>
    %150 = vector.broadcast %149 : vector<16x1xf32> to vector<16x16xf32>
    %151 = arith.divf %147, %150 : vector<16x16xf32>
    %152 = arith.truncf %151 : vector<16x16xf32> to vector<16x16xbf16>
    %153 = vector.extract_strided_slice %106 {offsets = [0, 64], sizes = [16, 32], strides = [1, 1]} : vector<16x128xbf16> to vector<16x32xbf16>
    %cst_70 = arith.constant dense<0.000000e+00> : vector<16x32xf32>
    %154 = tpu.matmul %152, %153, %cst_70 {dimension_numbers = #tpu.dot_dimension_numbers<[1], [0], [0], [1], [0, 0, 1, 1], [], []>} : vector<16x16xbf16>, vector<16x32xbf16>, vector<16x32xf32> -> vector<16x32xf32>
    %155 = vector.extract_strided_slice %104 {offsets = [0, 96], sizes = [16, 32], strides = [1, 1]} : vector<16x128xbf16> to vector<16x32xbf16>
    %156 = vector.extract_strided_slice %105 {offsets = [0, 96], sizes = [16, 32], strides = [1, 1]} : vector<16x128xbf16> to vector<16x32xbf16>
    %cst_71 = arith.constant dense<0.000000e+00> : vector<16x16xf32>
    %157 = tpu.matmul %155, %156, %cst_71 {dimension_numbers = #tpu.dot_dimension_numbers<[1], [1], [0], [0], [0, 0, 1, 0], [], []>} : vector<16x32xbf16>, vector<16x32xbf16>, vector<16x16xf32> -> vector<16x16xf32>
    %158 = arith.addf %157, %35 : vector<16x16xf32>
    %cst_72 = arith.constant dense<0xFF800000> : vector<16xf32>
    %159 = vector.multi_reduction <maximumf>, %158, %cst_72 [1] : vector<16x16xf32> to vector<16xf32>
    %160 = vector.shape_cast %159 : vector<16xf32> to vector<16x1xf32>
    %161 = vector.broadcast %160 : vector<16x1xf32> to vector<16x16xf32>
    %162 = arith.subf %158, %161 : vector<16x16xf32>
    %163 = math.exp %162 : vector<16x16xf32>
    %cst_73 = arith.constant dense<0.000000e+00> : vector<16xf32>
    %164 = vector.multi_reduction <add>, %163, %cst_73 [1] : vector<16x16xf32> to vector<16xf32>
    %165 = vector.shape_cast %164 : vector<16xf32> to vector<16x1xf32>
    %166 = vector.broadcast %165 : vector<16x1xf32> to vector<16x16xf32>
    %167 = arith.divf %163, %166 : vector<16x16xf32>
    %168 = arith.truncf %167 : vector<16x16xf32> to vector<16x16xbf16>
    %169 = vector.extract_strided_slice %106 {offsets = [0, 96], sizes = [16, 32], strides = [1, 1]} : vector<16x128xbf16> to vector<16x32xbf16>
    %cst_74 = arith.constant dense<0.000000e+00> : vector<16x32xf32>
    %170 = tpu.matmul %168, %169, %cst_74 {dimension_numbers = #tpu.dot_dimension_numbers<[1], [0], [0], [1], [0, 0, 1, 1], [], []>} : vector<16x16xbf16>, vector<16x32xbf16>, vector<16x32xf32> -> vector<16x32xf32>
    %171 = tpu.concatenate %122, %138, %154, %170 in 1 : vector<16x32xf32>, vector<16x32xf32>, vector<16x32xf32>, vector<16x32xf32> -> vector<16x128xf32>
    %172 = tpu.concatenate %103, %171 in 0 : vector<16x128xf32>, vector<16x128xf32> -> vector<32x128xf32>
    %173 = arith.truncf %172 : vector<32x128xf32> to vector<32x128xbf16>
    %cst_75 = arith.constant dense<0.000000e+00> : vector<32x128xf32>
    %174 = tpu.matmul %173, %2, %cst_75 {dimension_numbers = #tpu.dot_dimension_numbers<[1], [0], [0], [1], [0, 0, 1, 1], [], []>} : vector<32x128xbf16>, vector<128x128xbf16>, vector<32x128xf32> -> vector<32x128xf32>
    %175 = vector.broadcast %3 : vector<1x128xf32> to vector<32x128xf32>
    %176 = arith.addf %174, %175 : vector<32x128xf32>
    %177 = arith.addf %176, %20 : vector<32x128xf32>
    %cst_76 = arith.constant dense<0.000000e+00> : vector<32xf32>
    %178 = vector.multi_reduction <add>, %177, %cst_76 [1] : vector<32x128xf32> to vector<32xf32>
    %179 = vector.shape_cast %178 : vector<32xf32> to vector<32x1xf32>
    %cst_77 = arith.constant 1.280000e+02 : f32
    %180 = vector.broadcast %cst_77 : f32 to vector<32x1xf32>
    %181 = arith.divf %179, %180 : vector<32x1xf32>
    %182 = vector.broadcast %181 : vector<32x1xf32> to vector<32x128xf32>
    %183 = arith.subf %177, %182 : vector<32x128xf32>
    %184 = arith.mulf %183, %183 : vector<32x128xf32>
    %cst_78 = arith.constant dense<0.000000e+00> : vector<32xf32>
    %185 = vector.multi_reduction <add>, %184, %cst_78 [1] : vector<32x128xf32> to vector<32xf32>
    %186 = vector.shape_cast %185 : vector<32xf32> to vector<32x1xf32>
    %cst_79 = arith.constant 1.280000e+02 : f32
    %187 = vector.broadcast %cst_79 : f32 to vector<32x1xf32>
    %188 = arith.divf %186, %187 : vector<32x1xf32>
    %189 = vector.broadcast %181 : vector<32x1xf32> to vector<32x128xf32>
    %190 = arith.subf %177, %189 : vector<32x128xf32>
    %191 = vector.broadcast %4 : vector<1x128xf32> to vector<32x128xf32>
    %192 = arith.mulf %191, %190 : vector<32x128xf32>
    %cst_80 = arith.constant 9.99999974E-6 : f32
    %193 = vector.broadcast %cst_80 : f32 to vector<32x1xf32>
    %194 = arith.addf %188, %193 : vector<32x1xf32>
    %195 = math.rsqrt %194 : vector<32x1xf32>
    %196 = vector.broadcast %195 : vector<32x1xf32> to vector<32x128xf32>
    %197 = arith.mulf %192, %196 : vector<32x128xf32>
    %198 = vector.broadcast %5 : vector<1x128xf32> to vector<32x128xf32>
    %199 = arith.addf %197, %198 : vector<32x128xf32>
    %200 = arith.truncf %199 : vector<32x128xf32> to vector<32x128xbf16>
    %201 = arith.truncf %21 : vector<16x128xf32> to vector<16x128xbf16>
    %cst_81 = arith.constant dense<0.000000e+00> : vector<32x128xf32>
    %202 = tpu.matmul %200, %6, %cst_81 {dimension_numbers = #tpu.dot_dimension_numbers<[1], [0], [0], [1], [0, 0, 1, 1], [], []>} : vector<32x128xbf16>, vector<128x128xbf16>, vector<32x128xf32> -> vector<32x128xf32>
    %203 = vector.broadcast %7 : vector<1x128xf32> to vector<32x128xf32>
    %204 = arith.addf %202, %203 : vector<32x128xf32>
    %205 = arith.truncf %204 : vector<32x128xf32> to vector<32x128xbf16>
    %cst_82 = arith.constant dense<0.000000e+00> : vector<16x256xf32>
    %206 = tpu.matmul %201, %8, %cst_82 {dimension_numbers = #tpu.dot_dimension_numbers<[1], [0], [0], [1], [0, 0, 1, 1], [], []>} : vector<16x128xbf16>, vector<128x256xbf16>, vector<16x256xf32> -> vector<16x256xf32>
    %207 = vector.broadcast %9 : vector<1x256xf32> to vector<16x256xf32>
    %208 = arith.addf %206, %207 : vector<16x256xf32>
    %209 = arith.truncf %208 : vector<16x256xf32> to vector<16x256xbf16>
    %210 = vector.extract_strided_slice %209 {offsets = [0, 0], sizes = [16, 128], strides = [1, 1]} : vector<16x256xbf16> to vector<16x128xbf16>
    %211 = vector.extract_strided_slice %209 {offsets = [0, 128], sizes = [16, 128], strides = [1, 1]} : vector<16x256xbf16> to vector<16x128xbf16>
    %212 = vector.extract_strided_slice %205 {offsets = [0, 0], sizes = [16, 128], strides = [1, 1]} : vector<32x128xbf16> to vector<16x128xbf16>
    %213 = vector.extract_strided_slice %210 {offsets = [0, 0], sizes = [8, 128], strides = [1, 1]} : vector<16x128xbf16> to vector<8x128xbf16>
    %214 = vector.extract_strided_slice %211 {offsets = [0, 0], sizes = [8, 128], strides = [1, 1]} : vector<16x128xbf16> to vector<8x128xbf16>
    %215 = vector.extract_strided_slice %212 {offsets = [0, 0], sizes = [16, 32], strides = [1, 1]} : vector<16x128xbf16> to vector<16x32xbf16>
    %216 = vector.extract_strided_slice %213 {offsets = [0, 0], sizes = [8, 32], strides = [1, 1]} : vector<8x128xbf16> to vector<8x32xbf16>
    %cst_83 = arith.constant dense<0.000000e+00> : vector<16x8xf32>
    %217 = tpu.matmul %215, %216, %cst_83 {dimension_numbers = #tpu.dot_dimension_numbers<[1], [1], [0], [0], [0, 0, 1, 0], [], []>} : vector<16x32xbf16>, vector<8x32xbf16>, vector<16x8xf32> -> vector<16x8xf32>
    %cst_84 = arith.constant dense<0xFF800000> : vector<16xf32>
    %218 = vector.multi_reduction <maximumf>, %217, %cst_84 [1] : vector<16x8xf32> to vector<16xf32>
    %219 = vector.shape_cast %218 : vector<16xf32> to vector<16x1xf32>
    %220 = vector.broadcast %219 : vector<16x1xf32> to vector<16x8xf32>
    %221 = arith.subf %217, %220 : vector<16x8xf32>
    %222 = math.exp %221 : vector<16x8xf32>
    %cst_85 = arith.constant dense<0.000000e+00> : vector<16xf32>
    %223 = vector.multi_reduction <add>, %222, %cst_85 [1] : vector<16x8xf32> to vector<16xf32>
    %224 = vector.shape_cast %223 : vector<16xf32> to vector<16x1xf32>
    %225 = vector.broadcast %224 : vector<16x1xf32> to vector<16x8xf32>
    %226 = arith.divf %222, %225 : vector<16x8xf32>
    %227 = arith.truncf %226 : vector<16x8xf32> to vector<16x8xbf16>
    %228 = vector.extract_strided_slice %214 {offsets = [0, 0], sizes = [8, 32], strides = [1, 1]} : vector<8x128xbf16> to vector<8x32xbf16>
    %cst_86 = arith.constant dense<0.000000e+00> : vector<16x32xf32>
    %229 = tpu.matmul %227, %228, %cst_86 {dimension_numbers = #tpu.dot_dimension_numbers<[1], [0], [0], [1], [0, 0, 1, 1], [], []>} : vector<16x8xbf16>, vector<8x32xbf16>, vector<16x32xf32> -> vector<16x32xf32>
    %230 = vector.extract_strided_slice %212 {offsets = [0, 32], sizes = [16, 32], strides = [1, 1]} : vector<16x128xbf16> to vector<16x32xbf16>
    %231 = vector.extract_strided_slice %213 {offsets = [0, 32], sizes = [8, 32], strides = [1, 1]} : vector<8x128xbf16> to vector<8x32xbf16>
    %cst_87 = arith.constant dense<0.000000e+00> : vector<16x8xf32>
    %232 = tpu.matmul %230, %231, %cst_87 {dimension_numbers = #tpu.dot_dimension_numbers<[1], [1], [0], [0], [0, 0, 1, 0], [], []>} : vector<16x32xbf16>, vector<8x32xbf16>, vector<16x8xf32> -> vector<16x8xf32>
    %cst_88 = arith.constant dense<0xFF800000> : vector<16xf32>
    %233 = vector.multi_reduction <maximumf>, %232, %cst_88 [1] : vector<16x8xf32> to vector<16xf32>
    %234 = vector.shape_cast %233 : vector<16xf32> to vector<16x1xf32>
    %235 = vector.broadcast %234 : vector<16x1xf32> to vector<16x8xf32>
    %236 = arith.subf %232, %235 : vector<16x8xf32>
    %237 = math.exp %236 : vector<16x8xf32>
    %cst_89 = arith.constant dense<0.000000e+00> : vector<16xf32>
    %238 = vector.multi_reduction <add>, %237, %cst_89 [1] : vector<16x8xf32> to vector<16xf32>
    %239 = vector.shape_cast %238 : vector<16xf32> to vector<16x1xf32>
    %240 = vector.broadcast %239 : vector<16x1xf32> to vector<16x8xf32>
    %241 = arith.divf %237, %240 : vector<16x8xf32>
    %242 = arith.truncf %241 : vector<16x8xf32> to vector<16x8xbf16>
    %243 = vector.extract_strided_slice %214 {offsets = [0, 32], sizes = [8, 32], strides = [1, 1]} : vector<8x128xbf16> to vector<8x32xbf16>
    %cst_90 = arith.constant dense<0.000000e+00> : vector<16x32xf32>
    %244 = tpu.matmul %242, %243, %cst_90 {dimension_numbers = #tpu.dot_dimension_numbers<[1], [0], [0], [1], [0, 0, 1, 1], [], []>} : vector<16x8xbf16>, vector<8x32xbf16>, vector<16x32xf32> -> vector<16x32xf32>
    %245 = vector.extract_strided_slice %212 {offsets = [0, 64], sizes = [16, 32], strides = [1, 1]} : vector<16x128xbf16> to vector<16x32xbf16>
    %246 = vector.extract_strided_slice %213 {offsets = [0, 64], sizes = [8, 32], strides = [1, 1]} : vector<8x128xbf16> to vector<8x32xbf16>
    %cst_91 = arith.constant dense<0.000000e+00> : vector<16x8xf32>
    %247 = tpu.matmul %245, %246, %cst_91 {dimension_numbers = #tpu.dot_dimension_numbers<[1], [1], [0], [0], [0, 0, 1, 0], [], []>} : vector<16x32xbf16>, vector<8x32xbf16>, vector<16x8xf32> -> vector<16x8xf32>
    %cst_92 = arith.constant dense<0xFF800000> : vector<16xf32>
    %248 = vector.multi_reduction <maximumf>, %247, %cst_92 [1] : vector<16x8xf32> to vector<16xf32>
    %249 = vector.shape_cast %248 : vector<16xf32> to vector<16x1xf32>
    %250 = vector.broadcast %249 : vector<16x1xf32> to vector<16x8xf32>
    %251 = arith.subf %247, %250 : vector<16x8xf32>
    %252 = math.exp %251 : vector<16x8xf32>
    %cst_93 = arith.constant dense<0.000000e+00> : vector<16xf32>
    %253 = vector.multi_reduction <add>, %252, %cst_93 [1] : vector<16x8xf32> to vector<16xf32>
    %254 = vector.shape_cast %253 : vector<16xf32> to vector<16x1xf32>
    %255 = vector.broadcast %254 : vector<16x1xf32> to vector<16x8xf32>
    %256 = arith.divf %252, %255 : vector<16x8xf32>
    %257 = arith.truncf %256 : vector<16x8xf32> to vector<16x8xbf16>
    %258 = vector.extract_strided_slice %214 {offsets = [0, 64], sizes = [8, 32], strides = [1, 1]} : vector<8x128xbf16> to vector<8x32xbf16>
    %cst_94 = arith.constant dense<0.000000e+00> : vector<16x32xf32>
    %259 = tpu.matmul %257, %258, %cst_94 {dimension_numbers = #tpu.dot_dimension_numbers<[1], [0], [0], [1], [0, 0, 1, 1], [], []>} : vector<16x8xbf16>, vector<8x32xbf16>, vector<16x32xf32> -> vector<16x32xf32>
    %260 = vector.extract_strided_slice %212 {offsets = [0, 96], sizes = [16, 32], strides = [1, 1]} : vector<16x128xbf16> to vector<16x32xbf16>
    %261 = vector.extract_strided_slice %213 {offsets = [0, 96], sizes = [8, 32], strides = [1, 1]} : vector<8x128xbf16> to vector<8x32xbf16>
    %cst_95 = arith.constant dense<0.000000e+00> : vector<16x8xf32>
    %262 = tpu.matmul %260, %261, %cst_95 {dimension_numbers = #tpu.dot_dimension_numbers<[1], [1], [0], [0], [0, 0, 1, 0], [], []>} : vector<16x32xbf16>, vector<8x32xbf16>, vector<16x8xf32> -> vector<16x8xf32>
    %cst_96 = arith.constant dense<0xFF800000> : vector<16xf32>
    %263 = vector.multi_reduction <maximumf>, %262, %cst_96 [1] : vector<16x8xf32> to vector<16xf32>
    %264 = vector.shape_cast %263 : vector<16xf32> to vector<16x1xf32>
    %265 = vector.broadcast %264 : vector<16x1xf32> to vector<16x8xf32>
    %266 = arith.subf %262, %265 : vector<16x8xf32>
    %267 = math.exp %266 : vector<16x8xf32>
    %cst_97 = arith.constant dense<0.000000e+00> : vector<16xf32>
    %268 = vector.multi_reduction <add>, %267, %cst_97 [1] : vector<16x8xf32> to vector<16xf32>
    %269 = vector.shape_cast %268 : vector<16xf32> to vector<16x1xf32>
    %270 = vector.broadcast %269 : vector<16x1xf32> to vector<16x8xf32>
    %271 = arith.divf %267, %270 : vector<16x8xf32>
    %272 = arith.truncf %271 : vector<16x8xf32> to vector<16x8xbf16>
    %273 = vector.extract_strided_slice %214 {offsets = [0, 96], sizes = [8, 32], strides = [1, 1]} : vector<8x128xbf16> to vector<8x32xbf16>
    %cst_98 = arith.constant dense<0.000000e+00> : vector<16x32xf32>
    %274 = tpu.matmul %272, %273, %cst_98 {dimension_numbers = #tpu.dot_dimension_numbers<[1], [0], [0], [1], [0, 0, 1, 1], [], []>} : vector<16x8xbf16>, vector<8x32xbf16>, vector<16x32xf32> -> vector<16x32xf32>
    %275 = tpu.concatenate %229, %244, %259, %274 in 1 : vector<16x32xf32>, vector<16x32xf32>, vector<16x32xf32>, vector<16x32xf32> -> vector<16x128xf32>
    %276 = vector.extract_strided_slice %205 {offsets = [16, 0], sizes = [16, 128], strides = [1, 1]} : vector<32x128xbf16> to vector<16x128xbf16>
    %277 = vector.extract_strided_slice %210 {offsets = [8, 0], sizes = [8, 128], strides = [1, 1]} : vector<16x128xbf16> to vector<8x128xbf16>
    %278 = vector.extract_strided_slice %211 {offsets = [8, 0], sizes = [8, 128], strides = [1, 1]} : vector<16x128xbf16> to vector<8x128xbf16>
    %279 = vector.extract_strided_slice %276 {offsets = [0, 0], sizes = [16, 32], strides = [1, 1]} : vector<16x128xbf16> to vector<16x32xbf16>
    %280 = vector.extract_strided_slice %277 {offsets = [0, 0], sizes = [8, 32], strides = [1, 1]} : vector<8x128xbf16> to vector<8x32xbf16>
    %cst_99 = arith.constant dense<0.000000e+00> : vector<16x8xf32>
    %281 = tpu.matmul %279, %280, %cst_99 {dimension_numbers = #tpu.dot_dimension_numbers<[1], [1], [0], [0], [0, 0, 1, 0], [], []>} : vector<16x32xbf16>, vector<8x32xbf16>, vector<16x8xf32> -> vector<16x8xf32>
    %cst_100 = arith.constant dense<0xFF800000> : vector<16xf32>
    %282 = vector.multi_reduction <maximumf>, %281, %cst_100 [1] : vector<16x8xf32> to vector<16xf32>
    %283 = vector.shape_cast %282 : vector<16xf32> to vector<16x1xf32>
    %284 = vector.broadcast %283 : vector<16x1xf32> to vector<16x8xf32>
    %285 = arith.subf %281, %284 : vector<16x8xf32>
    %286 = math.exp %285 : vector<16x8xf32>
    %cst_101 = arith.constant dense<0.000000e+00> : vector<16xf32>
    %287 = vector.multi_reduction <add>, %286, %cst_101 [1] : vector<16x8xf32> to vector<16xf32>
    %288 = vector.shape_cast %287 : vector<16xf32> to vector<16x1xf32>
    %289 = vector.broadcast %288 : vector<16x1xf32> to vector<16x8xf32>
    %290 = arith.divf %286, %289 : vector<16x8xf32>
    %291 = arith.truncf %290 : vector<16x8xf32> to vector<16x8xbf16>
    %292 = vector.extract_strided_slice %278 {offsets = [0, 0], sizes = [8, 32], strides = [1, 1]} : vector<8x128xbf16> to vector<8x32xbf16>
    %cst_102 = arith.constant dense<0.000000e+00> : vector<16x32xf32>
    %293 = tpu.matmul %291, %292, %cst_102 {dimension_numbers = #tpu.dot_dimension_numbers<[1], [0], [0], [1], [0, 0, 1, 1], [], []>} : vector<16x8xbf16>, vector<8x32xbf16>, vector<16x32xf32> -> vector<16x32xf32>
    %294 = vector.extract_strided_slice %276 {offsets = [0, 32], sizes = [16, 32], strides = [1, 1]} : vector<16x128xbf16> to vector<16x32xbf16>
    %295 = vector.extract_strided_slice %277 {offsets = [0, 32], sizes = [8, 32], strides = [1, 1]} : vector<8x128xbf16> to vector<8x32xbf16>
    %cst_103 = arith.constant dense<0.000000e+00> : vector<16x8xf32>
    %296 = tpu.matmul %294, %295, %cst_103 {dimension_numbers = #tpu.dot_dimension_numbers<[1], [1], [0], [0], [0, 0, 1, 0], [], []>} : vector<16x32xbf16>, vector<8x32xbf16>, vector<16x8xf32> -> vector<16x8xf32>
    %cst_104 = arith.constant dense<0xFF800000> : vector<16xf32>
    %297 = vector.multi_reduction <maximumf>, %296, %cst_104 [1] : vector<16x8xf32> to vector<16xf32>
    %298 = vector.shape_cast %297 : vector<16xf32> to vector<16x1xf32>
    %299 = vector.broadcast %298 : vector<16x1xf32> to vector<16x8xf32>
    %300 = arith.subf %296, %299 : vector<16x8xf32>
    %301 = math.exp %300 : vector<16x8xf32>
    %cst_105 = arith.constant dense<0.000000e+00> : vector<16xf32>
    %302 = vector.multi_reduction <add>, %301, %cst_105 [1] : vector<16x8xf32> to vector<16xf32>
    %303 = vector.shape_cast %302 : vector<16xf32> to vector<16x1xf32>
    %304 = vector.broadcast %303 : vector<16x1xf32> to vector<16x8xf32>
    %305 = arith.divf %301, %304 : vector<16x8xf32>
    %306 = arith.truncf %305 : vector<16x8xf32> to vector<16x8xbf16>
    %307 = vector.extract_strided_slice %278 {offsets = [0, 32], sizes = [8, 32], strides = [1, 1]} : vector<8x128xbf16> to vector<8x32xbf16>
    %cst_106 = arith.constant dense<0.000000e+00> : vector<16x32xf32>
    %308 = tpu.matmul %306, %307, %cst_106 {dimension_numbers = #tpu.dot_dimension_numbers<[1], [0], [0], [1], [0, 0, 1, 1], [], []>} : vector<16x8xbf16>, vector<8x32xbf16>, vector<16x32xf32> -> vector<16x32xf32>
    %309 = vector.extract_strided_slice %276 {offsets = [0, 64], sizes = [16, 32], strides = [1, 1]} : vector<16x128xbf16> to vector<16x32xbf16>
    %310 = vector.extract_strided_slice %277 {offsets = [0, 64], sizes = [8, 32], strides = [1, 1]} : vector<8x128xbf16> to vector<8x32xbf16>
    %cst_107 = arith.constant dense<0.000000e+00> : vector<16x8xf32>
    %311 = tpu.matmul %309, %310, %cst_107 {dimension_numbers = #tpu.dot_dimension_numbers<[1], [1], [0], [0], [0, 0, 1, 0], [], []>} : vector<16x32xbf16>, vector<8x32xbf16>, vector<16x8xf32> -> vector<16x8xf32>
    %cst_108 = arith.constant dense<0xFF800000> : vector<16xf32>
    %312 = vector.multi_reduction <maximumf>, %311, %cst_108 [1] : vector<16x8xf32> to vector<16xf32>
    %313 = vector.shape_cast %312 : vector<16xf32> to vector<16x1xf32>
    %314 = vector.broadcast %313 : vector<16x1xf32> to vector<16x8xf32>
    %315 = arith.subf %311, %314 : vector<16x8xf32>
    %316 = math.exp %315 : vector<16x8xf32>
    %cst_109 = arith.constant dense<0.000000e+00> : vector<16xf32>
    %317 = vector.multi_reduction <add>, %316, %cst_109 [1] : vector<16x8xf32> to vector<16xf32>
    %318 = vector.shape_cast %317 : vector<16xf32> to vector<16x1xf32>
    %319 = vector.broadcast %318 : vector<16x1xf32> to vector<16x8xf32>
    %320 = arith.divf %316, %319 : vector<16x8xf32>
    %321 = arith.truncf %320 : vector<16x8xf32> to vector<16x8xbf16>
    %322 = vector.extract_strided_slice %278 {offsets = [0, 64], sizes = [8, 32], strides = [1, 1]} : vector<8x128xbf16> to vector<8x32xbf16>
    %cst_110 = arith.constant dense<0.000000e+00> : vector<16x32xf32>
    %323 = tpu.matmul %321, %322, %cst_110 {dimension_numbers = #tpu.dot_dimension_numbers<[1], [0], [0], [1], [0, 0, 1, 1], [], []>} : vector<16x8xbf16>, vector<8x32xbf16>, vector<16x32xf32> -> vector<16x32xf32>
    %324 = vector.extract_strided_slice %276 {offsets = [0, 96], sizes = [16, 32], strides = [1, 1]} : vector<16x128xbf16> to vector<16x32xbf16>
    %325 = vector.extract_strided_slice %277 {offsets = [0, 96], sizes = [8, 32], strides = [1, 1]} : vector<8x128xbf16> to vector<8x32xbf16>
    %cst_111 = arith.constant dense<0.000000e+00> : vector<16x8xf32>
    %326 = tpu.matmul %324, %325, %cst_111 {dimension_numbers = #tpu.dot_dimension_numbers<[1], [1], [0], [0], [0, 0, 1, 0], [], []>} : vector<16x32xbf16>, vector<8x32xbf16>, vector<16x8xf32> -> vector<16x8xf32>
    %cst_112 = arith.constant dense<0xFF800000> : vector<16xf32>
    %327 = vector.multi_reduction <maximumf>, %326, %cst_112 [1] : vector<16x8xf32> to vector<16xf32>
    %328 = vector.shape_cast %327 : vector<16xf32> to vector<16x1xf32>
    %329 = vector.broadcast %328 : vector<16x1xf32> to vector<16x8xf32>
    %330 = arith.subf %326, %329 : vector<16x8xf32>
    %331 = math.exp %330 : vector<16x8xf32>
    %cst_113 = arith.constant dense<0.000000e+00> : vector<16xf32>
    %332 = vector.multi_reduction <add>, %331, %cst_113 [1] : vector<16x8xf32> to vector<16xf32>
    %333 = vector.shape_cast %332 : vector<16xf32> to vector<16x1xf32>
    %334 = vector.broadcast %333 : vector<16x1xf32> to vector<16x8xf32>
    %335 = arith.divf %331, %334 : vector<16x8xf32>
    %336 = arith.truncf %335 : vector<16x8xf32> to vector<16x8xbf16>
    %337 = vector.extract_strided_slice %278 {offsets = [0, 96], sizes = [8, 32], strides = [1, 1]} : vector<8x128xbf16> to vector<8x32xbf16>
    %cst_114 = arith.constant dense<0.000000e+00> : vector<16x32xf32>
    %338 = tpu.matmul %336, %337, %cst_114 {dimension_numbers = #tpu.dot_dimension_numbers<[1], [0], [0], [1], [0, 0, 1, 1], [], []>} : vector<16x8xbf16>, vector<8x32xbf16>, vector<16x32xf32> -> vector<16x32xf32>
    %339 = tpu.concatenate %293, %308, %323, %338 in 1 : vector<16x32xf32>, vector<16x32xf32>, vector<16x32xf32>, vector<16x32xf32> -> vector<16x128xf32>
    %340 = tpu.concatenate %275, %339 in 0 : vector<16x128xf32>, vector<16x128xf32> -> vector<32x128xf32>
    %341 = arith.truncf %340 : vector<32x128xf32> to vector<32x128xbf16>
    %cst_115 = arith.constant dense<0.000000e+00> : vector<32x128xf32>
    %342 = tpu.matmul %341, %10, %cst_115 {dimension_numbers = #tpu.dot_dimension_numbers<[1], [0], [0], [1], [0, 0, 1, 1], [], []>} : vector<32x128xbf16>, vector<128x128xbf16>, vector<32x128xf32> -> vector<32x128xf32>
    %343 = vector.broadcast %11 : vector<1x128xf32> to vector<32x128xf32>
    %344 = arith.addf %342, %343 : vector<32x128xf32>
    %345 = arith.addf %344, %199 : vector<32x128xf32>
    %cst_116 = arith.constant dense<0.000000e+00> : vector<32xf32>
    %346 = vector.multi_reduction <add>, %345, %cst_116 [1] : vector<32x128xf32> to vector<32xf32>
    %347 = vector.shape_cast %346 : vector<32xf32> to vector<32x1xf32>
    %cst_117 = arith.constant 1.280000e+02 : f32
    %348 = vector.broadcast %cst_117 : f32 to vector<32x1xf32>
    %349 = arith.divf %347, %348 : vector<32x1xf32>
    %350 = vector.broadcast %349 : vector<32x1xf32> to vector<32x128xf32>
    %351 = arith.subf %345, %350 : vector<32x128xf32>
    %352 = arith.mulf %351, %351 : vector<32x128xf32>
    %cst_118 = arith.constant dense<0.000000e+00> : vector<32xf32>
    %353 = vector.multi_reduction <add>, %352, %cst_118 [1] : vector<32x128xf32> to vector<32xf32>
    %354 = vector.shape_cast %353 : vector<32xf32> to vector<32x1xf32>
    %cst_119 = arith.constant 1.280000e+02 : f32
    %355 = vector.broadcast %cst_119 : f32 to vector<32x1xf32>
    %356 = arith.divf %354, %355 : vector<32x1xf32>
    %357 = vector.broadcast %349 : vector<32x1xf32> to vector<32x128xf32>
    %358 = arith.subf %345, %357 : vector<32x128xf32>
    %359 = vector.broadcast %12 : vector<1x128xf32> to vector<32x128xf32>
    %360 = arith.mulf %359, %358 : vector<32x128xf32>
    %cst_120 = arith.constant 9.99999974E-6 : f32
    %361 = vector.broadcast %cst_120 : f32 to vector<32x1xf32>
    %362 = arith.addf %356, %361 : vector<32x1xf32>
    %363 = math.rsqrt %362 : vector<32x1xf32>
    %364 = vector.broadcast %363 : vector<32x1xf32> to vector<32x128xf32>
    %365 = arith.mulf %360, %364 : vector<32x128xf32>
    %366 = vector.broadcast %13 : vector<1x128xf32> to vector<32x128xf32>
    %367 = arith.addf %365, %366 : vector<32x128xf32>
    %368 = arith.truncf %367 : vector<32x128xf32> to vector<32x128xbf16>
    %cst_121 = arith.constant dense<0.000000e+00> : vector<32x256xf32>
    %369 = tpu.matmul %368, %14, %cst_121 {dimension_numbers = #tpu.dot_dimension_numbers<[1], [0], [0], [1], [0, 0, 1, 1], [], []>} : vector<32x128xbf16>, vector<128x256xbf16>, vector<32x256xf32> -> vector<32x256xf32>
    %370 = vector.broadcast %15 : vector<1x256xf32> to vector<32x256xf32>
    %371 = arith.addf %369, %370 : vector<32x256xf32>
    %cst_122 = arith.constant 0.000000e+00 : f32
    %372 = vector.broadcast %cst_122 : f32 to vector<32x256xf32>
    %373 = arith.maximumf %371, %372 : vector<32x256xf32>
    %374 = arith.truncf %373 : vector<32x256xf32> to vector<32x256xbf16>
    %cst_123 = arith.constant dense<0.000000e+00> : vector<32x128xf32>
    %375 = tpu.matmul %374, %16, %cst_123 {dimension_numbers = #tpu.dot_dimension_numbers<[1], [0], [0], [1], [0, 0, 1, 1], [], []>} : vector<32x256xbf16>, vector<256x128xbf16>, vector<32x128xf32> -> vector<32x128xf32>
    %376 = vector.broadcast %17 : vector<1x128xf32> to vector<32x128xf32>
    %377 = arith.addf %375, %376 : vector<32x128xf32>
    %378 = arith.addf %377, %367 : vector<32x128xf32>
    %cst_124 = arith.constant dense<0.000000e+00> : vector<32xf32>
    %379 = vector.multi_reduction <add>, %378, %cst_124 [1] : vector<32x128xf32> to vector<32xf32>
    %380 = vector.shape_cast %379 : vector<32xf32> to vector<32x1xf32>
    %cst_125 = arith.constant 1.280000e+02 : f32
    %381 = vector.broadcast %cst_125 : f32 to vector<32x1xf32>
    %382 = arith.divf %380, %381 : vector<32x1xf32>
    %383 = vector.broadcast %382 : vector<32x1xf32> to vector<32x128xf32>
    %384 = arith.subf %378, %383 : vector<32x128xf32>
    %385 = arith.mulf %384, %384 : vector<32x128xf32>
    %cst_126 = arith.constant dense<0.000000e+00> : vector<32xf32>
    %386 = vector.multi_reduction <add>, %385, %cst_126 [1] : vector<32x128xf32> to vector<32xf32>
    %387 = vector.shape_cast %386 : vector<32xf32> to vector<32x1xf32>
    %cst_127 = arith.constant 1.280000e+02 : f32
    %388 = vector.broadcast %cst_127 : f32 to vector<32x1xf32>
    %389 = arith.divf %387, %388 : vector<32x1xf32>
    %390 = vector.broadcast %382 : vector<32x1xf32> to vector<32x128xf32>
    %391 = arith.subf %378, %390 : vector<32x128xf32>
    %392 = vector.broadcast %12 : vector<1x128xf32> to vector<32x128xf32>
    %393 = arith.mulf %392, %391 : vector<32x128xf32>
    %cst_128 = arith.constant 9.99999974E-6 : f32
    %394 = vector.broadcast %cst_128 : f32 to vector<32x1xf32>
    %395 = arith.addf %389, %394 : vector<32x1xf32>
    %396 = math.rsqrt %395 : vector<32x1xf32>
    %397 = vector.broadcast %396 : vector<32x1xf32> to vector<32x128xf32>
    %398 = arith.mulf %393, %397 : vector<32x128xf32>
    %399 = vector.broadcast %13 : vector<1x128xf32> to vector<32x128xf32>
    %400 = arith.addf %398, %399 : vector<32x128xf32>
    %401 = vector.shape_cast %400 : vector<32x128xf32> to vector<2x16x128xf32>
    %c0_129 = arith.constant 0 : index
    %c0_130 = arith.constant 0 : index
    %c0_131 = arith.constant 0 : index
    %402 = vector.load %arg21[%c0_129, %c0_130, %c0_131] : memref<2x16x128xf32, #tpu.memory_space<vmem>>, vector<2x16x128xf32>
    tpu.vector_store %arg21[%c0_129, %c0_130, %c0_131], %401 {strides = array<i32>} : memref<2x16x128xf32, #tpu.memory_space<vmem>>, vector<2x16x128xf32>,
    return
  }
  func.func @transform_0(%arg0: i32) -> (i32, i32, i32) {
    %c0_i32 = arith.constant 0 : i32
    %c0_i32_0 = arith.constant 0 : i32
    %c0_i32_1 = arith.constant 0 : i32
    %c0_i32_2 = arith.constant 0 : i32
    return %c0_i32, %c0_i32_0, %c0_i32_1 : i32, i32, i32
  }
  func.func @transform_1(%arg0: i32) -> (i32, i32, i32) {
    %c0_i32 = arith.constant 0 : i32
    %c0_i32_0 = arith.constant 0 : i32
    %c0_i32_1 = arith.constant 0 : i32
    %c0_i32_2 = arith.constant 0 : i32
    return %c0_i32, %c0_i32_0, %c0_i32_1 : i32, i32, i32
  }
  func.func @transform_2(%arg0: i32) -> (i32, i32) {
    %c0_i32 = arith.constant 0 : i32
    %c0_i32_0 = arith.constant 0 : i32
    %c0_i32_1 = arith.constant 0 : i32
    return %c0_i32, %c0_i32_0 : i32, i32
  }
  func.func @transform_3(%arg0: i32) -> (i32, i32) {
    %c0_i32 = arith.constant 0 : i32
    %c0_i32_0 = arith.constant 0 : i32
    %c0_i32_1 = arith.constant 0 : i32
    return %c0_i32, %c0_i32_0 : i32, i32
  }
  func.func @transform_4(%arg0: i32) -> (i32, i32) {
    %c0_i32 = arith.constant 0 : i32
    %c0_i32_0 = arith.constant 0 : i32
    %c0_i32_1 = arith.constant 0 : i32
    return %c0_i32, %c0_i32_0 : i32, i32
  }
  func.func @transform_5(%arg0: i32) -> (i32, i32) {
    %c0_i32 = arith.constant 0 : i32
    %c0_i32_0 = arith.constant 0 : i32
    %c0_i32_1 = arith.constant 0 : i32
    return %c0_i32, %c0_i32_0 : i32, i32
  }
  func.func @transform_6(%arg0: i32) -> (i32, i32) {
    %c0_i32 = arith.constant 0 : i32
    %c0_i32_0 = arith.constant 0 : i32
    %c0_i32_1 = arith.constant 0 : i32
    return %c0_i32, %c0_i32_0 : i32, i32
  }
  func.func @transform_7(%arg0: i32) -> (i32, i32) {
    %c0_i32 = arith.constant 0 : i32
    %c0_i32_0 = arith.constant 0 : i32
    %c0_i32_1 = arith.constant 0 : i32
    return %c0_i32, %c0_i32_0 : i32, i32
  }
  func.func @transform_8(%arg0: i32) -> (i32, i32) {
    %c0_i32 = arith.constant 0 : i32
    %c0_i32_0 = arith.constant 0 : i32
    %c0_i32_1 = arith.constant 0 : i32
    return %c0_i32, %c0_i32_0 : i32, i32
  }
  func.func @transform_9(%arg0: i32) -> (i32, i32) {
    %c0_i32 = arith.constant 0 : i32
    %c0_i32_0 = arith.constant 0 : i32
    %c0_i32_1 = arith.constant 0 : i32
    return %c0_i32, %c0_i32_0 : i32, i32
  }
  func.func @transform_10(%arg0: i32) -> (i32, i32) {
    %c0_i32 = arith.constant 0 : i32
    %c0_i32_0 = arith.constant 0 : i32
    %c0_i32_1 = arith.constant 0 : i32
    return %c0_i32, %c0_i32_0 : i32, i32
  }
  func.func @transform_11(%arg0: i32) -> (i32, i32) {
    %c0_i32 = arith.constant 0 : i32
    %c0_i32_0 = arith.constant 0 : i32
    %c0_i32_1 = arith.constant 0 : i32
    return %c0_i32, %c0_i32_0 : i32, i32
  }
  func.func @transform_12(%arg0: i32) -> (i32, i32) {
    %c0_i32 = arith.constant 0 : i32
    %c0_i32_0 = arith.constant 0 : i32
    %c0_i32_1 = arith.constant 0 : i32
    return %c0_i32, %c0_i32_0 : i32, i32
  }
  func.func @transform_13(%arg0: i32) -> (i32, i32) {
    %c0_i32 = arith.constant 0 : i32
    %c0_i32_0 = arith.constant 0 : i32
    %c0_i32_1 = arith.constant 0 : i32
    return %c0_i32, %c0_i32_0 : i32, i32
  }
  func.func @transform_14(%arg0: i32) -> (i32, i32) {
    %c0_i32 = arith.constant 0 : i32
    %c0_i32_0 = arith.constant 0 : i32
    %c0_i32_1 = arith.constant 0 : i32
    return %c0_i32, %c0_i32_0 : i32, i32
  }
  func.func @transform_15(%arg0: i32) -> (i32, i32) {
    %c0_i32 = arith.constant 0 : i32
    %c0_i32_0 = arith.constant 0 : i32
    %c0_i32_1 = arith.constant 0 : i32
    return %c0_i32, %c0_i32_0 : i32, i32
  }
  func.func @transform_16(%arg0: i32) -> (i32, i32) {
    %c0_i32 = arith.constant 0 : i32
    %c0_i32_0 = arith.constant 0 : i32
    %c0_i32_1 = arith.constant 0 : i32
    return %c0_i32, %c0_i32_0 : i32, i32
  }
  func.func @transform_17(%arg0: i32) -> (i32, i32) {
    %c0_i32 = arith.constant 0 : i32
    %c0_i32_0 = arith.constant 0 : i32
    %c0_i32_1 = arith.constant 0 : i32
    return %c0_i32, %c0_i32_0 : i32, i32
  }
  func.func @transform_18(%arg0: i32) -> (i32, i32) {
    %c0_i32 = arith.constant 0 : i32
    %c0_i32_0 = arith.constant 0 : i32
    %c0_i32_1 = arith.constant 0 : i32
    return %c0_i32, %c0_i32_0 : i32, i32
  }
  func.func @transform_19(%arg0: i32) -> (i32, i32) {
    %c0_i32 = arith.constant 0 : i32
    %c0_i32_0 = arith.constant 0 : i32
    %c0_i32_1 = arith.constant 0 : i32
    return %c0_i32, %c0_i32_0 : i32, i32
  }
  func.func @transform_20(%arg0: i32) -> (i32, i32, i32) {
    %c0_i32 = arith.constant 0 : i32
    %c0_i32_0 = arith.constant 0 : i32
    %c0_i32_1 = arith.constant 0 : i32
    %c0_i32_2 = arith.constant 0 : i32
    return %c0_i32, %c0_i32_0, %c0_i32_1 : i32, i32, i32
  }
}

</mosaic_0001>

<bundles_post_ra>
// kernel: tpu_custom_call.1
= control target key start
LH: loop header
LB: loop body
LE: loop exit
PB: predicated region body
PF: predicated region fallthrough
CT: control target
= control target key end

     0   :  { %s5682_s0 = inlined_call_operand.hbm [shape: f32[2,16,128], index: 0, kind: input, shape index: {}]   ;;  %s5683_s1 = inlined_call_operand.hbm [shape: f32[2,8,128], index: 1, kind: input, shape index: {}]   ;;  %s5684_s2 = inlined_call_operand.hbm [shape: bf16[128,384], index: 2, kind: input, shape index: {}]   ;;  %s5685_s3 = inlined_call_operand.vmem [shape: f32[1,384], index: 3, kind: input, shape index: {}]   ;;  %s5686_s4 = inlined_call_operand.hbm [shape: bf16[128,128], index: 4, kind: input, shape index: {}]   ;;  %s5687_s5 = inlined_call_operand.vmem [shape: f32[1,128], index: 5, kind: input, shape index: {}]   ;;  %s5688_s6 = inlined_call_operand.vmem [shape: f32[1,128], index: 6, kind: input, shape index: {}]   ;;  %s5689_s7 = inlined_call_operand.vmem [shape: f32[1,128], index: 7, kind: input, shape index: {}]   ;;  %s5690_s8 = inlined_call_operand.hbm [shape: bf16[128,128], index: 8, kind: input, shape index: {}]   ;;  %s5691_s9 = inlined_call_operand.vmem [shape: f32[1,128], index: 9, kind: input, shape index: {}]   ;;  %s5692_s10 = inlined_call_operand.hbm [shape: bf16[128,256], index: 10, kind: input, shape index: {}]   ;;  %s5693_s11 = inlined_call_operand.vmem [shape: f32[1,256], index: 11, kind: input, shape index: {}]   ;;  %s5694_s12 = inlined_call_operand.hbm [shape: bf16[128,128], index: 12, kind: input, shape index: {}]   ;;  %s5695_s13 = inlined_call_operand.vmem [shape: f32[1,128], index: 13, kind: input, shape index: {}]   ;;  %s5696_s14 = inlined_call_operand.vmem [shape: f32[1,128], index: 14, kind: input, shape index: {}]   ;;  %s5697_s15 = inlined_call_operand.vmem [shape: f32[1,128], index: 15, kind: input, shape index: {}]   ;;  %s5698_s16 = inlined_call_operand.hbm [shape: bf16[128,256], index: 16, kind: input, shape index: {}]   ;;  %s5699_s17 = inlined_call_operand.vmem [shape: f32[1,256], index: 17, kind: input, shape index: {}]   ;;  %s5700_s18 = inlined_call_operand.hbm [shape: bf16[256,128], index: 18, kind: input, shape index: {}]   ;;  %s5701_s19 = inlined_call_operand.vmem [shape: f32[1,128], index: 19, kind: input, shape index: {}]   ;;  %s5702_s20 = inlined_call_operand.hbm [shape: f32[2,16,128], index: 20, kind: output, shape index: {}]  }
   0x1   :  { %5707 = sst [smem:[#allocation24_spill]] %s5682_s0 }
   0x2   :  { %5708 = sst [smem:[#allocation25_spill]] %s5683_s1 }
   0x3   :  { %5709 = sst [smem:[#allocation26_spill]] %s5684_s2 }
   0x4   :  { %5710 = sst [smem:[#allocation27_spill]] %s5685_s3 }
   0x5   :  { %5711 = sst [smem:[#allocation28_spill]] %s5686_s4 }
   0x6   :  { %25 = vsyncpa [#allocation3], 0 }
   0x7   :  { %26 = vsyncpa [#allocation6], 0 }
   0x8   :  { %27 = vsyncpa [#allocation9], 0 }
   0x9   :  { %28 = vsyncpa [#allocation12], 0 }
   0xa   :  { %29 = vsyncpa [#allocation15], 0 }
   0xb   :  { %30 = vsyncpa [#allocation4], 0  ;;  %s4768_s1 = smov [#allocation5]   ;;  %s4769_s23 = smov [#allocation8]  }
   0xc   :  { %s48_s22 = sshll.u32 %s4768_s1, 4  ;;  %s74_s24 = sshll.u32 %s4769_s23, 4  ;;  %s49_s22 = int_to_ptr.vmem [resolvable:$true] %s48_s22  ;;  %s75_s24 = int_to_ptr.vmem [resolvable:$true] %s74_s24 }
   0xd   :  { %s4564_s2 = scalar_lea.vmem %s49_s22, 256  ;;  %p4569_p1 = scmp.lt.s32.totalorder %s49_s22, %s49_s22 }
   0xe   :  { %p4565_p0 = scmp.ne.s32.totalorder %s49_s22, %s4564_s2  ;;  %p4570_p2 = scmp.lt.s32.totalorder %s4564_s2, %s4564_s2 }
  0x10   :  { %p4571_p3 = por %p4570_p2, %p4569_p1 }
  0x12   :  { %p4572_p4 = pnand %p4571_p3, %p4565_p0 }
  0x14   :  { %4575 = shalt.err (!%p4572_p4)
}
  0x15   :  { %s4770_s25 = smov 128   ;;  %s4771_s3 = smov 8  }
  0x16   :  { %s5712_s28 = sld [smem:[#allocation25_spill]]  ;;  %s4584_s4 = scalar_lea.vmem %s75_s24, 1024 }
  0x17   :  { %p4585_p5 = scmp.ne.s32.totalorder %s75_s24, %s4584_s4  ;;  %p4589_p6 = scmp.lt.s32.totalorder %s75_s24, %s75_s24 }
  0x18   :  { %p4590_p7 = scmp.lt.s32.totalorder %s4584_s4, %s4584_s4 }
  0x1a   :  { %p4591_p8 = por %p4590_p7, %p4589_p6 }
  0x1c   :  { %54 = dma.hbm_to_vmem [thread:$0]  %s5712_s28, 256, %s49_s22, [#allocation6], %s4770_s25, %s4770_s25, %s4771_s3  }
  0x1d   :  { %p4592_p9 = pnand %p4591_p8, %p4585_p5 }
  0x1f   :  { %4595 = shalt.err (!%p4592_p9)
}
  0x20   :  { %s5703_s29 = smov 64   ;;  %s5705_s30 = smov 4  }
  0x21   :  { %s5713_s1 = sld [smem:[#allocation28_spill]]  ;;  %s4774_s23 = smov [#allocation11]  }
  0x22   :  { %s106_s2 = sshll.u32 %s4774_s23, 4  ;;  %s4775_s26 = smov [#allocation14]   ;;  %s107_s2 = int_to_ptr.vmem [resolvable:$true] %s106_s2 }
  0x23   :  { %s138_s22 = sshll.u32 %s4775_s26, 4  ;;  %s4604_s27 = scalar_lea.vmem %s107_s2, 2048  ;;  %s139_s22 = int_to_ptr.vmem [resolvable:$true] %s138_s22 }
  0x24   :  { %p4605_p10 = scmp.ne.s32.totalorder %s107_s2, %s4604_s27  ;;  %p4609_p11 = scmp.lt.s32.totalorder %s107_s2, %s107_s2 }
  0x25   :  { %p4610_p12 = scmp.lt.s32.totalorder %s4604_s27, %s4604_s27 }
  0x27   :  { %80 = dma.hbm_to_vmem [thread:$0]  %s5713_s1, 1024, %s75_s24, [#allocation9], %s5703_s29, %s5703_s29, %s5705_s30  }
  0x28   :  { %p4611_p13 = por %p4610_p12, %p4609_p11 }
  0x2a   :  { %p4612_p0 = pnand %p4611_p13, %p4605_p10 }
  0x2c   :  { %4615 = shalt.err (!%p4612_p0)
}
  0x2d   :  { %112 = dma.hbm_to_vmem [thread:$0]  %s5692_s10, 2048, %s107_s2, [#allocation12], %s4770_s25, %s4770_s25, %s4771_s3  }
  0x2e   :  { %s4624_s24 = scalar_lea.vmem %s139_s22, 2048  ;;  %p4629_p2 = scmp.lt.s32.totalorder %s139_s22, %s139_s22 }
  0x2f   :  { %p4625_p1 = scmp.ne.s32.totalorder %s139_s22, %s4624_s24  ;;  %p4630_p3 = scmp.lt.s32.totalorder %s4624_s24, %s4624_s24 }
  0x31   :  { %p4631_p4 = por %p4630_p3, %p4629_p2 }
  0x33   :  { %p4632_p5 = pnand %p4631_p4, %p4625_p1 }
  0x35   :  { %4635 = shalt.err (!%p4632_p5)
}
  0x36   :  { %144 = dma.hbm_to_vmem [thread:$0]  %s5698_s16, 2048, %s139_s22, [#allocation15], %s4770_s25, %s4770_s25, %s4771_s3  }
  0x37   :  { %s4776_s1 = smov [#allocation2]   ;;  %s4777_s26 = smov [#allocation7]  }
  0x38   :  { %s36_s23 = sshll.u32 %s4776_s1, 4  ;;  %s60_s27 = sshll.u32 %s4777_s26, 4  ;;  %s37_s23 = int_to_ptr.vmem [resolvable:$true] %s36_s23  ;;  %s61_s27 = int_to_ptr.vmem [resolvable:$true] %s60_s27 }
  0x39   :  { %s4644_s10 = scalar_lea.vmem %s37_s23, 512  ;;  %p4649_p7 = scmp.lt.s32.totalorder %s37_s23, %s37_s23 }
  0x3a   :  { %p4645_p6 = scmp.ne.s32.totalorder %s37_s23, %s4644_s10  ;;  %p4650_p8 = scmp.lt.s32.totalorder %s4644_s10, %s4644_s10 }
  0x3c   :  { %p4651_p9 = por %p4650_p8, %p4649_p7 }
  0x3e   :  { %p4652_p10 = pnand %p4651_p9, %p4645_p6 }
  0x40   :  { %4655 = shalt.err (!%p4652_p10)
}
  0x41   :  { %s5714_s4 = sld [smem:[#allocation24_spill]]  ;;  %s4664_s16 = scalar_lea.vmem %s61_s27, 3072 }
  0x42   :  { %p4665_p11 = scmp.ne.s32.totalorder %s61_s27, %s4664_s16  ;;  %p4669_p12 = scmp.lt.s32.totalorder %s61_s27, %s61_s27 }
  0x43   :  { %p4670_p13 = scmp.lt.s32.totalorder %s4664_s16, %s4664_s16 }
  0x45   :  { %p4671_p0 = por %p4670_p13, %p4669_p12 }
  0x47   :  { %42 = dma.hbm_to_vmem [thread:$0]  %s5714_s4, 512, %s37_s23, [#allocation3], %s4770_s25, %s4770_s25, %s4771_s3  }
  0x48   :  { %p4672_p1 = pnand %p4671_p0, %p4665_p11 }
  0x4a   :  { %4675 = shalt.err (!%p4672_p1)
}
  0x4b   :  { %s4778_s22 = smov 192   ;;  %s4779_s24 = smov 12  }
  0x4c   :  { %s5715_s1 = sld [smem:[#allocation26_spill]]  ;;  %s4780_s26 = smov [#allocation10]  }
  0x4d   :  { %s92_s10 = sshll.u32 %s4780_s26, 4  ;;  %s4781_s29 = smov [#allocation13]   ;;  %s93_s10 = int_to_ptr.vmem [resolvable:$true] %s92_s10 }
  0x4e   :  { %s120_s30 = sshll.u32 %s4781_s29, 4  ;;  %s4684_s23 = scalar_lea.vmem %s93_s10, 1024  ;;  %s121_s30 = int_to_ptr.vmem [resolvable:$true] %s120_s30 }
  0x4f   :  { %p4685_p2 = scmp.ne.s32.totalorder %s93_s10, %s4684_s23  ;;  %p4689_p3 = scmp.lt.s32.totalorder %s93_s10, %s93_s10 }
  0x50   :  { %p4690_p4 = scmp.lt.s32.totalorder %s4684_s23, %s4684_s23 }
  0x52   :  { %66 = dma.hbm_to_vmem [thread:$0]  %s5715_s1, 3072, %s61_s27, [#allocation6], %s4778_s22, %s4778_s22, %s4779_s24  }
  0x53   :  { %p4691_p5 = por %p4690_p4, %p4689_p3 }
  0x55   :  { %p4692_p6 = pnand %p4691_p5, %p4685_p2 }
  0x57   :  { %4695 = shalt.err (!%p4692_p6)
}
  0x58   :  { %s5716_s2 = smov 4   ;;  %s5717_s28 = smov 64  }
  0x59   :  { %98 = dma.hbm_to_vmem [thread:$0]  %s5690_s8, 1024, %s93_s10, [#allocation9], %s5717_s28, %s5717_s28, %s5716_s2  }
  0x5a   :  { %s4704_s27 = scalar_lea.vmem %s121_s30, 1024  ;;  %p4709_p8 = scmp.lt.s32.totalorder %s121_s30, %s121_s30 }
  0x5b   :  { %p4705_p7 = scmp.ne.s32.totalorder %s121_s30, %s4704_s27  ;;  %p4710_p9 = scmp.lt.s32.totalorder %s4704_s27, %s4704_s27 }
  0x5d   :  { %p4711_p10 = por %p4710_p9, %p4709_p8 }
  0x5f   :  { %p4712_p11 = pnand %p4711_p10, %p4705_p7 }
  0x61   :  { %4715 = shalt.err (!%p4712_p11)
}
  0x62   :  { %126 = dma.hbm_to_vmem [thread:$0]  %s5694_s12, 1024, %s121_s30, [#allocation12], %s5717_s28, %s5717_s28, %s5716_s2  }
  0x63   :  { %s4782_s24 = smov [#allocation16]  }
  0x64   :  { %s152_s0 = sshll.u32 %s4782_s24, 4  ;;  %s153_s0 = int_to_ptr.vmem [resolvable:$true] %s152_s0 }
  0x65   :  { %s4724_s21 = scalar_lea.vmem %s153_s0, 2048  ;;  %p4729_p13 = scmp.lt.s32.totalorder %s153_s0, %s153_s0 }
  0x66   :  { %p4725_p12 = scmp.ne.s32.totalorder %s153_s0, %s4724_s21  ;;  %p4730_p0 = scmp.lt.s32.totalorder %s4724_s21, %s4724_s21 }
  0x68   :  { %p4731_p1 = por %p4730_p0, %p4729_p13 }
  0x6a   :  { %p4732_p2 = pnand %p4731_p1, %p4725_p12 }
  0x6c   :  { %4735 = shalt.err (!%p4732_p2)
}
  0x6d   :  { %158 = dma.hbm_to_vmem [thread:$0]  %s5700_s18, 2048, %s153_s0, [#allocation15], %s5717_s28, %s5717_s28, %s5716_s2  }
  0x6e   :  { %4756 = dma.done.wait [#allocation3], 512  }
  0x6f   :  { %4757 = vsyncadd [#allocation3], 4294966784 }
  0x70   :  { %4758 = dma.done.wait [#allocation6], 3328  }
  0x71   :  { %4759 = vsyncadd [#allocation6], 4294963968 }
  0x72   :  { %4760 = dma.done.wait [#allocation9], 2048  }
  0x73   :  { %4761 = vsyncadd [#allocation9], 4294965248 }
  0x74   :  { %4762 = dma.done.wait [#allocation12], 3072  }
  0x75   :  { %4763 = vsyncadd [#allocation12], 4294964224 }
  0x76   :  { %4764 = dma.done.wait [#allocation15], 4096  }
  0x77   :  { %4765 = vsyncadd [#allocation15], 4294963200  ;;  %v4783_v0 = vmov 0   ;;  %v4280_v1 = vld [vmem:[#allocation7 + $0xac] ss:$12 sps:$4 sm:$0xff]   ;;  %v344_v8 = vld [vmem:[#allocation2] sm:$0xff]  ;;  %v353_v32 = vlaneseq }
  0x78   :  { %528 = vmatprep.mubr.bf16.mxu0 %v4783_v0  ;;  %v4282_v2 = vld [vmem:[#allocation7 + $0xa8] ss:$12 sps:$4 sm:$0xff]   ;;  %496 = vmatprep.subr.bf16.mxu0 %v4280_v1  ;;  %v4285_v4 = vld [vmem:[#allocation7 + $0x90] ss:$12 sps:$4 sm:$0xff]   ;;  %v4288_v6 = vld [vmem:[#allocation7 + $0x78] ss:$12 sps:$4 sm:$0xff]  }
  0x79   :  { %v4283_v3 = vld [vmem:[#allocation7 + $0x94] ss:$12 sps:$4 sm:$0xff]   ;;  %497 = vmatpush1.bf16.msra.mxu0 %v4282_v2  ;;  %v4286_v5 = vld [vmem:[#allocation7 + $0x7c] ss:$12 sps:$4 sm:$0xff]   ;;  %v4289_v7 = vld [vmem:[#allocation7 + $0x64] ss:$12 sps:$4 sm:$0xff]  }
  0x7a   :  { %498 = vmatprep.subr.bf16.mxu0 %v4283_v3  ;;  %v4291_v9 = vld [vmem:[#allocation7 + $0x60] ss:$12 sps:$4 sm:$0xff]   ;;  %v345_v10 = vld [vmem:[#allocation2 + $0x8] sm:$0xff]  ;;  %v4294_v13 = vld [vmem:[#allocation7 + $0x48] ss:$12 sps:$4 sm:$0xff]   ;;  %v4784_v23 = vmov 0.0  }
  0x7b   :  { %v4292_v11 = vld [vmem:[#allocation7 + $0x4c] ss:$12 sps:$4 sm:$0xff]   ;;  %v350_v12 = vpack.c.bf16 %v345_v10, %v344_v8  ;;  %v4295_v14 = vld [vmem:[#allocation7 + $0x34] ss:$12 sps:$4 sm:$0xff]   ;;  %v4297_v15 = vld [vmem:[#allocation7 + $0x30] ss:$12 sps:$4 sm:$0xff]  }
  0x7c   :  { %v4298_v16 = vld [vmem:[#allocation7 + $0x1c] ss:$12 sps:$4 sm:$0xff]   ;;  %v4300_v17 = vld [vmem:[#allocation7 + $0x18] ss:$12 sps:$4 sm:$0xff]   ;;  %v4303_v19 = vld [vmem:[#allocation7] ss:$12 sps:$4 sm:$0xff]  }
  0x7d   :  { %499 = vmatpush1.bf16.msra.mxu0 %v4285_v4  ;;  %3942 = vmatprep.mubr.bf16.mxu1 %v350_v12  ;;  %v4301_v18 = vld [vmem:[#allocation7 + $0x4] ss:$12 sps:$4 sm:$0xff]   ;;  %v347_v21 = vld [vmem:[#allocation2 + $0x18] sm:$0xff]  ;;  %vm4785_vm0 = vmmov 0   ;;  %v4955_v33 = vshrl.u32 %v353_v32, 7  ;;  %s5718_s30 = sld [smem:[#allocation27_spill]] }
  0x7e   :  { %500 = vmatprep.subr.bf16.mxu0 %v4286_v5  ;;  %v346_v20 = vld [vmem:[#allocation2 + $0x10] sm:$0xff]  ;;  %v4304_v24 = vld [vmem:[#allocation7 + $0xb0] ss:$12 sps:$4 sm:$0xff]   ;;  %v4307_v27 = vld [vmem:[#allocation7 + $0x68] ss:$12 sps:$4 sm:$0xff]   ;;  %vm613_vm1 = vcmask 261120  }
  0x7f   :  { %v351_v22 = vpack.c.bf16 %v347_v21, %v346_v20  ;;  %v4305_v25 = vld [vmem:[#allocation7 + $0x98] ss:$12 sps:$4 sm:$0xff]   ;;  %3926 = vmatprep.subr.bf16.mxu1 %v4304_v24  ;;  %v4306_v26 = vld [vmem:[#allocation7 + $0x80] ss:$12 sps:$4 sm:$0xff]   ;;  %v4308_v28 = vld [vmem:[#allocation7 + $0x50] ss:$12 sps:$4 sm:$0xff]  }
  0x80   :  { %3927 = vmatpush3.bf16.msra.mxu1 %v4304_v24  ;;  %v4309_v29 = vld [vmem:[#allocation7 + $0x38] ss:$12 sps:$4 sm:$0xff]   ;;  %v4310_v30 = vld [vmem:[#allocation7 + $0x20] ss:$12 sps:$4 sm:$0xff]   ;;  %v4311_v31 = vld [vmem:[#allocation7 + $0x8] ss:$12 sps:$4 sm:$0xff]  }
  0x81   :  { %501 = vmatpush1.bf16.msra.mxu0 %v4288_v6  ;;  %3928 = vmatprep.subr.bf16.mxu1 %v4305_v25  ;;  %v4958_v34 = vsub.s32 1, %v4955_v33  ;;  %v4964_v38 = vsub.s32 0, %v4955_v33  ;;  %s4786_s26 = smov 96   ;;  %s4787_s10 = smov 32   ;;  %v363_v60 = vsub.s32 2, %v4955_v33  ;;  %vm661_vm4 = vcmask 130048  }
  0x82   :  { %502 = vmatprep.subr.bf16.mxu0 %v4289_v7  ;;  %vm1121_vm5 = vcmask 523264   ;;  %vm1124_vm6 = vcmask 785408   ;;  %vm2129_vm7 = vcmask 1043456   ;;  %vm2102_vm8 = vcmask 64512  }
  0x83   :  { %v221_v36 = vld [vmem:[%s5718_s30] sm:$0x7] }
  0x84   :  { %3929 = vmatpush3.bf16.msra.mxu1 %v4305_v25  ;;  %v360_v39 = vrot.slane %v221_v36, %v4958_v34  ;;  %v356_v42 = vrot.slane %v221_v36, %v4964_v38  ;;  %v364_v63 = vrot.slane %v221_v36, %v363_v60 }
  0x85   :  { %503 = vmatpush1.bf16.msra.mxu0 %v4291_v9  ;;  %3930 = vmatprep.subr.bf16.mxu1 %v4306_v26 }
  0x86   :  { %504 = vmatprep.subr.bf16.mxu0 %v4292_v11 }
  0x88   :  { %3931 = vmatpush3.bf16.msra.mxu1 %v4306_v26 }
  0x89   :  { %505 = vmatpush1.bf16.msra.mxu0 %v4294_v13  ;;  %3932 = vmatprep.subr.bf16.mxu1 %v4307_v27 }
  0x8a   :  { %506 = vmatprep.subr.bf16.mxu0 %v4295_v14 }
  0x8c   :  { %3933 = vmatpush3.bf16.msra.mxu1 %v4307_v27 }
  0x8d   :  { %507 = vmatpush1.bf16.msra.mxu0 %v4297_v15  ;;  %3934 = vmatprep.subr.bf16.mxu1 %v4308_v28 }
  0x8e   :  { %508 = vmatprep.subr.bf16.mxu0 %v4298_v16 }
  0x90   :  { %3935 = vmatpush3.bf16.msra.mxu1 %v4308_v28 }
  0x91   :  { %509 = vmatpush1.bf16.msra.mxu0 %v4300_v17  ;;  %3936 = vmatprep.subr.bf16.mxu1 %v4309_v29 }
  0x92   :  { %510 = vmatprep.subr.bf16.mxu0 %v4301_v18 }
  0x94   :  { %3937 = vmatpush3.bf16.msra.mxu1 %v4309_v29  ;;  %v608_v29 = vand.u32 127, %v353_v32 }
  0x95   :  { %511 = vmatpush1.bf16.msra.mxu0 %v4303_v19  ;;  %3938 = vmatprep.subr.bf16.mxu1 %v4310_v30 }
  0x96   :  { %3946 = vmatprep.subr.bf16.mxu0 %v4784_v23  ;;  %vm609_vm2 = vcmp.le.s32.totalorder %v608_v29, %v4955_v33 }
  0x98   :  { %529 = vmatmul.mubr.bf16.vlgmr.msra.gmra.mxu0 %v350_v12  ;;  %3939 = vmatpush3.bf16.msra.mxu1 %v4310_v30  ;;  %v606_v30 = vadd.s32 8, %v4955_v33 }
  0x99   :  { %538 = vmatprep.mubr.bf16.mxu0 %v4783_v0  ;;  %3940 = vmatprep.subr.bf16.mxu1 %v4311_v31 }
  0x9a   :  { %vm610_vm3 = vcmp.le.s32.totalorder %v608_v29, %v606_v30 }
  0x9c   :  { %3941 = vmatpush3.bf16.msra.mxu1 %v4311_v31  ;;  %v4788_v31 = vmov -1e+09  }
  0x9d   :  { %3958 = vmatprep.subr.bf16.mxu1 %v4784_v23 }
  0x9f   :  { %3943 = vmatmul.mubr.bf16.vlgmr.msra.gmra.mxu1 %v351_v22 }
  0xa0   :  { %539 = vmatmul.mubr.bf16.gmra.mxu0 %v351_v22  ;;  %3960 = vmatprep.mubr.msk.bf16.mxu1 %vm4785_vm0, %v4784_v23 }
  0xa1   :  { %3948 = vmatprep.mubr.msk.bf16.mxu0 %vm4785_vm0, %v4784_v23 }
 0x158   :  { %v530_v35 = vpop.f32.mrf.mxu0 }
 0x159   :  { %v531_v49 = vadd.f32 %v530_v35, %v356_v42  ;;  %v5027_v35 = vsel %vm609_vm2, 0.0, %v4788_v31 }
 0x15a   :  { %v532_v37 = vpop.f32.mrf.mxu0 }
 0x15b   :  { %v533_v43 = vadd.f32 %v532_v37, %v360_v39 }
 0x15c   :  { %v534_v40 = vpop.f32.mrf.mxu0 }
 0x15d   :  { %v535_v46 = vadd.f32 %v534_v40, %v356_v42  ;;  %v5032_v40 = vsel %vm610_vm3, 0.0, %v4788_v31 }
 0x15e   :  { %v536_v41 = vpop.f32.mrf.mxu0 }
 0x15f   :  { %v537_v44 = vadd.f32 %v536_v41, %v360_v39  ;;  %v598_v52 = vpack.c.bf16 %v535_v46, %v531_v49  ;;  %v3944_v1 = vpop.f32.mrf.mxu1 }
 0x160   :  { %v540_v45 = vpop.f32.mrf.mxu0  ;;  %v592_v3 = vadd.f32 %v3944_v1, %v364_v63 }
 0x161   :  { %v599_v47 = vpack.c.bf16 %v537_v44, %v533_v43  ;;  %v541_v53 = vadd.f32 %v540_v45, %v356_v42  ;;  %v583_v4 = vpop.f32.mrf.mxu1 }
 0x162   :  { %v542_v48 = vpop.f32.mrf.mxu0  ;;  %v584_v8 = vadd.f32 %v583_v4, %v364_v63 }
 0x163   :  { %855 = vrot.lane.b32.xlu1 %v599_v47, %s5717_s28  ;;  %733 = vrot.lane.b32.xlu0 %v599_v47, %s4786_s26  ;;  %v618_v50 = vsel %vm613_vm1, %v599_v47, 0  ;;  %v543_v55 = vadd.f32 %v542_v48, %v360_v39  ;;  %v3945_v7 = vpop.f32.mrf.mxu1 }
 0x164   :  { %3947 = vmatpush3.bf16.xpose.msra.mxu0 %v618_v50  ;;  %v544_v51 = vpop.f32.mrf.mxu0  ;;  %v595_v9 = vadd.f32 %v3945_v7, %v364_v63 }
 0x165   :  { %3952 = vmatprep.subr.bf16.mxu0 %v4784_v23  ;;  %v545_v56 = vadd.f32 %v544_v51, %v356_v42  ;;  %v586_v10 = vpop.f32.mrf.mxu1 }
 0x166   :  { %v546_v54 = vpop.f32.mrf.mxu0  ;;  %v4993_v11 = vpack.c.bf16 %v595_v9, %v592_v3  ;;  %v587_v12 = vadd.f32 %v586_v10, %v364_v63 }
 0x167   :  { %853 = vrot.lane.b32.xlu1 %v598_v52, %s5717_s28  ;;  %730 = vrot.lane.b32.xlu0 %v598_v52, %s4786_s26  ;;  %v547_v57 = vadd.f32 %v546_v54, %v360_v39  ;;  %v601_v58 = vpack.c.bf16 %v545_v56, %v541_v53 }
 0x168   :  { %v4995_v14 = vpack.c.bf16 %v587_v12, %v584_v8 }
 0x169   :  { %v602_v59 = vpack.c.bf16 %v547_v57, %v543_v55 }
 0x16b   :  { %974 = vrot.lane.b32.xlu1 %v598_v52, %s4787_s10  ;;  %976 = vrot.lane.b32.xlu0 %v599_v47, %s4787_s10  ;;  %v1131_v18 = vsel %vm613_vm1, %v602_v59, 0 }
 0x16c   :  { %3949 = vmatmul.mubr.msk.bf16.vlgmr.msra.gmra.mxu0 %vm613_vm1, %v598_v52 }
 0x16d   :  { %3954 = vmatprep.mubr.msk.bf16.mxu0 %vm4785_vm0, %v4784_v23  ;;  %3953 = vmatpush3.bf16.msra.mxu0 %v4995_v14 }
 0x16e   :  { %3964 = vmatprep.subr.bf16.mxu0 %v4784_v23 }
 0x16f   :  { %1245 = vrot.lane.b32.xlu0 %v602_v59, %s4786_s26  ;;  %1242 = vrot.lane.b32.xlu1 %v601_v58, %s4786_s26 }
 0x173   :  { %1367 = vrot.lane.b32.xlu0 %v602_v59, %s5717_s28  ;;  %1365 = vrot.lane.b32.xlu1 %v601_v58, %s5717_s28 }
 0x177   :  { %1488 = vrot.lane.b32.xlu0 %v602_v59, %s4787_s10  ;;  %1486 = vrot.lane.b32.xlu1 %v601_v58, %s4787_s10 }
 0x1d5   :  { %v734_v61 = vpop.permute.xlu0 %733  ;;  %v856_v2 = vpop.permute.xlu1 %855 }
 0x1d6   :  { %v739_v62 = vsel %vm613_vm1, %v734_v61, 0  ;;  %v861_v6 = vsel %vm613_vm1, %v856_v2, 0 }
 0x1d7   :  { %3959 = vmatpush3.bf16.xpose.msra.mxu1 %v739_v62 }
 0x1d8   :  { %3970 = vmatprep.subr.bf16.mxu1 %v4784_v23 }
 0x1d9   :  { %v731_v5 = vpop.permute.xlu0 %730  ;;  %v854_v15 = vpop.permute.xlu1 %853 }
 0x1dd   :  { %v977_v13 = vpop.permute.xlu0 %976  ;;  %v975_v17 = vpop.permute.xlu1 %974 }
 0x1de   :  { %3961 = vmatmul.mubr.msk.bf16.vlgmr.msra.gmra.mxu1 %vm613_vm1, %v731_v5  ;;  %v982_v16 = vsel %vm613_vm1, %v977_v13, 0 }
 0x1df   :  { %3971 = vmatpush3.bf16.xpose.msra.mxu1 %v861_v6  ;;  %3972 = vmatprep.mubr.msk.bf16.mxu1 %vm4785_vm0, %v4784_v23 }
 0x1e0   :  { %3982 = vmatprep.subr.bf16.mxu1 %v4784_v23 }
 0x1e1   :  { %v1246_v19 = vpop.permute.xlu0 %1245  ;;  %v1243_v22 = vpop.permute.xlu1 %1242 }
 0x1e2   :  { %v1251_v20 = vsel %vm613_vm1, %v1246_v19, 0 }
 0x1e5   :  { %v1368_v21 = vpop.permute.xlu0 %1367  ;;  %v1366_v26 = vpop.permute.xlu1 %1365 }
 0x1e6   :  { %3973 = vmatmul.mubr.msk.bf16.vlgmr.msra.gmra.mxu1 %vm613_vm1, %v854_v15  ;;  %v1373_v24 = vsel %vm613_vm1, %v1368_v21, 0 }
 0x1e7   :  { %3983 = vmatpush3.bf16.xpose.msra.mxu1 %v982_v16  ;;  %3984 = vmatprep.mubr.msk.bf16.mxu1 %vm4785_vm0, %v4784_v23 }
 0x1e8   :  { %3994 = vmatprep.subr.bf16.mxu1 %v4784_v23 }
 0x1e9   :  { %v1489_v25 = vpop.permute.xlu0 %1488  ;;  %v1487_v28 = vpop.permute.xlu1 %1486 }
 0x1ea   :  { %v1494_v27 = vsel %vm613_vm1, %v1489_v25, 0 }
 0x1ee   :  { %3985 = vmatmul.mubr.msk.bf16.vlgmr.msra.gmra.mxu1 %vm613_vm1, %v975_v17 }
 0x1ef   :  { %3995 = vmatpush3.bf16.xpose.msra.mxu1 %v1131_v18  ;;  %3996 = vmatprep.mubr.msk.bf16.mxu1 %vm4785_vm0, %v4784_v23 }
 0x1f0   :  { %4006 = vmatprep.subr.bf16.mxu1 %v4784_v23 }
 0x1f6   :  { %3997 = vmatmul.mubr.msk.bf16.vlgmr.msra.gmra.mxu1 %vm613_vm1, %v601_v58 }
 0x1f7   :  { %4007 = vmatpush3.bf16.xpose.msra.mxu1 %v1251_v20  ;;  %4008 = vmatprep.mubr.msk.bf16.mxu1 %vm4785_vm0, %v4784_v23 }
 0x1f8   :  { %4018 = vmatprep.subr.bf16.mxu1 %v4784_v23 }
 0x1fe   :  { %4009 = vmatmul.mubr.msk.bf16.vlgmr.msra.gmra.mxu1 %vm613_vm1, %v1243_v22 }
 0x1ff   :  { %4019 = vmatpush3.bf16.xpose.msra.mxu1 %v1373_v24  ;;  %4020 = vmatprep.mubr.msk.bf16.mxu1 %vm4785_vm0, %v4784_v23 }
 0x200   :  { %4030 = vmatprep.subr.bf16.mxu1 %v4784_v23 }
 0x206   :  { %4021 = vmatmul.mubr.msk.bf16.vlgmr.msra.gmra.mxu1 %vm613_vm1, %v1366_v26 }
 0x207   :  { %4031 = vmatpush3.bf16.xpose.msra.mxu1 %v1494_v27  ;;  %4032 = vmatprep.mubr.msk.bf16.mxu1 %vm4785_vm0, %v4784_v23 }
 0x20e   :  { %4033 = vmatmul.mubr.msk.bf16.vlgmr.msra.gmra.mxu1 %vm613_vm1, %v1487_v28 }
 0x22c   :  { %v654_v36 = vpop.f32.mrf.mxu0 }
 0x22d   :  { %v5030_v37 = vadd.f32 %v654_v36, %v5027_v35 }
 0x22e   :  { %v3950_v39 = vpop.f32.mrf.mxu0 }
 0x22f   :  { %v662_v41 = vsel %vm661_vm4, %v5030_v37, -inf }
 0x230   :  { %663 = vmax.xlane.f32.xlu0 %v662_v41  ;;  %v657_v32 = vpop.f32.mrf.mxu0 }
 0x231   :  { %v658_v42 = vadd.f32 %v657_v32, %v5032_v40 }
 0x232   :  { %v3951_v33 = vpop.f32.mrf.mxu0 }
 0x233   :  { %v665_v43 = vsel %vm661_vm4, %v658_v42, -inf }
 0x234   :  { %666 = vmax.xlane.f32.xlu1 %v665_v43 }
 0x29e   :  { %v775_v44 = vpop.f32.mrf.mxu1 }
 0x29f   :  { %v5039_v45 = vadd.f32 %v775_v44, %v5027_v35 }
 0x2a0   :  { %v3962_v46 = vpop.f32.mrf.mxu1 }
 0x2a1   :  { %v782_v47 = vsel %vm661_vm4, %v5039_v45, -inf }
 0x2a2   :  { %v778_v48 = vpop.f32.mrf.mxu1  ;;  %783 = vmax.xlane.f32.xlu0 %v782_v47 }
 0x2a3   :  { %v5044_v49 = vadd.f32 %v778_v48, %v5032_v40 }
 0x2a4   :  { %v3963_v50 = vpop.f32.mrf.mxu1 }
 0x2a5   :  { %v785_v51 = vsel %vm661_vm4, %v5044_v49, -inf }
 0x2a6   :  { %v897_v52 = vpop.f32.mrf.mxu1  ;;  %786 = vmax.xlane.f32.xlu0 %v785_v51 }
 0x2a7   :  { %v5049_v53 = vadd.f32 %v897_v52, %v5027_v35 }
 0x2a8   :  { %v3974_v54 = vpop.f32.mrf.mxu1 }
 0x2a9   :  { %v904_v55 = vsel %vm661_vm4, %v5049_v53, -inf }
 0x2aa   :  { %v900_v56 = vpop.f32.mrf.mxu1  ;;  %905 = vmax.xlane.f32.xlu1 %v904_v55 }
 0x2ab   :  { %v5054_v57 = vadd.f32 %v900_v56, %v5032_v40 }
 0x2ac   :  { %v3975_v58 = vpop.f32.mrf.mxu1 }
 0x2ad   :  { %v907_v59 = vsel %vm661_vm4, %v5054_v57, -inf }
 0x2ae   :  { %v1018_v60 = vpop.f32.mrf.mxu1  ;;  %908 = vmax.xlane.f32.xlu0 %v907_v59 }
 0x2af   :  { %v5059_v61 = vadd.f32 %v1018_v60, %v5027_v35 }
 0x2b0   :  { %v3986_v62 = vpop.f32.mrf.mxu1 }
 0x2b1   :  { %v1025_v63 = vsel %vm661_vm4, %v5059_v61, -inf }
 0x2b2   :  { %v1021_v1 = vpop.f32.mrf.mxu1  ;;  %1026 = vmax.xlane.f32.xlu1 %v1025_v63 }
 0x2b3   :  { %v5064_v2 = vadd.f32 %v1021_v1, %v5032_v40 }
 0x2b4   :  { %v3987_v3 = vpop.f32.mrf.mxu1 }
 0x2b5   :  { %v1028_v4 = vsel %vm661_vm4, %v5064_v2, -inf }
 0x2b6   :  { %v1167_v5 = vpop.f32.mrf.mxu1  ;;  %1029 = vmax.xlane.f32.xlu0 %v1028_v4 }
 0x2b7   :  { %v1168_v46 = vadd.f32 %v1167_v5, %v5027_v35 }
 0x2b8   :  { %v3998_v6 = vpop.f32.mrf.mxu1 }
 0x2b9   :  { %v664_v33 = vpop.xlane.xlu0 %663  ;;  %v1174_v48 = vsel %vm661_vm4, %v1168_v46, -inf }
 0x2ba   :  { %v1170_v7 = vpop.f32.mrf.mxu1  ;;  %v668_v43 = vsub.f32 %v5030_v37, %v664_v33 }
 0x2bb   :  { %v5069_v8 = vadd.f32 %v1170_v7, %v5032_v40 }
 0x2bc   :  { %v3999_v9 = vpop.f32.mrf.mxu1  ;;  %v670_v44 = vmul.f32 1.442695, %v668_v43 }
 0x2bd   :  { %v667_v10 = vpop.xlane.xlu1 %666  ;;  %v1177_v12 = vsel %vm661_vm4, %v5069_v8, -inf }
 0x2be   :  { %v669_v13 = vsub.f32 %v658_v42, %v667_v10  ;;  %v1287_v15 = vpop.f32.mrf.mxu1  ;;  %1178 = vmax.xlane.f32.xlu0 %v1177_v12 }
 0x2bf   :  { %v5097_v47 = vadd.f32 %v1287_v15, %v5027_v35 }
 0x2c0   :  { %v672_v16 = vmul.f32 1.442695, %v669_v13  ;;  %v4010_v17 = vpop.f32.mrf.mxu1 }
 0x2c1   :  { %v1294_v50 = vsel %vm661_vm4, %v5097_v47, -inf }
 0x2c2   :  { %4400 = vpow2.f32 %v672_v16  ;;  %v1290_v18 = vpop.f32.mrf.mxu1 }
 0x2c3   :  { %v5074_v19 = vadd.f32 %v1290_v18, %v5032_v40  ;;  %806 = vrot.lane.b32.xlu1 %v4995_v14, %s4786_s26  ;;  %4402 = vpow2.f32 %v670_v44 }
 0x2c4   :  { %v4011_v20 = vpop.f32.mrf.mxu1 }
 0x2c5   :  { %v1297_v21 = vsel %vm661_vm4, %v5074_v19, -inf }
 0x2c6   :  { %v1409_v22 = vpop.f32.mrf.mxu1  ;;  %1298 = vmax.xlane.f32.xlu0 %v1297_v21 }
 0x2c8   :  { %v4022_v24 = vpop.f32.mrf.mxu1 }
 0x2ca   :  { %v1412_v25 = vpop.f32.mrf.mxu1 }
 0x2cb   :  { %v5081_v26 = vadd.f32 %v1412_v25, %v5032_v40 }
 0x2cc   :  { %v4023_v27 = vpop.f32.mrf.mxu1 }
 0x2cd   :  { %v1419_v28 = vsel %vm661_vm4, %v5081_v26, -inf }
 0x2ce   :  { %v1530_v29 = vpop.f32.mrf.mxu1  ;;  %1420 = vmax.xlane.f32.xlu0 %v1419_v28 }
 0x2cf   :  { %v5085_v30 = vpop.eup %4400  ;;  %v5110_v52 = vadd.f32 %v1530_v29, %v5027_v35 }
 0x2d0   :  { %v4034_v31 = vpop.f32.mrf.mxu1  ;;  %v677_v36 = vsel %vm661_vm4, %v5085_v30, 0.0  ;;  %v5107_v51 = vpop.eup %4402 }
 0x2d1   :  { %v674_v54 = vsel %vm661_vm4, %v5107_v51, 0.0  ;;  %v1537_v55 = vsel %vm661_vm4, %v5110_v52, -inf }
 0x2d2   :  { %v1533_v39 = vpop.f32.mrf.mxu1  ;;  %678 = vadd.xlane.f32.xlu0 %v677_v36 }
 0x2d3   :  { %v5090_v41 = vadd.f32 %v1533_v39, %v5032_v40  ;;  %v5101_v40 = vadd.f32 %v1409_v22, %v5027_v35 }
 0x2d4   :  { %v4035_v32 = vpop.f32.mrf.mxu1 }
 0x2d5   :  { %v1540_v42 = vsel %vm661_vm4, %v5090_v41, -inf  ;;  %v1416_v37 = vsel %vm661_vm4, %v5101_v40, -inf }
 0x2d6   :  { %1541 = vmax.xlane.f32.xlu0 %v1540_v42 }
 0x2e7   :  { %1175 = vmax.xlane.f32.xlu1 %v1174_v48 }
 0x2eb   :  { %1295 = vmax.xlane.f32.xlu1 %v1294_v50 }
 0x2ef   :  { %1417 = vmax.xlane.f32.xlu1 %v1416_v37 }
 0x2f3   :  { %675 = vadd.xlane.f32.xlu1 %v674_v54 }
 0x2f7   :  { %1538 = vmax.xlane.f32.xlu1 %v1537_v55 }
 0x32b   :  { %v784_v56 = vpop.xlane.xlu0 %783 }
 0x32c   :  { %v788_v58 = vsub.f32 %v5039_v45, %v784_v56 }
 0x32e   :  { %v790_v59 = vmul.f32 1.442695, %v788_v58 }
 0x32f   :  { %v787_v60 = vpop.xlane.xlu0 %786 }
 0x330   :  { %4404 = vpow2.f32 %v790_v59  ;;  %v789_v62 = vsub.f32 %v5044_v49, %v787_v60 }
 0x332   :  { %v792_v63 = vmul.f32 1.442695, %v789_v62 }
 0x333   :  { %v906_v45 = vpop.xlane.xlu1 %905 }
 0x334   :  { %4406 = vpow2.f32 %v792_v63  ;;  %v910_v49 = vsub.f32 %v5049_v53, %v906_v45 }
 0x336   :  { %v912_v9 = vmul.f32 1.442695, %v910_v49 }
 0x337   :  { %v909_v5 = vpop.xlane.xlu0 %908 }
 0x338   :  { %v911_v7 = vsub.f32 %v5054_v57, %v909_v5  ;;  %4408 = vpow2.f32 %v912_v9 }
 0x33a   :  { %v914_v13 = vmul.f32 1.442695, %v911_v7 }
 0x33b   :  { %v1027_v6 = vpop.xlane.xlu1 %1026 }
 0x33c   :  { %v1031_v10 = vsub.f32 %v5059_v61, %v1027_v6  ;;  %4410 = vpow2.f32 %v914_v13 }
 0x33d   :  { %v5118_v35 = vpop.eup %4404 }
 0x33e   :  { %v794_v1 = vsel %vm661_vm4, %v5118_v35, 0.0  ;;  %v1033_v15 = vmul.f32 1.442695, %v1031_v10 }
 0x33f   :  { %795 = vadd.xlane.f32.xlu1 %v794_v1  ;;  %v1030_v12 = vpop.xlane.xlu0 %1029  ;;  %v5135_v20 = vpop.permute.xlu1 %806 }
 0x340   :  { %v1032_v16 = vsub.f32 %v5064_v2, %v1030_v12  ;;  %4412 = vpow2.f32 %v1033_v15 }
 0x341   :  { %v5122_v3 = vpop.eup %4406 }
 0x342   :  { %v797_v4 = vsel %vm661_vm4, %v5122_v3, 0.0  ;;  %v1035_v18 = vmul.f32 1.442695, %v1032_v16 }
 0x343   :  { %798 = vadd.xlane.f32.xlu0 %v797_v4 }
 0x344   :  { %4414 = vpow2.f32 %v1035_v18 }
 0x345   :  { %v5137_v21 = vpop.eup %4408 }
 0x346   :  { %v916_v28 = vsel %vm661_vm4, %v5137_v21, 0.0 }
 0x347   :  { %v1179_v17 = vpop.xlane.xlu0 %1178 }
 0x349   :  { %v5139_v25 = vpop.eup %4410 }
 0x34a   :  { %v919_v39 = vsel %vm661_vm4, %v5139_v25, 0.0 }
 0x34f   :  { %v1299_v57 = vpop.xlane.xlu0 %1298 }
 0x350   :  { %1048 = vrot.lane.b32.xlu1 %v4995_v14, %s4787_s10  ;;  %v1301_v2 = vsub.f32 %v5074_v19, %v1299_v57 }
 0x352   :  { %v1304_v32 = vmul.f32 1.442695, %v1301_v2 }
 0x357   :  { %v1421_v61 = vpop.xlane.xlu0 %1420 }
 0x358   :  { %v1423_v42 = vsub.f32 %v5081_v26, %v1421_v61 }
 0x359   :  { %927 = vrot.lane.b32.xlu0 %v4995_v14, %s5717_s28  ;;  %v1181_v14 = vsub.f32 %v5069_v8, %v1179_v17  ;;  %v5144_v8 = vpop.eup %4412 }
 0x35a   :  { %v1037_v19 = vsel %vm661_vm4, %v5144_v8, 0.0  ;;  %v5152_v43 = vpop.eup %4414 }
 0x35b   :  { %v1184_v53 = vmul.f32 1.442695, %v1181_v14  ;;  %v679_v36 = vpop.xlane.xlu0 %678 }
 0x35d   :  { %4416 = vpow2.f32 %v1184_v53 }
 0x35f   :  { %v1542_v50 = vpop.xlane.xlu0 %1541 }
 0x360   :  { %v1544_v37 = vsub.f32 %v5090_v41, %v1542_v50 }
 0x362   :  { %v1547_v59 = vmul.f32 1.442695, %v1544_v37 }
 0x36a   :  { %v5156_v48 = vpop.eup %4416 }
 0x36b   :  { %v1189_v54 = vsel %vm661_vm4, %v5156_v48, 0.0 }
 0x370   :  { %v1176_v22 = vpop.xlane.xlu1 %1175 }
 0x371   :  { %v1180_v24 = vsub.f32 %v1168_v46, %v1176_v22  ;;  %v1426_v46 = vmul.f32 1.442695, %v1423_v42 }
 0x373   :  { %v1182_v27 = vmul.f32 1.442695, %v1180_v24 }
 0x374   :  { %917 = vadd.xlane.f32.xlu1 %v916_v28  ;;  %v1296_v29 = vpop.xlane.xlu1 %1295 }
 0x375   :  { %4418 = vpow2.f32 %v1182_v27  ;;  %v1300_v31 = vsub.f32 %v5097_v47, %v1296_v29  ;;  %v1040_v47 = vsel %vm661_vm4, %v5152_v43, 0.0 }
 0x377   :  { %v1302_v33 = vmul.f32 1.442695, %v1300_v31 }
 0x378   :  { %920 = vadd.xlane.f32.xlu0 %v919_v39  ;;  %1038 = vadd.xlane.f32.xlu1 %v1037_v19  ;;  %v1418_v44 = vpop.xlane.xlu1 %1417 }
 0x379   :  { %4420 = vpow2.f32 %v1302_v33  ;;  %v1422_v13 = vsub.f32 %v5101_v40, %v1418_v44 }
 0x37a   :  { %4422 = vpow2.f32 %v1304_v32 }
 0x37b   :  { %4424 = vrcp.f32 %v679_v36  ;;  %v1424_v15 = vmul.f32 1.442695, %v1422_v13 }
 0x37c   :  { %1041 = vadd.xlane.f32.xlu0 %v1040_v47  ;;  %v676_v26 = vpop.xlane.xlu1 %675 }
 0x37d   :  { %4426 = vrcp.f32 %v676_v26 }
 0x37e   :  { %4428 = vpow2.f32 %v1426_v46 }
 0x380   :  { %1190 = vadd.xlane.f32.xlu0 %v1189_v54  ;;  %v1539_v55 = vpop.xlane.xlu1 %1538 }
 0x381   :  { %v1543_v56 = vsub.f32 %v5110_v52, %v1539_v55 }
 0x382   :  { %v5162_v58 = vpop.eup %4418 }
 0x383   :  { %v1545_v60 = vmul.f32 1.442695, %v1543_v56  ;;  %v1186_v62 = vsel %vm661_vm4, %v5162_v58, 0.0 }
 0x384   :  { %1187 = vadd.xlane.f32.xlu1 %v1186_v62 }
 0x385   :  { %4430 = vpow2.f32 %v1545_v60 }
 0x386   :  { %v5166_v63 = vpop.eup %4420  ;;  %4432 = vpow2.f32 %v1547_v59 }
 0x387   :  { %v1306_v41 = vsel %vm661_vm4, %v5166_v63, 0.0  ;;  %v5170_v1 = vpop.eup %4422  ;;  %4434 = vpow2.f32 %v1424_v15 }
 0x388   :  { %1307 = vadd.xlane.f32.xlu0 %v1306_v41  ;;  %v4425_v4 = vpop.eup %4424  ;;  %v1309_v45 = vsel %vm661_vm4, %v5170_v1, 0.0 }
 0x389   :  { %v683_v6 = vmul.f32 %v4425_v4, %v5085_v30 }
 0x38a   :  { %v4427_v52 = vpop.eup %4426 }
 0x38b   :  { %v5174_v49 = vpop.eup %4428  ;;  %v681_v5 = vmul.f32 %v4427_v52, %v5107_v51 }
 0x38c   :  { %1310 = vadd.xlane.f32.xlu0 %v1309_v45  ;;  %v1431_v9 = vsel %vm661_vm4, %v5174_v49, 0.0 }
 0x38d   :  { %v684_v7 = vpack.c.bf16 %v683_v6, %v681_v5 }
 0x38f   :  { %3955 = vmatmul.mubr.msk.bf16.vlgmr.msra.gmra.mxu0 %vm661_vm4, %v684_v7 }
 0x390   :  { %1432 = vadd.xlane.f32.xlu0 %v1431_v9  ;;  %3965 = vmatpush3.bf16.msra.mxu0 %v5135_v20 }
 0x391   :  { %3966 = vmatprep.mubr.msk.bf16.mxu0 %vm4785_vm0, %v4784_v23  ;;  %3976 = vmatprep.subr.bf16.mxu0 %v4784_v23 }
 0x392   :  { %v5184_v10 = vpop.eup %4430 }
 0x393   :  { %v1549_v51 = vsel %vm661_vm4, %v5184_v10, 0.0  ;;  %v5189_v30 = vpop.eup %4432 }
 0x394   :  { %1550 = vadd.xlane.f32.xlu0 %v1549_v51  ;;  %v1552_v12 = vsel %vm661_vm4, %v5189_v30, 0.0  ;;  %v5198_v16 = vpop.eup %4434 }
 0x395   :  { %1318 = vrot.lane.b32.xlu1 %v4993_v11, %s4786_s26  ;;  %v1428_v17 = vsel %vm661_vm4, %v5198_v16, 0.0 }
 0x398   :  { %1553 = vadd.xlane.f32.xlu0 %v1552_v12 }
 0x3ae   :  { %1439 = vrot.lane.b32.xlu0 %v4993_v11, %s5717_s28 }
 0x3b9   :  { %1429 = vadd.xlane.f32.xlu1 %v1428_v17 }
 0x3c8   :  { %v796_v18 = vpop.xlane.xlu1 %795 }
 0x3c9   :  { %4436 = vrcp.f32 %v796_v18 }
 0x3ca   :  { %1560 = vrot.lane.b32.xlu1 %v4993_v11, %s4787_s10 }
 0x3cc   :  { %v799_v14 = vpop.xlane.xlu0 %798  ;;  %v1049_v24 = vpop.permute.xlu1 %1048 }
 0x3cd   :  { %4438 = vrcp.f32 %v799_v14 }
 0x3d0   :  { %v928_v22 = vpop.permute.xlu0 %927 }
 0x3d6   :  { %v4437_v53 = vpop.eup %4436 }
 0x3d7   :  { %v801_v20 = vmul.f32 %v4437_v53, %v5118_v35 }
 0x3da   :  { %v4439_v40 = vpop.eup %4438 }
 0x3db   :  { %v803_v57 = vmul.f32 %v4439_v40, %v5122_v3 }
 0x3dd   :  { %v804_v61 = vpack.c.bf16 %v803_v57, %v801_v20 }
 0x3df   :  { %3967 = vmatmul.mubr.msk.bf16.vlgmr.msra.gmra.mxu0 %vm661_vm4, %v804_v61 }
 0x3e0   :  { %3977 = vmatpush3.bf16.msra.mxu0 %v928_v22  ;;  %3978 = vmatprep.mubr.msk.bf16.mxu0 %vm4785_vm0, %v4784_v23 }
 0x3e1   :  { %3988 = vmatprep.subr.bf16.mxu0 %v4784_v23 }
 0x3fd   :  { %v918_v2 = vpop.xlane.xlu1 %917 }
 0x3fe   :  { %4440 = vrcp.f32 %v918_v2 }
 0x401   :  { %v921_v27 = vpop.xlane.xlu0 %920  ;;  %v1039_v28 = vpop.xlane.xlu1 %1038 }
 0x402   :  { %4442 = vrcp.f32 %v921_v27 }
 0x405   :  { %v1042_v29 = vpop.xlane.xlu0 %1041 }
 0x406   :  { %4444 = vrcp.f32 %v1042_v29 }
 0x407   :  { %4446 = vrcp.f32 %v1039_v28 }
 0x409   :  { %v1191_v3 = vpop.xlane.xlu0 %1190 }
 0x40b   :  { %v4441_v35 = vpop.eup %4440 }
 0x40c   :  { %v923_v39 = vmul.f32 %v4441_v35, %v5137_v21 }
 0x40d   :  { %v1188_v31 = vpop.xlane.xlu1 %1187 }
 0x40e   :  { %4448 = vrcp.f32 %v1188_v31 }
 0x40f   :  { %v4443_v36 = vpop.eup %4442  ;;  %4450 = vrcp.f32 %v1191_v3 }
 0x410   :  { %v925_v32 = vmul.f32 %v4443_v36, %v5139_v25  ;;  %v4312_v36 = vld [vmem:[#allocation8 + $0x38] sm:$0xff]  }
 0x411   :  { %v1308_v42 = vpop.xlane.xlu0 %1307  ;;  %v1319_v59 = vpop.permute.xlu1 %1318  ;;  %4042 = vmatprep.subr.bf16.mxu1 %v4312_v36 }
 0x412   :  { %v926_v33 = vpack.c.bf16 %v925_v32, %v923_v39  ;;  %v4313_v39 = vld [vmem:[#allocation8 + $0x30] sm:$0xff]   ;;  %4043 = vmatpush3.bf16.msra.mxu1 %v4312_v36 }
 0x413   :  { %v4445_v19 = vpop.eup %4444  ;;  %4044 = vmatprep.subr.bf16.mxu1 %v4313_v39 }
 0x414   :  { %3979 = vmatmul.mubr.msk.bf16.vlgmr.msra.gmra.mxu0 %vm661_vm4, %v926_v33  ;;  %v4447_v44 = vpop.eup %4446  ;;  %v1046_v47 = vmul.f32 %v4445_v19, %v5152_v43  ;;  %v4314_v33 = vld [vmem:[#allocation8 + $0x28] sm:$0xff]  }
 0x415   :  { %3989 = vmatpush3.bf16.msra.mxu0 %v1049_v24  ;;  %v1311_v46 = vpop.xlane.xlu0 %1310  ;;  %3990 = vmatprep.mubr.msk.bf16.mxu0 %vm4785_vm0, %v4784_v23  ;;  %v1044_v21 = vmul.f32 %v4447_v44, %v5144_v8 }
 0x416   :  { %4452 = vrcp.f32 %v1311_v46  ;;  %4000 = vmatprep.subr.bf16.mxu0 %v4784_v23  ;;  %4045 = vmatpush3.bf16.msra.mxu1 %v4313_v39  ;;  %v4315_v46 = vld [vmem:[#allocation8 + $0x20] sm:$0xff]  }
 0x417   :  { %4454 = vrcp.f32 %v1308_v42  ;;  %v1047_v50 = vpack.c.bf16 %v1046_v47, %v1044_v21  ;;  %4046 = vmatprep.subr.bf16.mxu1 %v4314_v33 }
 0x419   :  { %v1433_v25 = vpop.xlane.xlu0 %1432 }
 0x41a   :  { %4456 = vrcp.f32 %v1433_v25  ;;  %4047 = vmatpush3.bf16.msra.mxu1 %v4314_v33  ;;  %v4316_v25 = vld [vmem:[#allocation8 + $0x18] sm:$0xff]  }
 0x41b   :  { %v4449_v26 = vpop.eup %4448  ;;  %4048 = vmatprep.subr.bf16.mxu1 %v4315_v46 }
 0x41c   :  { %3991 = vmatmul.mubr.msk.bf16.vlgmr.msra.gmra.mxu0 %vm661_vm4, %v1047_v50  ;;  %v4451_v37 = vpop.eup %4450  ;;  %v1193_v54 = vmul.f32 %v4449_v26, %v5162_v58  ;;  %v4317_v50 = vld [vmem:[#allocation8 + $0x10] sm:$0xff]   ;;  %v4318_v26 = vld [vmem:[#allocation8 + $0x8] sm:$0xff]  }
 0x41d   :  { %4001 = vmatpush3.bf16.msra.mxu0 %v4993_v11  ;;  %4002 = vmatprep.mubr.msk.bf16.mxu0 %vm4785_vm0, %v4784_v23  ;;  %v1551_v55 = vpop.xlane.xlu0 %1550  ;;  %v1195_v43 = vmul.f32 %v4451_v37, %v5156_v48 }
 0x41e   :  { %4012 = vmatprep.subr.bf16.mxu0 %v4784_v23  ;;  %4049 = vmatpush3.bf16.msra.mxu1 %v4315_v46  ;;  %v4553_v46 = vld [vmem:[#allocation2 + $0x8] sm:$0xff] }
 0x41f   :  { %v1196_v56 = vpack.c.bf16 %v1195_v43, %v1193_v54  ;;  %4050 = vmatprep.subr.bf16.mxu1 %v4316_v25 }
 0x421   :  { %v1554_v11 = vpop.xlane.xlu0 %1553 }
 0x422   :  { %4051 = vmatpush3.bf16.msra.mxu1 %v4316_v25 }
 0x423   :  { %v4453_v8 = vpop.eup %4452  ;;  %4052 = vmatprep.subr.bf16.mxu1 %v4317_v50 }
 0x424   :  { %4003 = vmatmul.mubr.msk.bf16.vlgmr.msra.gmra.mxu0 %vm661_vm4, %v1196_v56  ;;  %v4455_v60 = vpop.eup %4454  ;;  %v1315_v62 = vmul.f32 %v4453_v8, %v5170_v1 }
 0x425   :  { %4013 = vmatpush3.bf16.msra.mxu0 %v1319_v59  ;;  %4014 = vmatprep.mubr.msk.bf16.mxu0 %vm4785_vm0, %v4784_v23  ;;  %v1313_v58 = vmul.f32 %v4455_v60, %v5166_v63  ;;  %v1440_v4 = vpop.permute.xlu0 %1439 }
 0x426   :  { %4024 = vmatprep.subr.bf16.mxu0 %v4784_v23  ;;  %4053 = vmatpush3.bf16.msra.mxu1 %v4317_v50  ;;  %v4555_v50 = vld [vmem:[#allocation2 + $0x18] sm:$0xff] }
 0x427   :  { %v1316_v41 = vpack.c.bf16 %v1315_v62, %v1313_v58  ;;  %v4457_v52 = vpop.eup %4456  ;;  %4054 = vmatprep.subr.bf16.mxu1 %v4318_v26 }
 0x428   :  { %v1437_v5 = vmul.f32 %v4457_v52, %v5174_v49 }
 0x42a   :  { %4055 = vmatpush3.bf16.msra.mxu1 %v4318_v26 }
 0x42c   :  { %4015 = vmatmul.mubr.msk.bf16.vlgmr.msra.gmra.mxu0 %vm661_vm4, %v1316_v41 }
 0x42d   :  { %4025 = vmatpush3.bf16.msra.mxu0 %v1440_v4  ;;  %4026 = vmatprep.mubr.msk.bf16.mxu0 %vm4785_vm0, %v4784_v23 }
 0x42e   :  { %4036 = vmatprep.subr.bf16.mxu0 %v4784_v23 }
 0x442   :  { %v1430_v48 = vpop.xlane.xlu1 %1429 }
 0x443   :  { %4458 = vrcp.f32 %v1430_v48 }
 0x444   :  { %4460 = vrcp.f32 %v1554_v11 }
 0x445   :  { %4462 = vrcp.f32 %v1551_v55  ;;  %v4319_v55 = vld [vmem:[#allocation8] sm:$0xff]  }
 0x446   :  { %v1561_v12 = vpop.permute.xlu1 %1560  ;;  %4056 = vmatprep.subr.bf16.mxu1 %v4319_v55 }
 0x447   :  { %4057 = vmatpush3.bf16.msra.mxu1 %v4319_v55  ;;  %v4325_v55 = vld [vmem:[#allocation11 + $0x64] ss:$8 sps:$4 sm:$0xff]  }
 0x44f   :  { %v5235_v1 = vpop.f32.mrf.mxu0 }
 0x450   :  { %v4459_v45 = vpop.eup %4458 }
 0x451   :  { %v1435_v63 = vmul.f32 %v4459_v45, %v5198_v16  ;;  %v3956_v6 = vpop.f32.mrf.mxu0  ;;  %v4461_v9 = vpop.eup %4460 }
 0x452   :  { %v4463_v13 = vpop.eup %4462  ;;  %v1558_v17 = vmul.f32 %v4461_v9, %v5189_v30 }
 0x453   :  { %v1438_v7 = vpack.c.bf16 %v1437_v5, %v1435_v63  ;;  %v5239_v51 = vpop.f32.mrf.mxu0  ;;  %v1556_v16 = vmul.f32 %v4463_v13, %v5184_v10 }
 0x455   :  { %4027 = vmatmul.mubr.msk.bf16.vlgmr.msra.gmra.mxu0 %vm661_vm4, %v1438_v7  ;;  %v3957_v15 = vpop.f32.mrf.mxu0  ;;  %v1559_v18 = vpack.c.bf16 %v1558_v17, %v1556_v16 }
 0x456   :  { %4037 = vmatpush3.bf16.msra.mxu0 %v1561_v12  ;;  %4038 = vmatprep.mubr.msk.bf16.mxu0 %vm4785_vm0, %v4784_v23 }
 0x45d   :  { %4039 = vmatmul.mubr.msk.bf16.vlgmr.msra.gmra.mxu0 %vm661_vm4, %v1559_v18 }
 0x49f   :  { %v846_v49 = vpop.f32.mrf.mxu0 }
 0x4a1   :  { %v3968_v14 = vpop.f32.mrf.mxu0 }
 0x4a3   :  { %v849_v53 = vpop.f32.mrf.mxu0 }
 0x4a4   :  { %v4220_v40 = vpack.i.bf16 %v849_v53, %v846_v49 }
 0x4a5   :  { %v3969_v20 = vpop.f32.mrf.mxu0 }
 0x4a6   :  { %4221 = vrot.lane.b32.xlu1 %v4220_v40, %s4787_s10 }
 0x4d4   :  { %v967_v57 = vpop.f32.mrf.mxu0 }
 0x4d6   :  { %v3980_v61 = vpop.f32.mrf.mxu0 }
 0x4d8   :  { %v970_v22 = vpop.f32.mrf.mxu0 }
 0x4d9   :  { %v4225_v24 = vpack.i.bf16 %v970_v22, %v967_v57 }
 0x4da   :  { %v3981_v2 = vpop.f32.mrf.mxu0 }
 0x4db   :  { %4226 = vrot.lane.b32.xlu1 %v4225_v24, %s5717_s28 }
 0x4dc   :  { %v1088_v30 = vpop.f32.mrf.mxu0 }
 0x4de   :  { %v3992_v27 = vpop.f32.mrf.mxu0 }
 0x4e0   :  { %v1091_v10 = vpop.f32.mrf.mxu0 }
 0x4e1   :  { %v4230_v28 = vpack.i.bf16 %v1091_v10, %v1088_v30 }
 0x4e2   :  { %v3993_v29 = vpop.f32.mrf.mxu0 }
 0x4e3   :  { %4231 = vrot.lane.b32.xlu1 %v4230_v28, %s4786_s26 }
 0x4e4   :  { %v5250_v35 = vpop.f32.mrf.mxu0 }
 0x4e6   :  { %v4004_v3 = vpop.f32.mrf.mxu0 }
 0x4e7   :  { %v3698_v3 = vld [vmem:[%s5687_s5] ss:$0 sm:$0xff] }
 0x4e8   :  { %v5252_v31 = vpop.f32.mrf.mxu0 }
 0x4ea   :  { %v4005_v32 = vpop.f32.mrf.mxu0 }
 0x4eb   :  { %v4552_v32 = vld [vmem:[#allocation2] sm:$0xff] }
 0x4ec   :  { %v1358_v42 = vpop.f32.mrf.mxu0 }
 0x4ee   :  { %v4016_v19 = vpop.f32.mrf.mxu0 }
 0x4f0   :  { %v1361_v44 = vpop.f32.mrf.mxu0 }
 0x4f1   :  { %v4235_v47 = vpack.i.bf16 %v1361_v44, %v1358_v42 }
 0x4f2   :  { %v4017_v21 = vpop.f32.mrf.mxu0 }
 0x4f3   :  { %4236 = vrot.lane.b32.xlu1 %v4235_v47, %s4787_s10  ;;  %v4554_v21 = vld [vmem:[#allocation2 + $0x10] sm:$0xff] }
 0x515   :  { %v1479_v37 = vpop.f32.mrf.mxu0 }
 0x517   :  { %v4028_v54 = vpop.f32.mrf.mxu0 }
 0x518   :  { %v4222_v41 = vpop.permute.xlu1 %4221  ;;  %v4322_v54 = vld [vmem:[#allocation11 + $0x74] ss:$8 sps:$4 sm:$0xff]  }
 0x519   :  { %v1482_v43 = vpop.f32.mrf.mxu0  ;;  %v4224_v48 = vunpack.i.h.bf16 %v4222_v41  ;;  %v4223_v52 = vunpack.i.l.bf16 %v4222_v41  ;;  %2010 = vmatprep.subr.bf16.mxu1 %v4322_v54  ;;  %v3708_v54 = vld [vmem:[%s5689_s7] ss:$0 sm:$0xff] }
 0x51a   :  { %v4240_v56 = vpack.i.bf16 %v1482_v43, %v1479_v37  ;;  %v4320_v37 = vld [vmem:[#allocation11 + $0x70] ss:$8 sps:$4 sm:$0xff]   ;;  %v4323_v43 = vld [vmem:[#allocation11 + $0x60] ss:$8 sps:$4 sm:$0xff]  }
 0x51b   :  { %v4029_v8 = vpop.f32.mrf.mxu0  ;;  %v1120_v6 = vsel %vm613_vm1, %v5239_v51, %v4224_v48  ;;  %v1119_v7 = vsel %vm613_vm1, %v5235_v1, %v4223_v52 }
 0x51c   :  { %4241 = vrot.lane.b32.xlu0 %v4240_v56, %s5717_s28  ;;  %v4328_v56 = vld [vmem:[#allocation11 + $0x54] ss:$8 sps:$4 sm:$0xff]   ;;  %v4326_v8 = vld [vmem:[#allocation11 + $0x50] ss:$8 sps:$4 sm:$0xff]  }
 0x51d   :  { %v1600_v59 = vpop.f32.mrf.mxu0 }
 0x51f   :  { %v4040_v60 = vpop.f32.mrf.mxu0 }
 0x521   :  { %v1603_v11 = vpop.f32.mrf.mxu0 }
 0x522   :  { %v4245_v62 = vpack.i.bf16 %v1603_v11, %v1600_v59 }
 0x523   :  { %v4041_v58 = vpop.f32.mrf.mxu0 }
 0x524   :  { %4246 = vrot.lane.b32.xlu1 %v4245_v62, %s4786_s26 }
 0x54d   :  { %v4227_v4 = vpop.permute.xlu1 %4226 }
 0x54e   :  { %v4229_v45 = vunpack.i.h.bf16 %v4227_v4  ;;  %v4228_v63 = vunpack.i.l.bf16 %v4227_v4 }
 0x550   :  { %v1123_v13 = vsel %vm1121_vm5, %v1120_v6, %v4229_v45  ;;  %v1122_v15 = vsel %vm1121_vm5, %v1119_v7, %v4228_v63 }
 0x555   :  { %v4232_v5 = vpop.permute.xlu1 %4231 }
 0x556   :  { %v4234_v9 = vunpack.i.h.bf16 %v4232_v5  ;;  %v4233_v12 = vunpack.i.l.bf16 %v4232_v5 }
 0x558   :  { %v1125_v17 = vsel %vm1124_vm6, %v1122_v15, %v4233_v12  ;;  %v1126_v16 = vsel %vm1124_vm6, %v1123_v13, %v4234_v9  ;;  %v4329_v13 = vld [vmem:[#allocation10 + $0x38] sm:$0xff]   ;;  %v4332_v15 = vld [vmem:[#allocation11 + $0x44] ss:$8 sps:$4 sm:$0xff]  }
 0x559   :  { %v1637_v18 = vpack.c.bf16 %v1126_v16, %v1125_v17  ;;  %v4330_v17 = vld [vmem:[#allocation11 + $0x40] ss:$8 sps:$4 sm:$0xff]   ;;  %4062 = vmatprep.subr.bf16.mxu0 %v4329_v13  ;;  %v4333_v16 = vld [vmem:[#allocation10 + $0x30] sm:$0xff]  }
 0x55a   :  { %4063 = vmatpush3.bf16.msra.mxu0 %v4329_v13 }
 0x55b   :  { %4058 = vmatprep.mubr.bf16.mxu1 %v1637_v18  ;;  %v4336_v18 = vld [vmem:[#allocation11 + $0x34] ss:$8 sps:$4 sm:$0xff]   ;;  %4064 = vmatprep.subr.bf16.mxu0 %v4333_v16 }
 0x55e   :  { %4065 = vmatpush3.bf16.msra.mxu0 %v4333_v16 }
 0x565   :  { %v4237_v49 = vpop.permute.xlu1 %4236 }
 0x566   :  { %v4239_v53 = vunpack.i.h.bf16 %v4237_v49  ;;  %v4238_v40 = vunpack.i.l.bf16 %v4237_v49  ;;  %v4334_v49 = vld [vmem:[#allocation11 + $0x30] ss:$8 sps:$4 sm:$0xff]  }
 0x568   :  { %v1632_v1 = vsel %vm613_vm1, %v5252_v31, %v4239_v53  ;;  %v1631_v61 = vsel %vm613_vm1, %v5250_v35, %v4238_v40  ;;  %v4340_v53 = vld [vmem:[#allocation11 + $0x24] ss:$8 sps:$4 sm:$0xff]   ;;  %v4338_v40 = vld [vmem:[#allocation11 + $0x20] ss:$8 sps:$4 sm:$0xff]  }
 0x58e   :  { %v4242_v14 = vpop.permute.xlu0 %4241 }
 0x58f   :  { %v4244_v51 = vunpack.i.h.bf16 %v4242_v14  ;;  %v4243_v20 = vunpack.i.l.bf16 %v4242_v14  ;;  %v4337_v14 = vld [vmem:[#allocation10 + $0x28] sm:$0xff]  }
 0x590   :  { %4066 = vmatprep.subr.bf16.mxu0 %v4337_v14 }
 0x591   :  { %v1634_v2 = vsel %vm1121_vm5, %v1632_v1, %v4244_v51  ;;  %v1633_v30 = vsel %vm1121_vm5, %v1631_v61, %v4243_v20  ;;  %4067 = vmatpush3.bf16.msra.mxu0 %v4337_v14  ;;  %v4341_v51 = vld [vmem:[#allocation10 + $0x20] sm:$0xff]   ;;  %v4342_v20 = vld [vmem:[#allocation11 + $0x10] ss:$8 sps:$4 sm:$0xff]  }
 0x592   :  { %v4345_v1 = vld [vmem:[#allocation10 + $0x18] sm:$0xff]   ;;  %v4348_v61 = vld [vmem:[#allocation11 + $0x4] ss:$8 sps:$4 sm:$0xff]   ;;  %4068 = vmatprep.subr.bf16.mxu0 %v4341_v51 }
 0x595   :  { %4069 = vmatpush3.bf16.msra.mxu0 %v4341_v51 }
 0x596   :  { %v4247_v57 = vpop.permute.xlu1 %4246  ;;  %4070 = vmatprep.subr.bf16.mxu0 %v4345_v1 }
 0x597   :  { %v4249_v22 = vunpack.i.h.bf16 %v4247_v57  ;;  %v4248_v24 = vunpack.i.l.bf16 %v4247_v57  ;;  %v4344_v57 = vld [vmem:[#allocation11 + $0x14] ss:$8 sps:$4 sm:$0xff]  }
 0x599   :  { %v1636_v27 = vsel %vm1124_vm6, %v1634_v2, %v4249_v22  ;;  %v1635_v10 = vsel %vm1124_vm6, %v1633_v30, %v4248_v24  ;;  %v4346_v22 = vld [vmem:[#allocation11] ss:$8 sps:$4 sm:$0xff]   ;;  %v348_v24 = vld [vmem:[#allocation5] sm:$0xff]  ;;  %v349_v2 = vld [vmem:[#allocation5 + $0x8] sm:$0xff]  ;;  %4071 = vmatpush3.bf16.msra.mxu0 %v4345_v1 }
 0x59a   :  { %v1638_v28 = vpack.c.bf16 %v1636_v27, %v1635_v10  ;;  %v4349_v30 = vld [vmem:[#allocation10 + $0x10] sm:$0xff]   ;;  %v1813_v27 = vpack.c.bf16 %v349_v2, %v348_v24  ;;  %v4350_v10 = vld [vmem:[#allocation10 + $0x8] sm:$0xff]  }
 0x59b   :  { %4072 = vmatprep.subr.bf16.mxu0 %v4349_v30 }
 0x59c   :  { %4059 = vmatmul.mubr.bf16.vlgmr.msra.gmra.mxu1 %v1638_v28  ;;  %v4351_v28 = vld [vmem:[#allocation10] sm:$0xff]  }
 0x59d   :  { %2042 = vmatprep.mubr.bf16.mxu1 %v4783_v0  ;;  %2011 = vmatpush1.bf16.msra.mxu1 %v4320_v37 }
 0x59e   :  { %2012 = vmatprep.subr.bf16.mxu1 %v4325_v55  ;;  %4073 = vmatpush3.bf16.msra.mxu0 %v4349_v30 }
 0x59f   :  { %4074 = vmatprep.subr.bf16.mxu0 %v4350_v10 }
 0x5a1   :  { %2013 = vmatpush1.bf16.msra.mxu1 %v4323_v43 }
 0x5a2   :  { %2014 = vmatprep.subr.bf16.mxu1 %v4328_v56  ;;  %4075 = vmatpush3.bf16.msra.mxu0 %v4350_v10 }
 0x5a3   :  { %4076 = vmatprep.subr.bf16.mxu0 %v4351_v28 }
 0x5a5   :  { %2015 = vmatpush1.bf16.msra.mxu1 %v4326_v8 }
 0x5a6   :  { %2016 = vmatprep.subr.bf16.mxu1 %v4332_v15  ;;  %4077 = vmatpush3.bf16.msra.mxu0 %v4351_v28 }
 0x5a7   :  { %4082 = vmatprep.subr.bf16.mxu0 %v4784_v23 }
 0x5a9   :  { %2017 = vmatpush1.bf16.msra.mxu1 %v4330_v17 }
 0x5aa   :  { %2018 = vmatprep.subr.bf16.mxu1 %v4336_v18 }
 0x5ad   :  { %2019 = vmatpush1.bf16.msra.mxu1 %v4334_v49 }
 0x5ae   :  { %2020 = vmatprep.subr.bf16.mxu1 %v4340_v53  ;;  %v3709_v53 = vld [vmem:[%s5691_s9] ss:$0 sm:$0xff] }
 0x5b1   :  { %2021 = vmatpush1.bf16.msra.mxu1 %v4338_v40 }
 0x5b2   :  { %2022 = vmatprep.subr.bf16.mxu1 %v4344_v57 }
 0x5b5   :  { %2023 = vmatpush1.bf16.msra.mxu1 %v4342_v20 }
 0x5b6   :  { %2024 = vmatprep.subr.bf16.mxu1 %v4348_v61 }
 0x5b9   :  { %2025 = vmatpush1.bf16.msra.mxu1 %v4346_v22 }
 0x5ba   :  { %4106 = vmatprep.subr.bf16.mxu1 %v4784_v23 }
 0x5bc   :  { %2043 = vmatmul.mubr.bf16.vlgmr.msra.gmra.mxu1 %v1813_v27 }
 0x5bd   :  { %4108 = vmatprep.mubr.msk.bf16.mxu1 %vm4785_vm0, %v4784_v23 }
 0x65c   :  { %v4060_v29 = vpop.f32.mrf.mxu1 }
 0x65d   :  { %v1736_v39 = vadd.f32 %v4060_v29, %v3698_v3 }
 0x65e   :  { %v1727_v35 = vpop.f32.mrf.mxu1 }
 0x65f   :  { %v1728_v31 = vadd.f32 %v3698_v3, %v1727_v35  ;;  %v1744_v25 = vadd.f32 %v4554_v21, %v1736_v39 }
 0x660   :  { %v4061_v36 = vpop.f32.mrf.mxu1 }
 0x661   :  { %v1742_v42 = vadd.f32 %v4552_v32, %v1728_v31  ;;  %v1739_v44 = vadd.f32 %v4061_v36, %v3698_v3 }
 0x662   :  { %v1730_v33 = vpop.f32.mrf.mxu1 }
 0x663   :  { %v1731_v19 = vadd.f32 %v3698_v3, %v1730_v33  ;;  %1746 = vadd.xlane.f32.xlu0 %v1742_v42  ;;  %v1745_v26 = vadd.f32 %v4555_v50, %v1739_v44 }
 0x665   :  { %v1743_v47 = vadd.f32 %v4553_v46, %v1731_v19 }
 0x667   :  { %1748 = vadd.xlane.f32.xlu1 %v1743_v47  ;;  %1750 = vadd.xlane.f32.xlu0 %v1744_v25 }
 0x66b   :  { %1752 = vadd.xlane.f32.xlu0 %v1745_v26 }
 0x6ec   :  { %v1747_v59 = vpop.xlane.xlu0 %1746 }
 0x6ed   :  { %v1755_v60 = vmul.f32 0.0078125, %v1747_v59 }
 0x6ef   :  { %v5277_v11 = vsub.f32 %v1742_v42, %v1755_v60 }
 0x6f0   :  { %v1749_v62 = vpop.xlane.xlu1 %1748  ;;  %v1751_v58 = vpop.xlane.xlu0 %1750 }
 0x6f1   :  { %v1756_v41 = vmul.f32 0.0078125, %v1749_v62  ;;  %v1757_v4 = vmul.f32 0.0078125, %v1751_v58  ;;  %v1763_v48 = vmul.f32 %v5277_v11, %v5277_v11 }
 0x6f3   :  { %v5281_v52 = vsub.f32 %v1743_v47, %v1756_v41  ;;  %v5283_v45 = vsub.f32 %v1744_v25, %v1757_v4  ;;  %1767 = vadd.xlane.f32.xlu1 %v1763_v48  ;;  %v3707_v47 = vld [vmem:[%s5688_s6] ss:$0 sm:$0xff] }
 0x6f4   :  { %v1753_v63 = vpop.xlane.xlu0 %1752  ;;  %v1785_v25 = vmul.f32 %v3707_v47, %v5277_v11 }
 0x6f5   :  { %v1758_v5 = vmul.f32 0.0078125, %v1753_v63  ;;  %v1764_v6 = vmul.f32 %v5281_v52, %v5281_v52  ;;  %v1765_v7 = vmul.f32 %v5283_v45, %v5283_v45  ;;  %v1786_v50 = vmul.f32 %v3707_v47, %v5281_v52 }
 0x6f6   :  { %v1787_v43 = vmul.f32 %v3707_v47, %v5283_v45  ;;  %v274_v45 = vld [vmem:[%s5693_s11] sm:$0x3] }
 0x6f7   :  { %v5289_v9 = vsub.f32 %v1745_v26, %v1758_v5  ;;  %1769 = vadd.xlane.f32.xlu0 %v1764_v6  ;;  %1771 = vadd.xlane.f32.xlu1 %v1765_v7  ;;  %v1923_v63 = vrot.slane %v274_v45, %v4964_v38  ;;  %v1927_v5 = vrot.slane %v274_v45, %v4958_v34  ;;  %v2044_v6 = vpop.f32.mrf.mxu1 }
 0x6f9   :  { %v1766_v12 = vmul.f32 %v5289_v9, %v5289_v9  ;;  %v1788_v8 = vmul.f32 %v3707_v47, %v5289_v9  ;;  %v2046_v7 = vpop.f32.mrf.mxu1  ;;  %v2045_v9 = vadd.f32 %v2044_v6, %v1923_v63 }
 0x6fb   :  { %1773 = vadd.xlane.f32.xlu0 %v1766_v12  ;;  %v2047_v12 = vadd.f32 %v2046_v7, %v1927_v5  ;;  %v2048_v13 = vpop.f32.mrf.mxu1 }
 0x6fc   :  { %v2049_v15 = vadd.f32 %v2048_v13, %v1923_v63 }
 0x6fd   :  { %v2050_v17 = vpop.f32.mrf.mxu1 }
 0x6fe   :  { %v2053_v16 = vpack.c.bf16 %v2049_v15, %v2045_v9  ;;  %v2051_v18 = vadd.f32 %v2050_v17, %v1927_v5 }
 0x700   :  { %v5326_v49 = vpack.c.bf16 %v2051_v18, %v2047_v12  ;;  %v2059_v14 = vsel %vm613_vm1, %v2053_v16, 0 }
 0x702   :  { %v2131_v27 = vsel %vm2129_vm7, %v5326_v49, 0 }
 0x77c   :  { %v1768_v29 = vpop.xlane.xlu1 %1767 }
 0x77d   :  { %v1775_v3 = vmul.f32 0.0078125, %v1768_v29 }
 0x77f   :  { %v1789_v35 = vadd.f32 1e-05, %v1775_v3 }
 0x780   :  { %v1770_v31 = vpop.xlane.xlu0 %1769  ;;  %v1772_v36 = vpop.xlane.xlu1 %1771 }
 0x781   :  { %4464 = vrsqrt.f32 %v1789_v35  ;;  %v1776_v39 = vmul.f32 0.0078125, %v1770_v31  ;;  %v1777_v32 = vmul.f32 0.0078125, %v1772_v36 }
 0x783   :  { %v1790_v42 = vadd.f32 1e-05, %v1776_v39  ;;  %v1791_v33 = vadd.f32 1e-05, %v1777_v32 }
 0x784   :  { %v1774_v19 = vpop.xlane.xlu0 %1773 }
 0x785   :  { %4466 = vrsqrt.f32 %v1790_v42  ;;  %v1778_v44 = vmul.f32 0.0078125, %v1774_v19 }
 0x786   :  { %4468 = vrsqrt.f32 %v1791_v33 }
 0x787   :  { %v1792_v46 = vadd.f32 1e-05, %v1778_v44 }
 0x789   :  { %4470 = vrsqrt.f32 %v1792_v46 }
 0x78e   :  { %v4465_v21 = vpop.eup %4464 }
 0x78f   :  { %v1797_v26 = vmul.f32 %v4465_v21, %v1785_v25  ;;  %v2576_v25 = vrot.slane %v2053_v16, 4 }
 0x791   :  { %v5307_v59 = vadd.f32 %v3708_v54, %v1797_v26  ;;  %v2581_v6 = vsel %vm613_vm1, %v2576_v25, 0 }
 0x792   :  { %v4467_v37 = vpop.eup %4466 }
 0x793   :  { %v4469_v55 = vpop.eup %4468  ;;  %v1798_v56 = vmul.f32 %v4467_v37, %v1786_v50 }
 0x794   :  { %v1799_v62 = vmul.f32 %v4469_v55, %v1787_v43 }
 0x795   :  { %v5309_v60 = vadd.f32 %v3708_v54, %v1798_v56 }
 0x796   :  { %v4471_v11 = vpop.eup %4470  ;;  %v5313_v4 = vadd.f32 %v3708_v54, %v1799_v62 }
 0x797   :  { %v1811_v58 = vpack.c.bf16 %v5309_v60, %v5307_v59  ;;  %v1800_v41 = vmul.f32 %v4471_v11, %v1788_v8 }
 0x799   :  { %4078 = vmatprep.mubr.bf16.mxu0 %v1811_v58  ;;  %v5315_v48 = vadd.f32 %v3708_v54, %v1800_v41 }
 0x79b   :  { %v1812_v52 = vpack.c.bf16 %v5315_v48, %v5313_v4 }
 0x79d   :  { %4079 = vmatmul.mubr.bf16.vlgmr.msra.gmra.mxu0 %v1812_v52 }
 0x79e   :  { %4084 = vmatprep.mubr.msk.bf16.mxu0 %vm4785_vm0, %v4784_v23  ;;  %4083 = vmatpush3.bf16.xpose.msra.mxu0 %v2059_v14 }
 0x79f   :  { %4088 = vmatprep.subr.bf16.mxu0 %v4784_v23 }
 0x85d   :  { %v4080_v40 = vpop.f32.mrf.mxu0 }
 0x85e   :  { %v1911_v51 = vadd.f32 %v4080_v40, %v3709_v53 }
 0x85f   :  { %v1902_v20 = vpop.f32.mrf.mxu0 }
 0x860   :  { %v1903_v22 = vadd.f32 %v3709_v53, %v1902_v20 }
 0x861   :  { %v4081_v57 = vpop.f32.mrf.mxu0 }
 0x862   :  { %v1914_v1 = vadd.f32 %v4081_v57, %v3709_v53 }
 0x863   :  { %v1905_v61 = vpop.f32.mrf.mxu0 }
 0x864   :  { %v5333_v24 = vpack.c.bf16 %v1914_v1, %v1911_v51  ;;  %v1906_v2 = vadd.f32 %v3709_v53, %v1905_v61 }
 0x866   :  { %v1917_v30 = vpack.c.bf16 %v1906_v2, %v1903_v22 }
 0x868   :  { %4085 = vmatmul.mubr.msk.bf16.vlgmr.msra.gmra.mxu0 %vm613_vm1, %v1917_v30 }
 0x869   :  { %4089 = vmatpush3.bf16.msra.mxu0 %v2131_v27  ;;  %4090 = vmatprep.mubr.msk.bf16.mxu0 %vm4785_vm0, %v4784_v23 }
 0x86a   :  { %4094 = vmatprep.subr.bf16.mxu0 %v4784_v23 }
 0x928   :  { %v2095_v10 = vpop.f32.mrf.mxu0 }
 0x929   :  { %v2103_v28 = vsel %vm2102_vm8, %v2095_v10, -inf }
 0x92a   :  { %2104 = vmax.xlane.f32.xlu1 %v2103_v28  ;;  %v4086_v29 = vpop.f32.mrf.mxu0 }
 0x92c   :  { %v2098_v3 = vpop.f32.mrf.mxu0 }
 0x92d   :  { %v2106_v35 = vsel %vm2102_vm8, %v2098_v3, -inf }
 0x92e   :  { %2107 = vmax.xlane.f32.xlu0 %v2106_v35  ;;  %v4087_v31 = vpop.f32.mrf.mxu0 }
 0x9b3   :  { %v2105_v36 = vpop.xlane.xlu1 %2104 }
 0x9b4   :  { %v2109_v39 = vsub.f32 %v2095_v10, %v2105_v36 }
 0x9b6   :  { %v2111_v32 = vmul.f32 1.442695, %v2109_v39 }
 0x9b7   :  { %v2108_v42 = vpop.xlane.xlu0 %2107 }
 0x9b8   :  { %4472 = vpow2.f32 %v2111_v32  ;;  %v2110_v33 = vsub.f32 %v2098_v3, %v2108_v42 }
 0x9ba   :  { %v2113_v19 = vmul.f32 1.442695, %v2110_v33 }
 0x9bc   :  { %4474 = vpow2.f32 %v2113_v19 }
 0x9c5   :  { %v4473_v44 = vpop.eup %4472 }
 0x9c6   :  { %v2115_v46 = vsel %vm2102_vm8, %v4473_v44, 0.0 }
 0x9c7   :  { %2116 = vadd.xlane.f32.xlu1 %v2115_v46 }
 0x9c9   :  { %v4475_v47 = vpop.eup %4474 }
 0x9ca   :  { %v2118_v21 = vsel %vm2102_vm8, %v4475_v47, 0.0 }
 0x9cb   :  { %2119 = vadd.xlane.f32.xlu0 %v2118_v21 }
 0x9d8   :  { %2178 = vrot.lane.b32.xlu1 %v2053_v16, %s4786_s26 }
 0x9dc   :  { %2302 = vrot.lane.b32.xlu1 %v2053_v16, %s5717_s28 }
 0x9e0   :  { %2300 = vrot.lane.b32.xlu1 %v1917_v30, %s5717_s28 }
 0x9e1   :  { %2175 = vrot.lane.b32.xlu0 %v1917_v30, %s4786_s26 }
 0x9e4   :  { %2423 = vrot.lane.b32.xlu1 %v1917_v30, %s4787_s10 }
 0x9e5   :  { %2425 = vrot.lane.b32.xlu0 %v2053_v16, %s4787_s10 }
 0x9e8   :  { %2696 = vrot.lane.b32.xlu1 %v5333_v24, %s4786_s26 }
 0x9e9   :  { %2698 = vrot.lane.b32.xlu0 %v2576_v25, %s4786_s26 }
 0x9ec   :  { %2819 = vrot.lane.b32.xlu1 %v5333_v24, %s5717_s28 }
 0x9ed   :  { %2821 = vrot.lane.b32.xlu0 %v2576_v25, %s5717_s28 }
 0x9f0   :  { %2942 = vrot.lane.b32.xlu1 %v5333_v24, %s4787_s10 }
 0x9f1   :  { %2944 = vrot.lane.b32.xlu0 %v2576_v25, %s4787_s10 }
 0xa50   :  { %v2117_v50 = vpop.xlane.xlu1 %2116 }
 0xa51   :  { %4476 = vrcp.f32 %v2117_v50 }
 0xa54   :  { %v2179_v26 = vpop.permute.xlu1 %2178  ;;  %v2120_v37 = vpop.xlane.xlu0 %2119 }
 0xa55   :  { %4478 = vrcp.f32 %v2120_v37  ;;  %v2184_v63 = vsel %vm613_vm1, %v2179_v26, 0 }
 0xa58   :  { %v2303_v54 = vpop.permute.xlu1 %2302  ;;  %v2176_v55 = vpop.permute.xlu0 %2175 }
 0xa59   :  { %v2308_v43 = vsel %vm613_vm1, %v2303_v54, 0 }
 0xa5a   :  { %4107 = vmatpush3.bf16.xpose.msra.mxu1 %v2308_v43 }
 0xa5b   :  { %4118 = vmatprep.subr.bf16.mxu1 %v4784_v23 }
 0xa5c   :  { %v2426_v56 = vpop.permute.xlu0 %2425  ;;  %v2301_v62 = vpop.permute.xlu1 %2300 }
 0xa5d   :  { %v2431_v11 = vsel %vm613_vm1, %v2426_v56, 0 }
 0xa5e   :  { %v4477_v8 = vpop.eup %4476 }
 0xa5f   :  { %v2122_v41 = vmul.f32 %v4477_v8, %v4473_v44 }
 0xa60   :  { %v2424_v5 = vpop.permute.xlu1 %2423  ;;  %v2699_v7 = vpop.permute.xlu0 %2698 }
 0xa61   :  { %4109 = vmatmul.mubr.msk.bf16.vlgmr.msra.gmra.mxu1 %vm613_vm1, %v2301_v62  ;;  %v2704_v9 = vsel %vm613_vm1, %v2699_v7, 0 }
 0xa62   :  { %v4479_v58 = vpop.eup %4478  ;;  %4119 = vmatpush3.bf16.xpose.msra.mxu1 %v2431_v11  ;;  %4120 = vmatprep.mubr.msk.bf16.mxu1 %vm4785_vm0, %v4784_v23 }
 0xa63   :  { %v2124_v52 = vmul.f32 %v4479_v58, %v4475_v47  ;;  %4130 = vmatprep.subr.bf16.mxu1 %v4784_v23 }
 0xa64   :  { %v2822_v12 = vpop.permute.xlu0 %2821  ;;  %v2697_v13 = vpop.permute.xlu1 %2696 }
 0xa65   :  { %v2125_v45 = vpack.c.bf16 %v2124_v52, %v2122_v41  ;;  %v2827_v15 = vsel %vm613_vm1, %v2822_v12, 0 }
 0xa67   :  { %4091 = vmatmul.mubr.msk.bf16.vlgmr.msra.gmra.mxu0 %vm2102_vm8, %v2125_v45 }
 0xa68   :  { %4095 = vmatpush3.bf16.xpose.msra.mxu0 %v2184_v63  ;;  %4096 = vmatprep.mubr.msk.bf16.mxu0 %vm4785_vm0, %v4784_v23  ;;  %v2945_v17 = vpop.permute.xlu0 %2944  ;;  %v2820_v16 = vpop.permute.xlu1 %2819 }
 0xa69   :  { %4121 = vmatmul.mubr.msk.bf16.vlgmr.msra.gmra.mxu1 %vm613_vm1, %v2424_v5  ;;  %4100 = vmatprep.subr.bf16.mxu0 %v4784_v23  ;;  %v2950_v18 = vsel %vm613_vm1, %v2945_v17, 0 }
 0xa6a   :  { %4131 = vmatpush3.bf16.xpose.msra.mxu1 %v2581_v6  ;;  %4132 = vmatprep.mubr.msk.bf16.mxu1 %vm4785_vm0, %v4784_v23 }
 0xa6b   :  { %4142 = vmatprep.subr.bf16.mxu1 %v4784_v23 }
 0xa6c   :  { %v2943_v14 = vpop.permute.xlu1 %2942 }
 0xa6f   :  { %4097 = vmatmul.mubr.msk.bf16.vlgmr.msra.gmra.mxu0 %vm613_vm1, %v2176_v55 }
 0xa70   :  { %4102 = vmatprep.mubr.msk.bf16.mxu0 %vm4785_vm0, %v4784_v23 }
 0xa71   :  { %4133 = vmatmul.mubr.msk.bf16.vlgmr.msra.gmra.mxu1 %vm613_vm1, %v5333_v24 }
 0xa72   :  { %4143 = vmatpush3.bf16.xpose.msra.mxu1 %v2704_v9  ;;  %4144 = vmatprep.mubr.msk.bf16.mxu1 %vm4785_vm0, %v4784_v23 }
 0xa73   :  { %4154 = vmatprep.subr.bf16.mxu1 %v4784_v23 }
 0xa79   :  { %4145 = vmatmul.mubr.msk.bf16.vlgmr.msra.gmra.mxu1 %vm613_vm1, %v2697_v13 }
 0xa7a   :  { %4155 = vmatpush3.bf16.xpose.msra.mxu1 %v2827_v15  ;;  %4156 = vmatprep.mubr.msk.bf16.mxu1 %vm4785_vm0, %v4784_v23 }
 0xa7b   :  { %4166 = vmatprep.subr.bf16.mxu1 %v4784_v23 }
 0xa81   :  { %4157 = vmatmul.mubr.msk.bf16.vlgmr.msra.gmra.mxu1 %vm613_vm1, %v2820_v16 }
 0xa82   :  { %4167 = vmatpush3.bf16.xpose.msra.mxu1 %v2950_v18  ;;  %4168 = vmatprep.mubr.msk.bf16.mxu1 %vm4785_vm0, %v4784_v23 }
 0xa89   :  { %4169 = vmatmul.mubr.msk.bf16.vlgmr.msra.gmra.mxu1 %vm613_vm1, %v2943_v14 }
 0xb21   :  { %v5396_v53 = vpop.f32.mrf.mxu1 }
 0xb22   :  { %v2351_v36 = vsel %vm2102_vm8, %v5396_v53, -inf }
 0xb23   :  { %v4110_v40 = vpop.f32.mrf.mxu1 }
 0xb25   :  { %v5398_v51 = vpop.f32.mrf.mxu1 }
 0xb26   :  { %v2354_v19 = vsel %vm2102_vm8, %v5398_v51, -inf }
 0xb27   :  { %v5400_v20 = vpop.f32.mrf.mxu0  ;;  %v4111_v57 = vpop.f32.mrf.mxu1 }
 0xb29   :  { %v4092_v1 = vpop.f32.mrf.mxu0  ;;  %v5402_v61 = vpop.f32.mrf.mxu1 }
 0xb2a   :  { %v2474_v44 = vsel %vm2102_vm8, %v5402_v61, -inf }
 0xb2b   :  { %v5404_v22 = vpop.f32.mrf.mxu0  ;;  %v4122_v24 = vpop.f32.mrf.mxu1 }
 0xb2d   :  { %v4093_v2 = vpop.f32.mrf.mxu0  ;;  %v5406_v30 = vpop.f32.mrf.mxu1 }
 0xb2e   :  { %v2477_v21 = vsel %vm2102_vm8, %v5406_v30, -inf }
 0xb2f   :  { %v5408_v27 = vpop.f32.mrf.mxu0  ;;  %v4123_v10 = vpop.f32.mrf.mxu1 }
 0xb30   :  { %v2227_v28 = vsel %vm2102_vm8, %v5408_v27, -inf }
 0xb31   :  { %v5412_v29 = vpop.f32.mrf.mxu1  ;;  %2228 = vmax.xlane.f32.xlu0 %v2227_v28  ;;  %v4098_v3 = vpop.f32.mrf.mxu0 }
 0xb32   :  { %v2624_v25 = vsel %vm2102_vm8, %v5412_v29, -inf }
 0xb33   :  { %v5414_v35 = vpop.f32.mrf.mxu0  ;;  %v4134_v31 = vpop.f32.mrf.mxu1 }
 0xb34   :  { %v2230_v39 = vsel %vm2102_vm8, %v5414_v35, -inf }
 0xb35   :  { %v5420_v32 = vpop.f32.mrf.mxu1  ;;  %2352 = vmax.xlane.f32.xlu0 %v2351_v36  ;;  %2231 = vmax.xlane.f32.xlu1 %v2230_v39  ;;  %v4099_v42 = vpop.f32.mrf.mxu0 }
 0xb36   :  { %v2627_v37 = vsel %vm2102_vm8, %v5420_v32, -inf }
 0xb37   :  { %v4135_v33 = vpop.f32.mrf.mxu1 }
 0xb39   :  { %v2740_v46 = vpop.f32.mrf.mxu1  ;;  %2355 = vmax.xlane.f32.xlu0 %v2354_v19  ;;  %2475 = vmax.xlane.f32.xlu1 %v2474_v44 }
 0xb3a   :  { %v2747_v54 = vsel %vm2102_vm8, %v2740_v46, -inf }
 0xb3b   :  { %v4146_v47 = vpop.f32.mrf.mxu1 }
 0xb3d   :  { %v5430_v50 = vpop.f32.mrf.mxu1  ;;  %2478 = vmax.xlane.f32.xlu0 %v2477_v21  ;;  %2625 = vmax.xlane.f32.xlu1 %v2624_v25 }
 0xb3e   :  { %v2750_v56 = vsel %vm2102_vm8, %v5430_v50, -inf }
 0xb3f   :  { %v4147_v26 = vpop.f32.mrf.mxu1 }
 0xb41   :  { %v5435_v55 = vpop.f32.mrf.mxu1  ;;  %2628 = vmax.xlane.f32.xlu0 %v2627_v37  ;;  %2748 = vmax.xlane.f32.xlu1 %v2747_v54 }
 0xb42   :  { %v2870_v8 = vsel %vm2102_vm8, %v5435_v55, -inf }
 0xb43   :  { %v4158_v43 = vpop.f32.mrf.mxu1 }
 0xb45   :  { %v5441_v62 = vpop.f32.mrf.mxu1  ;;  %2751 = vmax.xlane.f32.xlu0 %v2750_v56  ;;  %2871 = vmax.xlane.f32.xlu1 %v2870_v8 }
 0xb46   :  { %v2873_v58 = vsel %vm2102_vm8, %v5441_v62, -inf }
 0xb47   :  { %v4159_v11 = vpop.f32.mrf.mxu1 }
 0xb49   :  { %v5445_v41 = vpop.f32.mrf.mxu1  ;;  %2874 = vmax.xlane.f32.xlu0 %v2873_v58 }
 0xb4a   :  { %v2993_v52 = vsel %vm2102_vm8, %v5445_v41, -inf }
 0xb4b   :  { %v4170_v45 = vpop.f32.mrf.mxu1  ;;  %2994 = vmax.xlane.f32.xlu1 %v2993_v52 }
 0xb4d   :  { %v5449_v63 = vpop.f32.mrf.mxu1 }
 0xb4e   :  { %v2996_v5 = vsel %vm2102_vm8, %v5449_v63, -inf }
 0xb4f   :  { %v4171_v6 = vpop.f32.mrf.mxu1  ;;  %2997 = vmax.xlane.f32.xlu0 %v2996_v5 }
 0xbba   :  { %v2229_v7 = vpop.xlane.xlu0 %2228 }
 0xbbb   :  { %v2233_v1 = vsub.f32 %v5408_v27, %v2229_v7 }
 0xbbd   :  { %v2235_v31 = vmul.f32 1.442695, %v2233_v1 }
 0xbbe   :  { %v2353_v9 = vpop.xlane.xlu0 %2352  ;;  %v2232_v12 = vpop.xlane.xlu1 %2231 }
 0xbbf   :  { %v2357_v13 = vsub.f32 %v5396_v53, %v2353_v9 }
 0xbc1   :  { %v2359_v15 = vmul.f32 1.442695, %v2357_v13 }
 0xbc2   :  { %v2356_v17 = vpop.xlane.xlu0 %2355  ;;  %v2476_v16 = vpop.xlane.xlu1 %2475 }
 0xbc3   :  { %4480 = vpow2.f32 %v2359_v15  ;;  %v2358_v18 = vsub.f32 %v5398_v51, %v2356_v17  ;;  %v2480_v14 = vsub.f32 %v5402_v61, %v2476_v16 }
 0xbc5   :  { %v2361_v40 = vmul.f32 1.442695, %v2358_v18  ;;  %v2482_v57 = vmul.f32 1.442695, %v2480_v14 }
 0xbc6   :  { %v2479_v24 = vpop.xlane.xlu0 %2478  ;;  %v2626_v2 = vpop.xlane.xlu1 %2625 }
 0xbc7   :  { %4482 = vpow2.f32 %v2361_v40  ;;  %v2481_v10 = vsub.f32 %v5406_v30, %v2479_v24  ;;  %v2630_v28 = vsub.f32 %v5412_v29, %v2626_v2  ;;  %v2234_v29 = vsub.f32 %v5414_v35, %v2232_v12 }
 0xbc8   :  { %4484 = vpow2.f32 %v2482_v57 }
 0xbc9   :  { %v2484_v53 = vmul.f32 1.442695, %v2481_v10  ;;  %v2632_v3 = vmul.f32 1.442695, %v2630_v28  ;;  %v2237_v21 = vmul.f32 1.442695, %v2234_v29 }
 0xbca   :  { %v2629_v36 = vpop.xlane.xlu0 %2628  ;;  %v2749_v39 = vpop.xlane.xlu1 %2748 }
 0xbcb   :  { %4486 = vpow2.f32 %v2484_v53  ;;  %v2631_v51 = vsub.f32 %v5420_v32, %v2629_v36  ;;  %v2753_v61 = vsub.f32 %v2740_v46, %v2749_v39 }
 0xbcc   :  { %4488 = vpow2.f32 %v2632_v3  ;;  %v2647_v3 = vrot.slane %v5326_v49, 4 }
 0xbcd   :  { %v2634_v42 = vmul.f32 1.442695, %v2631_v51  ;;  %v2755_v27 = vmul.f32 1.442695, %v2753_v61  ;;  %4490 = vpow2.f32 %v2235_v31 }
 0xbce   :  { %v2752_v33 = vpop.xlane.xlu0 %2751  ;;  %v2872_v9 = vpop.xlane.xlu1 %2871 }
 0xbcf   :  { %4492 = vpow2.f32 %v2634_v42  ;;  %v2754_v30 = vsub.f32 %v5430_v50, %v2752_v33  ;;  %v2876_v12 = vsub.f32 %v5435_v55, %v2872_v9 }
 0xbd0   :  { %v5461_v19 = vpop.eup %4480  ;;  %4494 = vpow2.f32 %v2755_v27 }
 0xbd1   :  { %v2757_v44 = vmul.f32 1.442695, %v2754_v30  ;;  %v2363_v47 = vsel %vm2102_vm8, %v5461_v19, 0.0  ;;  %v2878_v13 = vmul.f32 1.442695, %v2876_v12 }
 0xbd2   :  { %2364 = vadd.xlane.f32.xlu1 %v2363_v47  ;;  %v2875_v15 = vpop.xlane.xlu0 %2874 }
 0xbd3   :  { %4496 = vpow2.f32 %v2757_v44  ;;  %v2877_v17 = vsub.f32 %v5441_v62, %v2875_v15 }
 0xbd4   :  { %v5466_v32 = vpop.eup %4482  ;;  %4498 = vpow2.f32 %v2237_v21  ;;  %v2995_v16 = vpop.xlane.xlu1 %2994 }
 0xbd5   :  { %v5468_v46 = vpop.eup %4484  ;;  %v2366_v25 = vsel %vm2102_vm8, %v5466_v32, 0.0  ;;  %4500 = vpow2.f32 %v2878_v13  ;;  %v2880_v18 = vmul.f32 1.442695, %v2877_v17  ;;  %v2999_v14 = vsub.f32 %v5445_v41, %v2995_v16 }
 0xbd6   :  { %2367 = vadd.xlane.f32.xlu0 %v2366_v25  ;;  %v2486_v50 = vsel %vm2102_vm8, %v5468_v46, 0.0 }
 0xbd7   :  { %2487 = vadd.xlane.f32.xlu1 %v2486_v50  ;;  %4502 = vpow2.f32 %v2880_v18  ;;  %v3001_v57 = vmul.f32 1.442695, %v2999_v14  ;;  %v2652_v18 = vsel %vm2129_vm7, %v2647_v3, 0 }
 0xbd8   :  { %v5474_v35 = vpop.eup %4486  ;;  %v2998_v40 = vpop.xlane.xlu0 %2997 }
 0xbd9   :  { %v5476_v26 = vpop.eup %4488  ;;  %v2489_v37 = vsel %vm2102_vm8, %v5474_v35, 0.0  ;;  %v3000_v1 = vsub.f32 %v5449_v63, %v2998_v40  ;;  %4504 = vpow2.f32 %v3001_v57 }
 0xbda   :  { %2490 = vadd.xlane.f32.xlu0 %v2489_v37  ;;  %v2636_v54 = vsel %vm2102_vm8, %v5476_v26, 0.0  ;;  %v5482_v43 = vpop.eup %4490 }
 0xbdb   :  { %2637 = vadd.xlane.f32.xlu1 %v2636_v54  ;;  %v2239_v58 = vsel %vm2102_vm8, %v5482_v43, 0.0  ;;  %v3003_v55 = vmul.f32 1.442695, %v3000_v1 }
 0xbdc   :  { %v5484_v56 = vpop.eup %4492 }
 0xbdd   :  { %v2639_v8 = vsel %vm2102_vm8, %v5484_v56, 0.0  ;;  %v5488_v11 = vpop.eup %4494  ;;  %4506 = vpow2.f32 %v3003_v55 }
 0xbde   :  { %2640 = vadd.xlane.f32.xlu0 %v2639_v8  ;;  %v2759_v52 = vsel %vm2102_vm8, %v5488_v11, 0.0 }
 0xbdf   :  { %2240 = vadd.xlane.f32.xlu1 %v2239_v58 }
 0xbe0   :  { %v5494_v45 = vpop.eup %4496 }
 0xbe1   :  { %v2762_v5 = vsel %vm2102_vm8, %v5494_v45, 0.0  ;;  %v4499_v6 = vpop.eup %4498 }
 0xbe2   :  { %2760 = vadd.xlane.f32.xlu0 %v2759_v52  ;;  %v2242_v7 = vsel %vm2102_vm8, %v4499_v6, 0.0  ;;  %v5507_v24 = vpop.eup %4500 }
 0xbe3   :  { %v2882_v2 = vsel %vm2102_vm8, %v5507_v24, 0.0 }
 0xbe4   :  { %v5511_v10 = vpop.eup %4502 }
 0xbe5   :  { %v2885_v62 = vsel %vm2102_vm8, %v5511_v10, 0.0 }
 0xbe6   :  { %2763 = vadd.xlane.f32.xlu0 %v2762_v5  ;;  %v5515_v41 = vpop.eup %4504 }
 0xbe7   :  { %v3005_v63 = vsel %vm2102_vm8, %v5515_v41, 0.0 }
 0xbea   :  { %2243 = vadd.xlane.f32.xlu0 %v2242_v7  ;;  %v5519_v28 = vpop.eup %4506 }
 0xbeb   :  { %v3008_v53 = vsel %vm2102_vm8, %v5519_v28, 0.0 }
 0xbf0   :  { %2251 = vrot.lane.b32.xlu1 %v5326_v49, %s4786_s26 }
 0xc00   :  { %2374 = vrot.lane.b32.xlu0 %v5326_v49, %s5717_s28 }
 0xc14   :  { %2883 = vadd.xlane.f32.xlu1 %v2882_v2 }
 0xc1f   :  { %2886 = vadd.xlane.f32.xlu0 %v2885_v62 }
 0xc23   :  { %3006 = vadd.xlane.f32.xlu0 %v3005_v63 }
 0xc25   :  { %2497 = vrot.lane.b32.xlu1 %v5326_v49, %s4787_s10 }
 0xc27   :  { %3009 = vadd.xlane.f32.xlu0 %v3008_v53 }
 0xc29   :  { %2770 = vrot.lane.b32.xlu1 %v2647_v3, %s4786_s26 }
 0xc2d   :  { %3016 = vrot.lane.b32.xlu1 %v2647_v3, %s4787_s10 }
 0xc3d   :  { %2893 = vrot.lane.b32.xlu0 %v2647_v3, %s5717_s28 }
 0xc5b   :  { %v2365_v31 = vpop.xlane.xlu1 %2364 }
 0xc5f   :  { %v2368_v36 = vpop.xlane.xlu0 %2367 }
 0xc60   :  { %v2488_v39 = vpop.xlane.xlu1 %2487 }
 0xc63   :  { %v2491_v51 = vpop.xlane.xlu0 %2490 }
 0xc64   :  { %v2638_v61 = vpop.xlane.xlu1 %2637 }
 0xc67   :  { %v2641_v42 = vpop.xlane.xlu0 %2640 }
 0xc68   :  { %v2241_v27 = vpop.xlane.xlu1 %2240 }
 0xc69   :  { %4508 = vrcp.f32 %v2241_v27 }
 0xc6b   :  { %v2761_v33 = vpop.xlane.xlu0 %2760 }
 0xc6c   :  { %v2252_v30 = vpop.permute.xlu1 %2251 }
 0xc6d   :  { %v2257_v29 = vsel %vm2129_vm7, %v2252_v30, 0 }
 0xc6e   :  { %4101 = vmatpush3.bf16.msra.mxu0 %v2257_v29 }
 0xc6f   :  { %v2764_v44 = vpop.xlane.xlu0 %2763  ;;  %4112 = vmatprep.subr.bf16.mxu0 %v4784_v23 }
 0xc73   :  { %v2244_v49 = vpop.xlane.xlu0 %2243 }
 0xc74   :  { %4510 = vrcp.f32 %v2244_v49 }
 0xc75   :  { %4512 = vrcp.f32 %v2368_v36 }
 0xc76   :  { %4514 = vrcp.f32 %v2365_v31  ;;  %v4509_v47 = vpop.eup %4508 }
 0xc77   :  { %v2246_v25 = vmul.f32 %v4509_v47, %v5482_v43  ;;  %v2375_v37 = vpop.permute.xlu0 %2374  ;;  %4516 = vrcp.f32 %v2491_v51 }
 0xc78   :  { %v2380_v58 = vsel %vm2129_vm7, %v2375_v37, 0  ;;  %4518 = vrcp.f32 %v2488_v39 }
 0xc79   :  { %4520 = vrcp.f32 %v2641_v42 }
 0xc7a   :  { %4522 = vrcp.f32 %v2638_v61 }
 0xc7b   :  { %4524 = vrcp.f32 %v2764_v44 }
 0xc7c   :  { %4526 = vrcp.f32 %v2761_v33 }
 0xc81   :  { %v4511_v21 = vpop.eup %4510 }
 0xc82   :  { %v2248_v50 = vmul.f32 %v4511_v21, %v4499_v6  ;;  %v4513_v8 = vpop.eup %4512 }
 0xc83   :  { %v4515_v52 = vpop.eup %4514  ;;  %v2372_v5 = vmul.f32 %v4513_v8, %v5466_v32 }
 0xc84   :  { %v2249_v54 = vpack.c.bf16 %v2248_v50, %v2246_v25  ;;  %v2370_v7 = vmul.f32 %v4515_v52, %v5461_v19  ;;  %v4517_v6 = vpop.eup %4516 }
 0xc85   :  { %v4519_v12 = vpop.eup %4518  ;;  %v2495_v32 = vmul.f32 %v4517_v6, %v5474_v35 }
 0xc86   :  { %4103 = vmatmul.mubr.msk.bf16.vlgmr.msra.gmra.mxu0 %vm2102_vm8, %v2249_v54  ;;  %v2373_v43 = vpack.c.bf16 %v2372_v5, %v2370_v7  ;;  %v2493_v15 = vmul.f32 %v4519_v12, %v5468_v46  ;;  %v4521_v16 = vpop.eup %4520 }
 0xc87   :  { %4113 = vmatpush3.bf16.msra.mxu0 %v2380_v58  ;;  %4114 = vmatprep.mubr.msk.bf16.mxu0 %vm4785_vm0, %v4784_v23  ;;  %v4523_v14 = vpop.eup %4522  ;;  %v2645_v40 = vmul.f32 %v4521_v16, %v5484_v56  ;;  %v4354_v58 = vld [vmem:[#allocation13 + $0x28] sm:$0xff]  }
 0xc88   :  { %4124 = vmatprep.subr.bf16.mxu0 %v4784_v23  ;;  %v2496_v17 = vpack.c.bf16 %v2495_v32, %v2493_v15  ;;  %v2643_v46 = vmul.f32 %v4523_v14, %v5476_v26  ;;  %v4525_v2 = vpop.eup %4524  ;;  %v4355_v32 = vld [vmem:[#allocation13 + $0x20] sm:$0xff]  }
 0xc89   :  { %v4527_v63 = vpop.eup %4526  ;;  %v2768_v56 = vmul.f32 %v4525_v2, %v5494_v45 }
 0xc8a   :  { %v2646_v55 = vpack.c.bf16 %v2645_v40, %v2643_v46  ;;  %v2766_v26 = vmul.f32 %v4527_v63, %v5488_v11 }
 0xc8c   :  { %v2769_v31 = vpack.c.bf16 %v2768_v56, %v2766_v26 }
 0xc8e   :  { %4115 = vmatmul.mubr.msk.bf16.vlgmr.msra.gmra.mxu0 %vm2102_vm8, %v2373_v43 }
 0xc8f   :  { %4126 = vmatprep.mubr.msk.bf16.mxu0 %vm4785_vm0, %v4784_v23 }
 0xc9d   :  { %v2884_v9 = vpop.xlane.xlu1 %2883 }
 0xca1   :  { %v2498_v13 = vpop.permute.xlu1 %2497 }
 0xca2   :  { %v2503_v19 = vsel %vm2129_vm7, %v2498_v13, 0 }
 0xca3   :  { %4125 = vmatpush3.bf16.msra.mxu0 %v2503_v19  ;;  %v4356_v19 = vld [vmem:[#allocation13 + $0x18] sm:$0xff]  }
 0xca4   :  { %4136 = vmatprep.subr.bf16.mxu0 %v4784_v23 }
 0xca5   :  { %v2771_v57 = vpop.permute.xlu1 %2770 }
 0xca6   :  { %4127 = vmatmul.mubr.msk.bf16.vlgmr.msra.gmra.mxu0 %vm2102_vm8, %v2496_v17  ;;  %v2776_v62 = vsel %vm2129_vm7, %v2771_v57, 0 }
 0xca7   :  { %4137 = vmatpush3.bf16.msra.mxu0 %v2652_v18  ;;  %4138 = vmatprep.mubr.msk.bf16.mxu0 %vm4785_vm0, %v4784_v23  ;;  %v4357_v18 = vld [vmem:[#allocation13 + $0x10] sm:$0xff]  }
 0xca8   :  { %v2887_v35 = vpop.xlane.xlu0 %2886  ;;  %4148 = vmatprep.subr.bf16.mxu0 %v4784_v23 }
 0xca9   :  { %4528 = vrcp.f32 %v2887_v35  ;;  %v3017_v42 = vpop.permute.xlu1 %3016  ;;  %v4358_v35 = vld [vmem:[#allocation13 + $0x8] sm:$0xff]  }
 0xcaa   :  { %4530 = vrcp.f32 %v2884_v9  ;;  %v3022_v33 = vsel %vm2129_vm7, %v3017_v42, 0 }
 0xcac   :  { %v3007_v1 = vpop.xlane.xlu0 %3006 }
 0xcae   :  { %4139 = vmatmul.mubr.msk.bf16.vlgmr.msra.gmra.mxu0 %vm2102_vm8, %v2646_v55  ;;  %v4359_v55 = vld [vmem:[#allocation13] sm:$0xff]  }
 0xcaf   :  { %4149 = vmatpush3.bf16.msra.mxu0 %v2776_v62  ;;  %4150 = vmatprep.mubr.msk.bf16.mxu0 %vm4785_vm0, %v4784_v23 }
 0xcb0   :  { %v3010_v53 = vpop.xlane.xlu0 %3009  ;;  %4160 = vmatprep.subr.bf16.mxu0 %v4784_v23 }
 0xcb1   :  { %4532 = vrcp.f32 %v3010_v53 }
 0xcb2   :  { %4534 = vrcp.f32 %v3007_v1 }
 0xcb4   :  { %v2894_v3 = vpop.permute.xlu0 %2893 }
 0xcb5   :  { %v2899_v36 = vsel %vm2129_vm7, %v2894_v3, 0 }
 0xcb6   :  { %v4529_v39 = vpop.eup %4528  ;;  %4151 = vmatmul.mubr.msk.bf16.vlgmr.msra.gmra.mxu0 %vm2102_vm8, %v2769_v31 }
 0xcb7   :  { %v4531_v51 = vpop.eup %4530  ;;  %4161 = vmatpush3.bf16.msra.mxu0 %v2899_v36  ;;  %4162 = vmatprep.mubr.msk.bf16.mxu0 %vm4785_vm0, %v4784_v23  ;;  %v2891_v45 = vmul.f32 %v4529_v39, %v5511_v10 }
 0xcb8   :  { %4172 = vmatprep.subr.bf16.mxu0 %v4784_v23  ;;  %v2889_v61 = vmul.f32 %v4531_v51, %v5507_v24 }
 0xcba   :  { %v2892_v11 = vpack.c.bf16 %v2891_v45, %v2889_v61 }
 0xcbe   :  { %v4533_v27 = vpop.eup %4532  ;;  %4163 = vmatmul.mubr.msk.bf16.vlgmr.msra.gmra.mxu0 %vm2102_vm8, %v2892_v11 }
 0xcbf   :  { %v4535_v30 = vpop.eup %4534  ;;  %4173 = vmatpush3.bf16.msra.mxu0 %v3022_v33  ;;  %4174 = vmatprep.mubr.msk.bf16.mxu0 %vm4785_vm0, %v4784_v23  ;;  %v3014_v29 = vmul.f32 %v4533_v27, %v5519_v28  ;;  %v4353_v28 = vld [vmem:[#allocation13 + $0x30] sm:$0xff]  }
 0xcc0   :  { %v3012_v44 = vmul.f32 %v4535_v30, %v5515_v41  ;;  %v4352_v41 = vld [vmem:[#allocation13 + $0x38] sm:$0xff]  }
 0xcc1   :  { %4178 = vmatprep.subr.bf16.mxu1 %v4352_v41 }
 0xcc2   :  { %v3015_v49 = vpack.c.bf16 %v3014_v29, %v3012_v44  ;;  %4179 = vmatpush3.bf16.msra.mxu1 %v4352_v41 }
 0xcc3   :  { %4180 = vmatprep.subr.bf16.mxu1 %v4353_v28 }
 0xcc6   :  { %4175 = vmatmul.mubr.msk.bf16.vlgmr.msra.gmra.mxu0 %vm2102_vm8, %v3015_v49  ;;  %4181 = vmatpush3.bf16.msra.mxu1 %v4353_v28 }
 0xcc7   :  { %3393 = vmatprep.mubr.bf16.mxu0 %v4783_v0  ;;  %4182 = vmatprep.subr.bf16.mxu1 %v4354_v58 }
 0xcca   :  { %4183 = vmatpush3.bf16.msra.mxu1 %v4354_v58 }
 0xccb   :  { %4184 = vmatprep.subr.bf16.mxu1 %v4355_v32 }
 0xcce   :  { %4185 = vmatpush3.bf16.msra.mxu1 %v4355_v32 }
 0xccf   :  { %4186 = vmatprep.subr.bf16.mxu1 %v4356_v19 }
 0xcd2   :  { %4187 = vmatpush3.bf16.msra.mxu1 %v4356_v19 }
 0xcd3   :  { %4188 = vmatprep.subr.bf16.mxu1 %v4357_v18 }
 0xcd6   :  { %4189 = vmatpush3.bf16.msra.mxu1 %v4357_v18 }
 0xcd7   :  { %4190 = vmatprep.subr.bf16.mxu1 %v4358_v35 }
 0xcda   :  { %4191 = vmatpush3.bf16.msra.mxu1 %v4358_v35 }
 0xcdb   :  { %4192 = vmatprep.subr.bf16.mxu1 %v4359_v55 }
 0xcde   :  { %4193 = vmatpush3.bf16.msra.mxu1 %v4359_v55 }
 0xd46   :  { %v2293_v24 = vpop.f32.mrf.mxu0 }
 0xd48   :  { %v4104_v10 = vpop.f32.mrf.mxu0 }
 0xd4a   :  { %v2296_v47 = vpop.f32.mrf.mxu0 }
 0xd4b   :  { %v4250_v21 = vpack.i.bf16 %v2296_v47, %v2293_v24 }
 0xd4c   :  { %v4105_v25 = vpop.f32.mrf.mxu0 }
 0xd4d   :  { %4251 = vrot.lane.b32.xlu1 %v4250_v21, %s4787_s10 }
 0xd4e   :  { %v2416_v50 = vpop.f32.mrf.mxu0 }
 0xd50   :  { %v4116_v37 = vpop.f32.mrf.mxu0 }
 0xd52   :  { %v2419_v54 = vpop.f32.mrf.mxu0 }
 0xd53   :  { %v4255_v23 = vpack.i.bf16 %v2419_v54, %v2416_v50 }
 0xd54   :  { %v4117_v8 = vpop.f32.mrf.mxu0 }
 0xd55   :  { %4256 = vrot.lane.b32.xlu1 %v4255_v23, %s5717_s28 }
 0xd66   :  { %v2539_v52 = vpop.f32.mrf.mxu0 }
 0xd68   :  { %v4128_v5 = vpop.f32.mrf.mxu0 }
 0xd6a   :  { %v2542_v7 = vpop.f32.mrf.mxu0 }
 0xd6b   :  { %v4260_v43 = vpack.i.bf16 %v2542_v7, %v2539_v52 }
 0xd6c   :  { %v4129_v6 = vpop.f32.mrf.mxu0 }
 0xd6d   :  { %4261 = vrot.lane.b32.xlu1 %v4260_v43, %s4786_s26 }
 0xd6e   :  { %v5578_v9 = vpop.f32.mrf.mxu0 }
 0xd70   :  { %v4140_v12 = vpop.f32.mrf.mxu0 }
 0xd71   :  { %v3750_v12 = vld [vmem:[%s5695_s13] ss:$0 sm:$0xff] }
 0xd72   :  { %v2691_v13 = vpop.f32.mrf.mxu0 }
 0xd74   :  { %v4141_v15 = vpop.f32.mrf.mxu0 }
 0xd76   :  { %v2812_v17 = vpop.f32.mrf.mxu0 }
 0xd78   :  { %v4152_v16 = vpop.f32.mrf.mxu0 }
 0xd7a   :  { %v2815_v14 = vpop.f32.mrf.mxu0 }
 0xd7b   :  { %v4265_v40 = vpack.i.bf16 %v2815_v14, %v2812_v17 }
 0xd7c   :  { %v4153_v46 = vpop.f32.mrf.mxu0 }
 0xd7d   :  { %4266 = vrot.lane.b32.xlu1 %v4265_v40, %s4787_s10  ;;  %v4360_v46 = vld [vmem:[#allocation14 + $0x70] ss:$8 sps:$4 sm:$0xff]  }
 0xd7e   :  { %v2935_v57 = vpop.f32.mrf.mxu0 }
 0xd80   :  { %v4164_v1 = vpop.f32.mrf.mxu0 }
 0xd82   :  { %v2938_v2 = vpop.f32.mrf.mxu0 }
 0xd83   :  { %v4270_v62 = vpack.i.bf16 %v2938_v2, %v2935_v57  ;;  %v4362_v57 = vld [vmem:[#allocation14 + $0x74] ss:$8 sps:$4 sm:$0xff]  }
 0xd84   :  { %v4165_v63 = vpop.f32.mrf.mxu0  ;;  %3361 = vmatprep.subr.bf16.mxu0 %v4362_v57 }
 0xd85   :  { %4271 = vrot.lane.b32.xlu0 %v4270_v62, %s5717_s28  ;;  %3362 = vmatpush1.bf16.msra.mxu0 %v4360_v46 }
 0xd86   :  { %v3058_v53 = vpop.f32.mrf.mxu0 }
 0xd88   :  { %v4176_v56 = vpop.f32.mrf.mxu0 }
 0xd8a   :  { %v3061_v26 = vpop.f32.mrf.mxu0 }
 0xd8b   :  { %v4275_v3 = vpack.i.bf16 %v3061_v26, %v3058_v53 }
 0xd8c   :  { %v4177_v31 = vpop.f32.mrf.mxu0 }
 0xd8d   :  { %4276 = vrot.lane.b32.xlu1 %v4275_v3, %s4786_s26 }
 0xdbf   :  { %v4252_v36 = vpop.permute.xlu1 %4251 }
 0xdc0   :  { %v4254_v51 = vunpack.i.h.bf16 %v4252_v36  ;;  %v4253_v45 = vunpack.i.l.bf16 %v4252_v36 }
 0xdc2   :  { %v2571_v27 = vsel %vm613_vm1, %v5404_v22, %v4254_v51  ;;  %v2570_v33 = vsel %vm613_vm1, %v5400_v20, %v4253_v45  ;;  %v4365_v51 = vld [vmem:[#allocation14 + $0x64] ss:$8 sps:$4 sm:$0xff]   ;;  %v4363_v45 = vld [vmem:[#allocation14 + $0x60] ss:$8 sps:$4 sm:$0xff]  }
 0xdc3   :  { %3363 = vmatprep.subr.bf16.mxu0 %v4365_v51  ;;  %v310_v51 = vld [vmem:[%s5699_s17] sm:$0x3] }
 0xdc4   :  { %3364 = vmatpush1.bf16.msra.mxu0 %v4363_v45 }
 0xdc7   :  { %v4257_v39 = vpop.permute.xlu1 %4256 }
 0xdc8   :  { %v4259_v61 = vunpack.i.h.bf16 %v4257_v39  ;;  %v4258_v42 = vunpack.i.l.bf16 %v4257_v39 }
 0xdca   :  { %v2573_v44 = vsel %vm1121_vm5, %v2571_v27, %v4259_v61  ;;  %v2572_v49 = vsel %vm1121_vm5, %v2570_v33, %v4258_v42  ;;  %v4368_v61 = vld [vmem:[#allocation14 + $0x54] ss:$8 sps:$4 sm:$0xff]   ;;  %v4366_v42 = vld [vmem:[#allocation14 + $0x50] ss:$8 sps:$4 sm:$0xff]   ;;  %v4369_v27 = vld [vmem:[#allocation14 + $0x40] ss:$8 sps:$4 sm:$0xff]  }
 0xdcb   :  { %3365 = vmatprep.subr.bf16.mxu0 %v4368_v61  ;;  %v4374_v33 = vld [vmem:[#allocation14 + $0x34] ss:$8 sps:$4 sm:$0xff]   ;;  %v3278_v61 = vrot.slane %v310_v51, %v4958_v34 }
 0xdcc   :  { %3366 = vmatpush1.bf16.msra.mxu0 %v4366_v42  ;;  %v3274_v42 = vrot.slane %v310_v51, %v4964_v38 }
 0xddf   :  { %v4262_v11 = vpop.permute.xlu1 %4261 }
 0xde0   :  { %v4264_v30 = vunpack.i.h.bf16 %v4262_v11  ;;  %v4263_v29 = vunpack.i.l.bf16 %v4262_v11  ;;  %v4371_v11 = vld [vmem:[#allocation14 + $0x44] ss:$8 sps:$4 sm:$0xff]  }
 0xde1   :  { %3367 = vmatprep.subr.bf16.mxu0 %v4371_v11 }
 0xde2   :  { %v2574_v24 = vsel %vm1124_vm6, %v2572_v49, %v4263_v29  ;;  %v2575_v10 = vsel %vm1124_vm6, %v2573_v44, %v4264_v30  ;;  %3368 = vmatpush1.bf16.msra.mxu0 %v4369_v27  ;;  %v4372_v30 = vld [vmem:[#allocation14 + $0x30] ss:$8 sps:$4 sm:$0xff]   ;;  %v4377_v29 = vld [vmem:[#allocation14 + $0x24] ss:$8 sps:$4 sm:$0xff]   ;;  %v4375_v44 = vld [vmem:[#allocation14 + $0x20] ss:$8 sps:$4 sm:$0xff]  }
 0xde3   :  { %v3095_v47 = vpack.c.bf16 %v2575_v10, %v2574_v24  ;;  %3369 = vmatprep.subr.bf16.mxu0 %v4374_v33  ;;  %v4380_v49 = vld [vmem:[#allocation14 + $0x14] ss:$8 sps:$4 sm:$0xff]   ;;  %v4378_v24 = vld [vmem:[#allocation14 + $0x10] ss:$8 sps:$4 sm:$0xff]   ;;  %v4383_v10 = vld [vmem:[#allocation14 + $0x4] ss:$8 sps:$4 sm:$0xff]  }
 0xde5   :  { %4194 = vmatprep.mubr.bf16.mxu1 %v3095_v47  ;;  %v4381_v47 = vld [vmem:[#allocation14] ss:$8 sps:$4 sm:$0xff]  }
 0xde6   :  { %3370 = vmatpush1.bf16.msra.mxu0 %v4372_v30 }
 0xde7   :  { %3371 = vmatprep.subr.bf16.mxu0 %v4377_v29 }
 0xdea   :  { %3372 = vmatpush1.bf16.msra.mxu0 %v4375_v44 }
 0xdeb   :  { %3373 = vmatprep.subr.bf16.mxu0 %v4380_v49 }
 0xdee   :  { %3374 = vmatpush1.bf16.msra.mxu0 %v4378_v24 }
 0xdef   :  { %v4267_v21 = vpop.permute.xlu1 %4266  ;;  %3375 = vmatprep.subr.bf16.mxu0 %v4383_v10 }
 0xdf0   :  { %v4269_v50 = vunpack.i.h.bf16 %v4267_v21  ;;  %v4268_v37 = vunpack.i.l.bf16 %v4267_v21  ;;  %v4384_v21 = vld [vmem:[#allocation16 + $0x78] sm:$0xff]  }
 0xdf1   :  { %3898 = vmatprep.subr.bf16.mxu1 %v4384_v21 }
 0xdf2   :  { %v3090_v20 = vsel %vm613_vm1, %v2691_v13, %v4269_v50  ;;  %v3089_v8 = vsel %vm613_vm1, %v5578_v9, %v4268_v37  ;;  %3376 = vmatpush1.bf16.msra.mxu0 %v4381_v47  ;;  %v4386_v50 = vld [vmem:[#allocation16 + $0x70] sm:$0xff]  }
 0xdf3   :  { %v4387_v37 = vld [vmem:[#allocation16 + $0x30] sm:$0xff]  }
 0xdf7   :  { %v4272_v25 = vpop.permute.xlu0 %4271 }
 0xdf8   :  { %v4274_v22 = vunpack.i.h.bf16 %v4272_v25  ;;  %v4273_v54 = vunpack.i.l.bf16 %v4272_v25  ;;  %v4385_v25 = vld [vmem:[#allocation16 + $0x38] sm:$0xff]  }
 0xdfa   :  { %v3092_v58 = vsel %vm1121_vm5, %v3090_v20, %v4274_v22  ;;  %v3091_v52 = vsel %vm1121_vm5, %v3089_v8, %v4273_v54  ;;  %v4388_v22 = vld [vmem:[#allocation16 + $0x68] sm:$0xff]   ;;  %v4391_v20 = vld [vmem:[#allocation16 + $0x20] sm:$0xff]   ;;  %v4392_v8 = vld [vmem:[#allocation16 + $0x58] sm:$0xff]  }
 0xdfb   :  { %v4389_v54 = vld [vmem:[#allocation16 + $0x28] sm:$0xff]  }
 0xdff   :  { %v4277_v23 = vpop.permute.xlu1 %4276 }
 0xe00   :  { %v4279_v41 = vunpack.i.h.bf16 %v4277_v23  ;;  %v4278_v28 = vunpack.i.l.bf16 %v4277_v23  ;;  %v4390_v23 = vld [vmem:[#allocation16 + $0x60] sm:$0xff]  }
 0xe02   :  { %v3094_v5 = vsel %vm1124_vm6, %v3092_v58, %v4279_v41  ;;  %v3093_v7 = vsel %vm1124_vm6, %v3091_v52, %v4278_v28  ;;  %v4393_v41 = vld [vmem:[#allocation16 + $0x18] sm:$0xff]  }
 0xe03   :  { %v3096_v43 = vpack.c.bf16 %v3094_v5, %v3093_v7 }
 0xe05   :  { %4195 = vmatmul.mubr.bf16.vlgmr.msra.gmra.mxu1 %v3096_v43 }
 0xe06   :  { %3899 = vmatpush3.bf16.msra.mxu1 %v4385_v25 }
 0xe07   :  { %3900 = vmatprep.subr.bf16.mxu1 %v4386_v50 }
 0xe0a   :  { %3901 = vmatpush3.bf16.msra.mxu1 %v4387_v37 }
 0xe0b   :  { %3902 = vmatprep.subr.bf16.mxu1 %v4388_v22 }
 0xe0e   :  { %3903 = vmatpush3.bf16.msra.mxu1 %v4389_v54 }
 0xe0f   :  { %3904 = vmatprep.subr.bf16.mxu1 %v4390_v23 }
 0xe12   :  { %3905 = vmatpush3.bf16.msra.mxu1 %v4391_v20 }
 0xe13   :  { %3906 = vmatprep.subr.bf16.mxu1 %v4392_v8 }
 0xe16   :  { %3907 = vmatpush3.bf16.msra.mxu1 %v4393_v41 }
 0xec5   :  { %v4196_v6 = vpop.f32.mrf.mxu1 }
 0xec6   :  { %v3194_v19 = vadd.f32 %v4196_v6, %v3750_v12 }
 0xec7   :  { %v3185_v32 = vpop.f32.mrf.mxu1 }
 0xec8   :  { %v3186_v13 = vadd.f32 %v3750_v12, %v3185_v32  ;;  %v3202_v18 = vadd.f32 %v3194_v19, %v5313_v4 }
 0xec9   :  { %v4197_v9 = vpop.f32.mrf.mxu1 }
 0xeca   :  { %v3200_v15 = vadd.f32 %v3186_v13, %v5307_v59  ;;  %v3197_v14 = vadd.f32 %v4197_v9, %v3750_v12 }
 0xecb   :  { %v3188_v17 = vpop.f32.mrf.mxu1 }
 0xecc   :  { %v3189_v16 = vadd.f32 %v3750_v12, %v3188_v17  ;;  %3204 = vadd.xlane.f32.xlu0 %v3200_v15  ;;  %v3203_v40 = vadd.f32 %v3197_v14, %v5315_v48 }
 0xece   :  { %v3201_v35 = vadd.f32 %v3189_v16, %v5309_v60 }
 0xed0   :  { %3206 = vadd.xlane.f32.xlu1 %v3201_v35  ;;  %3208 = vadd.xlane.f32.xlu0 %v3202_v18 }
 0xed4   :  { %3210 = vadd.xlane.f32.xlu0 %v3203_v40 }
 0xf55   :  { %v3205_v1 = vpop.xlane.xlu0 %3204 }
 0xf56   :  { %v3212_v55 = vmul.f32 0.0078125, %v3205_v1 }
 0xf58   :  { %v5605_v59 = vsub.f32 %v3200_v15, %v3212_v55  ;;  %v5624_v15 = vld [vmem:[%s5696_s14] ss:$0 sm:$0xff] }
 0xf59   :  { %v3207_v2 = vpop.xlane.xlu1 %3206  ;;  %v3209_v62 = vpop.xlane.xlu0 %3208 }
 0xf5a   :  { %v3213_v63 = vmul.f32 0.0078125, %v3207_v2  ;;  %v3214_v4 = vmul.f32 0.0078125, %v3209_v62  ;;  %v3220_v60 = vmul.f32 %v5605_v59, %v5605_v59  ;;  %v3242_v16 = vmul.f32 %v5624_v15, %v5605_v59 }
 0xf5c   :  { %v5609_v53 = vsub.f32 %v3201_v35, %v3213_v63  ;;  %v5611_v56 = vsub.f32 %v3202_v18, %v3214_v4  ;;  %3224 = vadd.xlane.f32.xlu1 %v3220_v60 }
 0xf5d   :  { %v3211_v48 = vpop.xlane.xlu0 %3210 }
 0xf5e   :  { %v3215_v26 = vmul.f32 0.0078125, %v3211_v48  ;;  %v3221_v3 = vmul.f32 %v5609_v53, %v5609_v53  ;;  %v3222_v31 = vmul.f32 %v5611_v56, %v5611_v56  ;;  %v3243_v18 = vmul.f32 %v5624_v15, %v5609_v53 }
 0xf5f   :  { %v3244_v62 = vmul.f32 %v5624_v15, %v5611_v56  ;;  %v4395_v56 = vld [vmem:[#allocation16 + $0x10] sm:$0xff]  }
 0xf60   :  { %v5617_v36 = vsub.f32 %v3203_v40, %v3215_v26  ;;  %3226 = vadd.xlane.f32.xlu0 %v3221_v3  ;;  %3228 = vadd.xlane.f32.xlu1 %v3222_v31  ;;  %v5633_v40 = vld [vmem:[%s5697_s15] ss:$0 sm:$0xff]  ;;  %v4396_v31 = vld [vmem:[#allocation16 + $0x48] sm:$0xff]  }
 0xf61   :  { %v4394_v3 = vld [vmem:[#allocation16 + $0x50] sm:$0xff]  }
 0xf62   :  { %v3223_v39 = vmul.f32 %v5617_v36, %v5617_v36  ;;  %v3245_v1 = vmul.f32 %v5624_v15, %v5617_v36  ;;  %3908 = vmatprep.subr.bf16.mxu1 %v4394_v3  ;;  %v4397_v36 = vld [vmem:[#allocation16 + $0x8] sm:$0xff]  }
 0xf63   :  { %3909 = vmatpush3.bf16.msra.mxu1 %v4395_v56 }
 0xf64   :  { %3230 = vadd.xlane.f32.xlu0 %v3223_v39  ;;  %3910 = vmatprep.subr.bf16.mxu1 %v4396_v31  ;;  %v4398_v39 = vld [vmem:[#allocation16 + $0x40] sm:$0xff]  }
 0xf67   :  { %3911 = vmatpush3.bf16.msra.mxu1 %v4397_v36 }
 0xf68   :  { %3912 = vmatprep.subr.bf16.mxu1 %v4398_v39 }
 0xfe5   :  { %v3225_v28 = vpop.xlane.xlu1 %3224 }
 0xfe6   :  { %v3232_v58 = vmul.f32 0.0078125, %v3225_v28 }
 0xfe8   :  { %v3246_v52 = vadd.f32 1e-05, %v3232_v58 }
 0xfe9   :  { %v3227_v5 = vpop.xlane.xlu0 %3226  ;;  %v3229_v7 = vpop.xlane.xlu1 %3228 }
 0xfea   :  { %4536 = vrsqrt.f32 %v3246_v52  ;;  %v3233_v43 = vmul.f32 0.0078125, %v3227_v5  ;;  %v3234_v6 = vmul.f32 0.0078125, %v3229_v7 }
 0xfec   :  { %v3247_v12 = vadd.f32 1e-05, %v3233_v43  ;;  %v3248_v32 = vadd.f32 1e-05, %v3234_v6  ;;  %v3777_v6 = vld [vmem:[%s5701_s19] ss:$0 sm:$0xff] }
 0xfed   :  { %v3231_v13 = vpop.xlane.xlu0 %3230  ;;  %s4789_s19 = smov [#allocation17]  }
 0xfee   :  { %4538 = vrsqrt.f32 %v3247_v12  ;;  %v3235_v9 = vmul.f32 0.0078125, %v3231_v13  ;;  %s3642_s8 = sshll.u32 %s4789_s19, 4  ;;  %s3643_s8 = int_to_ptr.vmem [resolvable:$true] %s3642_s8 }
 0xfef   :  { %4540 = vrsqrt.f32 %v3248_v32  ;;  %s4736_s1 = scalar_lea.vmem %s3643_s8, 512  ;;  %p4741_p4 = scmp.lt.s32.totalorder %s3643_s8, %s3643_s8 }
 0xff0   :  { %v3249_v19 = vadd.f32 1e-05, %v3235_v9  ;;  %p4737_p3 = scmp.ne.s32.totalorder %s3643_s8, %s4736_s1  ;;  %p4742_p5 = scmp.lt.s32.totalorder %s4736_s1, %s4736_s1 }
 0xff2   :  { %4542 = vrsqrt.f32 %v3249_v19  ;;  %p4743_p6 = por %p4742_p5, %p4741_p4 }
 0xff4   :  { %p4744_p7 = pnand %p4743_p6, %p4737_p3 }
 0xff7   :  { %v4537_v17 = vpop.eup %4536 }
 0xff8   :  { %v3254_v14 = vmul.f32 %v4537_v17, %v3242_v16 }
 0xffa   :  { %v5638_v55 = vadd.f32 %v5633_v40, %v3254_v14 }
 0xffb   :  { %v4539_v35 = vpop.eup %4538 }
 0xffc   :  { %v3255_v46 = vmul.f32 %v4539_v35, %v3243_v18  ;;  %v4541_v57 = vpop.eup %4540 }
 0xffd   :  { %v3256_v60 = vmul.f32 %v4541_v57, %v3244_v62 }
 0xffe   :  { %v5641_v59 = vadd.f32 %v5633_v40, %v3255_v46 }
 0xfff   :  { %v4543_v2 = vpop.eup %4542  ;;  %v5652_v48 = vadd.f32 %v5633_v40, %v3256_v60 }
0x1000   :  { %v3268_v63 = vpack.c.bf16 %v5641_v59, %v5638_v55  ;;  %v3257_v4 = vmul.f32 %v4543_v2, %v3245_v1 }
0x1002   :  { %3394 = vmatmul.mubr.bf16.vlgmr.msra.gmra.mxu0 %v3268_v63  ;;  %v5649_v53 = vadd.f32 %v5633_v40, %v3257_v4 }
0x1003   :  { %3403 = vmatprep.mubr.bf16.mxu0 %v4783_v0  ;;  %v4399_v0 = vld [vmem:[#allocation16] sm:$0xff]  }
0x1004   :  { %v3269_v26 = vpack.c.bf16 %v5649_v53, %v5652_v48  ;;  %3913 = vmatpush3.bf16.msra.mxu1 %v4399_v0 }
0x100a   :  { %3404 = vmatmul.mubr.bf16.gmra.mxu0 %v3269_v26 }
0x10c2   :  { %v3395_v45 = vpop.f32.mrf.mxu0 }
0x10c3   :  { %v3396_v29 = vadd.f32 %v3395_v45, %v3274_v42 }
0x10c4   :  { %v3397_v11 = vpop.f32.mrf.mxu0 }
0x10c5   :  { %v3398_v33 = vadd.f32 %v3397_v11, %v3278_v61  ;;  %v3414_v25 = vmax.f32 %v3396_v29, 0.0 }
0x10c6   :  { %v3399_v27 = vpop.f32.mrf.mxu0 }
0x10c7   :  { %v3400_v30 = vadd.f32 %v3399_v27, %v3274_v42  ;;  %v3415_v47 = vmax.f32 %v3398_v33, 0.0 }
0x10c8   :  { %v3401_v44 = vpop.f32.mrf.mxu0 }
0x10c9   :  { %v3402_v49 = vadd.f32 %v3401_v44, %v3278_v61  ;;  %v3416_v24 = vmax.f32 %v3400_v30, 0.0 }
0x10ca   :  { %v3405_v10 = vpop.f32.mrf.mxu0 }
0x10cb   :  { %v3417_v21 = vmax.f32 %v3402_v49, 0.0  ;;  %v3422_v22 = vpack.c.bf16 %v3416_v24, %v3414_v25  ;;  %v3406_v38 = vadd.f32 %v3405_v10, %v3274_v42 }
0x10cc   :  { %v3407_v50 = vpop.f32.mrf.mxu0 }
0x10cd   :  { %v3423_v37 = vpack.c.bf16 %v3417_v21, %v3415_v47  ;;  %v3408_v23 = vadd.f32 %v3407_v50, %v3278_v61  ;;  %v3418_v52 = vmax.f32 %v3406_v38, 0.0 }
0x10ce   :  { %v3409_v54 = vpop.f32.mrf.mxu0 }
0x10cf   :  { %v3410_v34 = vadd.f32 %v3409_v54, %v3274_v42  ;;  %3560 = vmatprep.mubr.bf16.mxu1 %v3423_v37  ;;  %v3419_v28 = vmax.f32 %v3408_v23, 0.0 }
0x10d0   :  { %v3411_v20 = vpop.f32.mrf.mxu0  ;;  %3561 = vmatmul.mubr.bf16.vlgmr.msra.gmra.mxu1 %v3422_v22 }
0x10d1   :  { %v3412_v8 = vadd.f32 %v3411_v20, %v3278_v61  ;;  %v3420_v41 = vmax.f32 %v3410_v34, 0.0 }
0x10d3   :  { %v3421_v58 = vmax.f32 %v3412_v8, 0.0  ;;  %v3424_v7 = vpack.c.bf16 %v3420_v41, %v3418_v52 }
0x10d5   :  { %v3425_v5 = vpack.c.bf16 %v3421_v58, %v3419_v28 }
0x10d7   :  { %3568 = vmatprep.mubr.bf16.mxu1 %v3425_v5 }
0x10d8   :  { %3569 = vmatmul.mubr.bf16.gmra.mxu1 %v3424_v7 }
0x1190   :  { %v3914_v43 = vpop.f32.mrf.mxu1 }
0x1192   :  { %v3915_v12 = vpop.f32.mrf.mxu1 }
0x1193   :  { %v3916_v32 = vadd.f32 %v3915_v12, %v3914_v43 }
0x1194   :  { %v3917_v13 = vpop.f32.mrf.mxu1 }
0x1195   :  { %v3563_v9 = vadd.f32 %v3916_v32, %v3777_v6 }
0x1196   :  { %v3918_v19 = vpop.f32.mrf.mxu1 }
0x1197   :  { %v3919_v17 = vadd.f32 %v3918_v19, %v3917_v13  ;;  %v3577_v16 = vadd.f32 %v3563_v9, %v5638_v55 }
0x1198   :  { %v3920_v18 = vpop.f32.mrf.mxu1 }
0x1199   :  { %v3566_v14 = vadd.f32 %v3919_v17, %v3777_v6  ;;  %3581 = vadd.xlane.f32.xlu1 %v3577_v16 }
0x119a   :  { %v3921_v35 = vpop.f32.mrf.mxu1 }
0x119b   :  { %v3922_v46 = vadd.f32 %v3921_v35, %v3920_v18  ;;  %v3578_v57 = vadd.f32 %v3566_v14, %v5641_v59 }
0x119c   :  { %v3923_v1 = vpop.f32.mrf.mxu1 }
0x119d   :  { %v3571_v2 = vadd.f32 %v3922_v46, %v3777_v6  ;;  %3583 = vadd.xlane.f32.xlu0 %v3578_v57 }
0x119e   :  { %v3924_v62 = vpop.f32.mrf.mxu1 }
0x119f   :  { %v3925_v63 = vadd.f32 %v3924_v62, %v3923_v1  ;;  %v3579_v4 = vadd.f32 %v3571_v2, %v5652_v48 }
0x11a1   :  { %v3574_v60 = vadd.f32 %v3925_v63, %v3777_v6  ;;  %3585 = vadd.xlane.f32.xlu1 %v3579_v4 }
0x11a3   :  { %v3580_v26 = vadd.f32 %v3574_v60, %v5649_v53 }
0x11a5   :  { %3587 = vadd.xlane.f32.xlu0 %v3580_v26 }
0x1222   :  { %v3582_v55 = vpop.xlane.xlu1 %3581 }
0x1223   :  { %v3589_v3 = vmul.f32 0.0078125, %v3582_v55 }
0x1225   :  { %v3593_v56 = vsub.f32 %v3577_v16, %v3589_v3 }
0x1226   :  { %v3584_v31 = vpop.xlane.xlu0 %3583 }
0x1227   :  { %v3590_v36 = vmul.f32 0.0078125, %v3584_v31  ;;  %v3597_v39 = vmul.f32 %v3593_v56, %v3593_v56  ;;  %v3613_v22 = vmul.f32 %v5624_v15, %v3593_v56 }
0x1229   :  { %v3594_v0 = vsub.f32 %v3578_v57, %v3590_v36  ;;  %3601 = vadd.xlane.f32.xlu1 %v3597_v39 }
0x122a   :  { %v3586_v59 = vpop.xlane.xlu1 %3585 }
0x122b   :  { %v3591_v51 = vmul.f32 0.0078125, %v3586_v59  ;;  %v3598_v45 = vmul.f32 %v3594_v0, %v3594_v0  ;;  %v3614_v34 = vmul.f32 %v5624_v15, %v3594_v0 }
0x122d   :  { %v3595_v61 = vsub.f32 %v3579_v4, %v3591_v51  ;;  %3603 = vadd.xlane.f32.xlu0 %v3598_v45 }
0x122e   :  { %v3588_v42 = vpop.xlane.xlu0 %3587 }
0x122f   :  { %v3592_v48 = vmul.f32 0.0078125, %v3588_v42  ;;  %v3599_v11 = vmul.f32 %v3595_v61, %v3595_v61  ;;  %v3615_v41 = vmul.f32 %v5624_v15, %v3595_v61 }
0x1231   :  { %v3596_v27 = vsub.f32 %v3580_v26, %v3592_v48  ;;  %3605 = vadd.xlane.f32.xlu1 %v3599_v11 }
0x1233   :  { %v3600_v53 = vmul.f32 %v3596_v27, %v3596_v27  ;;  %v3616_v5 = vmul.f32 %v5624_v15, %v3596_v27 }
0x1235   :  { %3607 = vadd.xlane.f32.xlu0 %v3600_v53 }
0x12b2   :  { %v3602_v33 = vpop.xlane.xlu1 %3601 }
0x12b3   :  { %v3609_v30 = vmul.f32 0.0078125, %v3602_v33 }
0x12b5   :  { %v3617_v29 = vadd.f32 1e-05, %v3609_v30 }
0x12b6   :  { %v3604_v44 = vpop.xlane.xlu0 %3603 }
0x12b7   :  { %4544 = vrsqrt.f32 %v3617_v29  ;;  %v3610_v49 = vmul.f32 0.0078125, %v3604_v44 }
0x12b9   :  { %v3618_v24 = vadd.f32 1e-05, %v3610_v49 }
0x12ba   :  { %v3606_v10 = vpop.xlane.xlu1 %3605 }
0x12bb   :  { %4546 = vrsqrt.f32 %v3618_v24  ;;  %v3611_v47 = vmul.f32 0.0078125, %v3606_v10 }
0x12bd   :  { %v3619_v21 = vadd.f32 1e-05, %v3611_v47 }
0x12be   :  { %v3608_v25 = vpop.xlane.xlu0 %3607 }
0x12bf   :  { %4548 = vrsqrt.f32 %v3619_v21  ;;  %v3612_v50 = vmul.f32 0.0078125, %v3608_v25 }
0x12c1   :  { %v3620_v37 = vadd.f32 1e-05, %v3612_v50 }
0x12c3   :  { %4550 = vrsqrt.f32 %v3620_v37 }
0x12c4   :  { %v4545_v54 = vpop.eup %4544 }
0x12c5   :  { %v3625_v23 = vmul.f32 %v4545_v54, %v3613_v22 }
0x12c7   :  { %v3629_v38 = vadd.f32 %v5633_v40, %v3625_v23 }
0x12c8   :  { %v4547_v20 = vpop.eup %4546 }
0x12c9   :  { %v3626_v8 = vmul.f32 %v4547_v20, %v3614_v34  ;;  %3633 = vst [vmem:[#allocation17] sm:$0xff] %v3629_v38 }
0x12cb   :  { %v3630_v28 = vadd.f32 %v5633_v40, %v3626_v8 }
0x12cc   :  { %v4549_v58 = vpop.eup %4548 }
0x12cd   :  { %v3627_v52 = vmul.f32 %v4549_v58, %v3615_v41  ;;  %3634 = vst [vmem:[#allocation17 + $0x8] sm:$0xff] %v3630_v28 }
0x12cf   :  { %v3631_v7 = vadd.f32 %v5633_v40, %v3627_v52 }
0x12d0   :  { %v4551_v43 = vpop.eup %4550 }
0x12d1   :  { %v3628_v6 = vmul.f32 %v4551_v43, %v3616_v5  ;;  %3635 = vst [vmem:[#allocation17 + $0x10] sm:$0xff] %v3631_v7 }
0x12d3   :  { %v3632_v12 = vadd.f32 %v5633_v40, %v3628_v6 }
0x12d5   :  { %3636 = vst [vmem:[#allocation17 + $0x18] sm:$0xff] %v3632_v12 }
0x12d6   :  { %4747 = shalt.err (!%p4744_p7)
}
0x12d7   :  { %3648 = dma.vmem_to_hbm [thread:$0]  %s3643_s8, 512, %s5702_s20, [#allocation4], %s4770_s25, %s4770_s25, %s4771_s3  }
0x12d8   :  { %4766 = dma.done.wait [#allocation4], 512  }
0x12d9   :  { %4767 = vsyncadd [#allocation4], 4294966784 }
0x12da   :  { %3652 = vsyncpa [#allocation3], 1 }
0x12db   :  { %3653 = vsyncpa [#allocation6], 1 }
0x12dc   :  { %3654 = vsyncpa [#allocation9], 1 }
0x12dd   :  { %3655 = vsyncpa [#allocation12], 1 }
0x12de   :  { %3656 = vsyncpa [#allocation15], 1 }
0x12df   :  { %3657 = vsyncpa [#allocation4], 1 }

</bundles_post_ra>
